<compile_context>
chip_gen: v6e
topology: v6e:2x2x1
jax: 0.10.0
libtpu: 0.0.40
codegen_flags: <defaults>
</compile_context>

<pallas_src>
import functools

import jax
import jax.numpy as jnp
from jax import lax
from jax.experimental import pallas as pl
from jax.experimental.pallas import tpu as pltpu


# Packed head layout (lane offsets inside the 128-wide fused head output).
_MOVE_DIM = 5
_COMM_DIM = 10
_VAL_DIM = 1
_HEAD_PAD = 128  # lane-dense width for the fused head matmul / packed output
_MOVE_LO, _MOVE_HI = 0, _MOVE_DIM
_COMM_LO, _COMM_HI = _MOVE_HI, _MOVE_HI + _COMM_DIM
_VAL_COL = _COMM_HI  # single critic column


def _round_up(x, m):
    return ((x + m - 1) // m) * m


def _selu(x):
    # torch.nn.SELU constants
    alpha = 1.6732632423543772848170429916717
    scale = 1.0507009873554804934193349852946
    return scale * jnp.where(x > 0, x, alpha * (jnp.exp(x) - 1.0))


def _make_kernel(num_layers):
    """Kernel body for a given (static) number of trunk layers."""

    def kernel(*refs):
        # refs: x, (W_i, b_i) * num_layers, head_w, head_b, out
        x_ref = refs[0]
        out_ref = refs[-1]

        h = x_ref[...]
        idx = 1
        for _ in range(num_layers):
            w = refs[idx][...]
            b = refs[idx + 1][...]
            idx += 2
            h = _selu(jnp.dot(h, w, preferred_element_type=jnp.float32) + b)

        head_w = refs[idx][...]      # (num_filters, 128), zero-padded
        head_b = refs[idx + 1][...]  # (1, 128), zero-padded

        # Single fused head matmul: lanes [0:5]=action, [5:15]=comm, [15]=critic.
        logits = jnp.dot(h, head_w, preferred_element_type=jnp.float32) + head_b

        col = lax.broadcasted_iota(jnp.int32, logits.shape, 1)
        is_move = col < _MOVE_HI
        is_comm = (col >= _COMM_LO) & (col < _COMM_HI)
        is_val = col == _VAL_COL

        # Fused segmented softmax: one exp over the whole (TB, 128) tile.
        move_max = jnp.max(jnp.where(is_move, logits, -jnp.inf), axis=-1, keepdims=True)
        comm_max = jnp.max(jnp.where(is_comm, logits, -jnp.inf), axis=-1, keepdims=True)
        # Per-lane shift: move lanes -> move_max, comm lanes -> comm_max,
        # value/pad lanes -> +inf so exp() is exactly zero there.
        shift = jnp.where(is_move, move_max, jnp.where(is_comm, comm_max, jnp.inf))
        e = jnp.exp(logits - shift)

        move_sum = jnp.sum(jnp.where(is_move, e, 0.0), axis=-1, keepdims=True)
        comm_sum = jnp.sum(jnp.where(is_comm, e, 0.0), axis=-1, keepdims=True)

        # Exact reciprocal (plain division): the kernel is DMA-bound so the
        # extra precision is free, and softmax rows sum to 1 exactly.
        scale = jnp.where(is_move, 1.0 / move_sum,
                          jnp.where(is_comm, 1.0 / comm_sum, 0.0))

        # One lane-dense packed store: [move(5) | comm(10) | value(1) | zeros].
        out = e * scale + jnp.where(is_val, logits, 0.0)
        out_ref[...] = out.astype(out_ref.dtype)

    return kernel


def init_params(key, in_features, num_layers, num_filters):
    """Deterministic synthetic parameters, PyTorch Linear shape convention (out, in)."""
    params = {}
    d = in_features
    for i in range(num_layers):
        key, kw, kb = jax.random.split(key, 3)
        params[f"fcc_{i}_w"] = 0.05 * jax.random.normal(kw, (num_filters, d), jnp.float32)
        params[f"fcc_{i}_b"] = 0.05 * jax.random.normal(kb, (num_filters,), jnp.float32)
        d = num_filters
    for name, out_dim in (("action", _MOVE_DIM), ("comm", _COMM_DIM), ("critic", _VAL_DIM)):
        key, kw, kb = jax.random.split(key, 3)
        params[f"{name}_w"] = 0.05 * jax.random.normal(kw, (out_dim, d), jnp.float32)
        params[f"{name}_b"] = 0.05 * jax.random.normal(kb, (out_dim,), jnp.float32)
    return params


def pack_params(params, num_layers, *, x_dtype=jnp.float32):
    """One-time layout prep: transpose trunk weights to (in, out), fuse the three
    heads into a single zero-padded (num_filters, 128) weight + (1, 128) bias.
    If x_dtype=bfloat16, the first-layer weight (the only large-K weight) is
    stored in bf16 so the big x@w0 dot runs natively on the MXU."""
    packed = {}
    for i in range(num_layers):
        w = jnp.asarray(params[f"fcc_{i}_w"], jnp.float32).T          # (in, out)
        if i == 0:
            w = w.astype(x_dtype)
        packed[f"w{i}"] = w
        packed[f"b{i}"] = jnp.asarray(params[f"fcc_{i}_b"], jnp.float32).reshape(1, -1)

    d = params["action_w"].shape[1]
    head_w = jnp.zeros((d, _HEAD_PAD), jnp.float32)
    head_w = head_w.at[:, _MOVE_LO:_MOVE_HI].set(params["action_w"].T)
    head_w = head_w.at[:, _COMM_LO:_COMM_HI].set(params["comm_w"].T)
    head_w = head_w.at[:, _VAL_COL:_VAL_COL + 1].set(params["critic_w"].T)

    head_b = jnp.zeros((1, _HEAD_PAD), jnp.float32)
    head_b = head_b.at[0, _MOVE_LO:_MOVE_HI].set(params["action_b"])
    head_b = head_b.at[0, _COMM_LO:_COMM_HI].set(params["comm_b"])
    head_b = head_b.at[0, _VAL_COL:_VAL_COL + 1].set(params["critic_b"])

    packed["head_w"] = head_w
    packed["head_b"] = head_b
    return packed


def _choose_tb(batch, in_features, x_itemsize):
    """Batch tile size: big (HBM-roofline) tiles, >= 2 grid steps when possible
    (both v7x TensorCores busy), sublane-aligned, within a VMEM budget."""
    sublane = 16 if x_itemsize < 4 else 8
    if batch <= sublane:
        tb = sublane
    else:
        half = -(-batch // 2)                     # >= 2 grid steps
        tb = min(1024, _round_up(half, sublane))  # 512-1024 rows hit ~85% of HBM roofline

    def tile_bytes(t):
        # double-buffered x tile + double-buffered packed output tile
        return 2 * t * in_features * x_itemsize + 2 * t * _HEAD_PAD * 4

    while tb > sublane and tile_bytes(tb) > (40 << 20):   # keep under ~40 MiB (v7x VMEM)
        tb = max(sublane, _round_up(tb // 2, sublane))
    return tb


@functools.partial(jax.jit, static_argnames=("num_layers",))
def policy_network_shared_forward(x, packed_params, num_layers):
    B = x.shape[0]
    x_dtype = packed_params["w0"].dtype
    # NOTE: ideally the producer already emits x in this dtype (e.g. bf16) so
    # this cast is not a separate HBM pass; the kernel's dominant DMA is still
    # halved either way when x_dtype is bf16.
    x_flat = x.reshape(B, -1).astype(x_dtype)
    in_features = x_flat.shape[1]
    x_itemsize = x_flat.dtype.itemsize

    TB = _choose_tb(B, in_features, x_itemsize)
    # No explicit jnp.pad (that was an extra full HBM read+write pass over x):
    # Pallas handles the ragged tail block; garbage tail rows are never returned
    # because out_shape is exactly (B, 128).
    grid = (pl.cdiv(B, TB),)

    # Operands: x tile (blocked over batch) + weights/biases (grid-invariant,
    # whole-array blocks -> fetched once, stay VMEM-resident).
    weight_args = []
    for i in range(num_layers):
        weight_args.append(packed_params[f"w{i}"])
        weight_args.append(packed_params[f"b{i}"])
    weight_args.append(packed_params["head_w"])
    weight_args.append(packed_params["head_b"])

    in_specs = [pl.BlockSpec((TB, in_features), lambda i: (i, 0))]
    in_specs += [pl.BlockSpec(a.shape, lambda i: (0, 0)) for a in weight_args]

    out_shape = jax.ShapeDtypeStruct((B, _HEAD_PAD), jnp.float32)
    out_specs = pl.BlockSpec((TB, _HEAD_PAD), lambda i: (i, 0))

    # Explicit VMEM budget: double-buffered tiles + (double-buffered) weights
    # + headroom.  Floor 32 MiB (above v5e's 16 MiB scoped default), cap 48 MiB
    # (v7x only has 64 MiB physical VMEM).
    weight_bytes = sum(int(a.size) * a.dtype.itemsize for a in weight_args)
    vmem_budget = (2 * TB * in_features * x_itemsize
                   + 2 * TB * _HEAD_PAD * 4
                   + 2 * weight_bytes + (8 << 20))
    vmem_limit = int(min(max(vmem_budget, 32 << 20), 48 << 20))

    packed_out = pl.pallas_call(
        _make_kernel(num_layers),
        grid=grid,
        in_specs=in_specs,
        out_specs=out_specs,
        out_shape=out_shape,
        compiler_params=pltpu.CompilerParams(
            dimension_semantics=("parallel",),
            vmem_limit_bytes=vmem_limit,
        ),
    )(x_flat, *weight_args)

    # Split the lane-dense packed output in the wrapper.
    move = packed_out[:, _MOVE_LO:_MOVE_HI]
    comm = packed_out[:, _COMM_LO:_COMM_HI]
    value = packed_out[:, _VAL_COL:_VAL_COL + 1]
    return move, comm, value


def _reference_forward(x, params, num_layers):
    """Pure-JAX reference (PyTorch weight convention) for correctness checking."""
    h = x.reshape(x.shape[0], -1).astype(jnp.float32)
    for i in range(num_layers):
        h = _selu(h @ params[f"fcc_{i}_w"].T + params[f"fcc_{i}_b"])
    move = jax.nn.softmax(h @ params["action_w"].T + params["action_b"], axis=1)
    comm = jax.nn.softmax(h @ params["comm_w"].T + params["comm_b"], axis=1)
    value = h @ params["critic_w"].T + params["critic_b"]
    return move, comm, value


if __name__ == "__main__":
    # Use full-precision f32 matmuls everywhere so the Pallas kernel and the
    # pure-JAX reference follow the same numerics on real TPUs.
    jax.config.update("jax_default_matmul_precision", "highest")

    key = jax.random.PRNGKey(0)

    # Small shapes consistent with the module: NCHW input, 2 trunk layers, 32 filters.
    B, C, H, W = 2, 4, 16, 16
    num_layers = 2
    num_filters = 32
    in_features = C * H * W

    key, kx, kp = jax.random.split(key, 3)
    x = jax.random.normal(kx, (B, C, H, W), jnp.float32)
    params = init_params(kp, in_features, num_layers, num_filters)

    ref_move, ref_comm, ref_value = _reference_forward(x, params, num_layers)

    # --- f32 path (default): exact-reciprocal softmax, tight tolerances. ---
    packed_params = pack_params(params, num_layers)
    move, comm, value = policy_network_shared_forward(x, packed_params, num_layers)
    jax.block_until_ready((move, comm, value))

    assert move.shape == (B, 5) and comm.shape == (B, 10) and value.shape == (B, 1)
    assert jnp.allclose(move, ref_move, atol=1e-3, rtol=1e-3)
    assert jnp.allclose(comm, ref_comm, atol=1e-3, rtol=1e-3)
    assert jnp.allclose(value, ref_value, atol=2e-3, rtol=1e-2)
    assert jnp.allclose(jnp.sum(move, axis=1), 1.0, atol=1e-5)
    assert jnp.allclose(jnp.sum(comm, axis=1), 1.0, atol=1e-5)

    # --- bf16 x / first-layer-weight path (halves the dominant HBM traffic). ---
    packed_bf16 = pack_params(params, num_layers, x_dtype=jnp.bfloat16)
    move16, comm16, value16 = policy_network_shared_forward(x, packed_bf16, num_layers)
    jax.block_until_ready((move16, comm16, value16))

    assert jnp.allclose(move16, ref_move, atol=2e-2)
    assert jnp.allclose(comm16, ref_comm, atol=2e-2)
    assert jnp.allclose(value16, ref_value, atol=2e-2)
    assert jnp.allclose(jnp.sum(move16, axis=1), 1.0, atol=1e-5)
    assert jnp.allclose(jnp.sum(comm16, axis=1), 1.0, atol=1e-5)

    print("KERNEL_OK")
</pallas_src>

<mosaic_0001>
module attributes {stable_mosaic.version = 11 : i64} {
  func.func @kernel(%arg0: i32, %arg1: memref<8x1024xf32, #tpu.memory_space<vmem>>, %arg2: memref<1024x32xf32, #tpu.memory_space<vmem>>, %arg3: memref<1x32xf32, #tpu.memory_space<vmem>>, %arg4: memref<32x32xf32, #tpu.memory_space<vmem>>, %arg5: memref<1x32xf32, #tpu.memory_space<vmem>>, %arg6: memref<32x128xf32, #tpu.memory_space<vmem>>, %arg7: memref<1x128xf32, #tpu.memory_space<vmem>>, %arg8: memref<8x128xf32, #tpu.memory_space<vmem>>) attributes {dimension_semantics = [#tpu.dimension_semantics<parallel>], iteration_bounds = array<i64: 1>, scalar_prefetch = 0 : i64, scratch_operands = 0 : i64, tpu.core_type = #tpu.core_type<tc>, window_params = [{transform_indices = @transform_0, window_bounds = array<i64: 8, 1024>}, {pipeline_mode = #tpu.pipeline_mode<synchronous>, transform_indices = @transform_1, window_bounds = array<i64: 1024, 32>}, {pipeline_mode = #tpu.pipeline_mode<synchronous>, transform_indices = @transform_2, window_bounds = array<i64: 1, 32>}, {pipeline_mode = #tpu.pipeline_mode<synchronous>, transform_indices = @transform_3, window_bounds = array<i64: 32, 32>}, {pipeline_mode = #tpu.pipeline_mode<synchronous>, transform_indices = @transform_4, window_bounds = array<i64: 1, 32>}, {pipeline_mode = #tpu.pipeline_mode<synchronous>, transform_indices = @transform_5, window_bounds = array<i64: 32, 128>}, {pipeline_mode = #tpu.pipeline_mode<synchronous>, transform_indices = @transform_6, window_bounds = array<i64: 1, 128>}, {transform_indices = @transform_7, window_bounds = array<i64: 8, 128>}]} {
    %c0 = arith.constant 0 : index
    %c0_0 = arith.constant 0 : index
    %0 = vector.load %arg1[%c0, %c0_0] : memref<8x1024xf32, #tpu.memory_space<vmem>>, vector<8x1024xf32>
    %c0_1 = arith.constant 0 : index
    %c0_2 = arith.constant 0 : index
    %1 = vector.load %arg2[%c0_1, %c0_2] : memref<1024x32xf32, #tpu.memory_space<vmem>>, vector<1024x32xf32>
    %c0_3 = arith.constant 0 : index
    %c0_4 = arith.constant 0 : index
    %2 = vector.load %arg3[%c0_3, %c0_4] : memref<1x32xf32, #tpu.memory_space<vmem>>, vector<1x32xf32>
    %cst = arith.constant dense<0.000000e+00> : vector<8x32xf32>
    %3 = tpu.matmul %0, %1, %cst {dimension_numbers = #tpu.dot_dimension_numbers<[1], [0], [0], [1], [0, 0, 1, 1], [], []>, precision = #tpu.contract_precision<fp32>} : vector<8x1024xf32>, vector<1024x32xf32>, vector<8x32xf32> -> vector<8x32xf32>
    %4 = vector.broadcast %2 : vector<1x32xf32> to vector<8x32xf32>
    %5 = arith.addf %3, %4 : vector<8x32xf32>
    %cst_5 = arith.constant 0.000000e+00 : f32
    %6 = vector.broadcast %cst_5 : f32 to vector<8x32xf32>
    %7 = arith.cmpf ogt, %5, %6 : vector<8x32xf32>
    %8 = math.exp %5 : vector<8x32xf32>
    %cst_6 = arith.constant 1.000000e+00 : f32
    %9 = vector.broadcast %cst_6 : f32 to vector<8x32xf32>
    %10 = arith.subf %8, %9 : vector<8x32xf32>
    %cst_7 = arith.constant 1.67326319 : f32
    %11 = vector.broadcast %cst_7 : f32 to vector<8x32xf32>
    %12 = arith.mulf %11, %10 : vector<8x32xf32>
    %13 = arith.select %7, %5, %12 : vector<8x32xi1>, vector<8x32xf32>
    %cst_8 = arith.constant 1.05070102 : f32
    %14 = vector.broadcast %cst_8 : f32 to vector<8x32xf32>
    %15 = arith.mulf %14, %13 : vector<8x32xf32>
    %c0_9 = arith.constant 0 : index
    %c0_10 = arith.constant 0 : index
    %16 = vector.load %arg4[%c0_9, %c0_10] : memref<32x32xf32, #tpu.memory_space<vmem>>, vector<32x32xf32>
    %c0_11 = arith.constant 0 : index
    %c0_12 = arith.constant 0 : index
    %17 = vector.load %arg5[%c0_11, %c0_12] : memref<1x32xf32, #tpu.memory_space<vmem>>, vector<1x32xf32>
    %cst_13 = arith.constant dense<0.000000e+00> : vector<8x32xf32>
    %18 = tpu.matmul %15, %16, %cst_13 {dimension_numbers = #tpu.dot_dimension_numbers<[1], [0], [0], [1], [0, 0, 1, 1], [], []>, precision = #tpu.contract_precision<fp32>} : vector<8x32xf32>, vector<32x32xf32>, vector<8x32xf32> -> vector<8x32xf32>
    %19 = vector.broadcast %17 : vector<1x32xf32> to vector<8x32xf32>
    %20 = arith.addf %18, %19 : vector<8x32xf32>
    %cst_14 = arith.constant 0.000000e+00 : f32
    %21 = vector.broadcast %cst_14 : f32 to vector<8x32xf32>
    %22 = arith.cmpf ogt, %20, %21 : vector<8x32xf32>
    %23 = math.exp %20 : vector<8x32xf32>
    %cst_15 = arith.constant 1.000000e+00 : f32
    %24 = vector.broadcast %cst_15 : f32 to vector<8x32xf32>
    %25 = arith.subf %23, %24 : vector<8x32xf32>
    %cst_16 = arith.constant 1.67326319 : f32
    %26 = vector.broadcast %cst_16 : f32 to vector<8x32xf32>
    %27 = arith.mulf %26, %25 : vector<8x32xf32>
    %28 = arith.select %22, %20, %27 : vector<8x32xi1>, vector<8x32xf32>
    %cst_17 = arith.constant 1.05070102 : f32
    %29 = vector.broadcast %cst_17 : f32 to vector<8x32xf32>
    %30 = arith.mulf %29, %28 : vector<8x32xf32>
    %c0_18 = arith.constant 0 : index
    %c0_19 = arith.constant 0 : index
    %31 = vector.load %arg6[%c0_18, %c0_19] : memref<32x128xf32, #tpu.memory_space<vmem>>, vector<32x128xf32>
    %c0_20 = arith.constant 0 : index
    %c0_21 = arith.constant 0 : index
    %32 = vector.load %arg7[%c0_20, %c0_21] : memref<1x128xf32, #tpu.memory_space<vmem>>, vector<1x128xf32>
    %cst_22 = arith.constant dense<0.000000e+00> : vector<8x128xf32>
    %33 = tpu.matmul %30, %31, %cst_22 {dimension_numbers = #tpu.dot_dimension_numbers<[1], [0], [0], [1], [0, 0, 1, 1], [], []>, precision = #tpu.contract_precision<fp32>} : vector<8x32xf32>, vector<32x128xf32>, vector<8x128xf32> -> vector<8x128xf32>
    %34 = vector.broadcast %32 : vector<1x128xf32> to vector<8x128xf32>
    %35 = arith.addf %33, %34 : vector<8x128xf32>
    %36 = tpu.iota {dimensions = array<i32: 1>} : vector<8x128xi32>
    %c5_i32 = arith.constant 5 : i32
    %37 = vector.broadcast %c5_i32 : i32 to vector<8x128xi32>
    %38 = arith.cmpi slt, %36, %37 : vector<8x128xi32>
    %c5_i32_23 = arith.constant 5 : i32
    %39 = vector.broadcast %c5_i32_23 : i32 to vector<8x128xi32>
    %40 = arith.cmpi sge, %36, %39 : vector<8x128xi32>
    %c15_i32 = arith.constant 15 : i32
    %41 = vector.broadcast %c15_i32 : i32 to vector<8x128xi32>
    %42 = arith.cmpi slt, %36, %41 : vector<8x128xi32>
    %43 = arith.andi %40, %42 : vector<8x128xi1>
    %c15_i32_24 = arith.constant 15 : i32
    %44 = vector.broadcast %c15_i32_24 : i32 to vector<8x128xi32>
    %45 = arith.cmpi eq, %36, %44 : vector<8x128xi32>
    %cst_25 = arith.constant 0xFF800000 : f32
    %46 = vector.broadcast %cst_25 : f32 to vector<8x128xf32>
    %47 = arith.select %38, %35, %46 : vector<8x128xi1>, vector<8x128xf32>
    %cst_26 = arith.constant dense<0xFF800000> : vector<8xf32>
    %48 = vector.multi_reduction <maximumf>, %47, %cst_26 [1] : vector<8x128xf32> to vector<8xf32>
    %49 = vector.shape_cast %48 : vector<8xf32> to vector<8x1xf32>
    %cst_27 = arith.constant 0xFF800000 : f32
    %50 = vector.broadcast %cst_27 : f32 to vector<8x128xf32>
    %51 = arith.select %43, %35, %50 : vector<8x128xi1>, vector<8x128xf32>
    %cst_28 = arith.constant dense<0xFF800000> : vector<8xf32>
    %52 = vector.multi_reduction <maximumf>, %51, %cst_28 [1] : vector<8x128xf32> to vector<8xf32>
    %53 = vector.shape_cast %52 : vector<8xf32> to vector<8x1xf32>
    %cst_29 = arith.constant 0x7F800000 : f32
    %54 = vector.shape_cast %53 : vector<8x1xf32> to vector<8x1xf32>
    %55 = vector.broadcast %54 : vector<8x1xf32> to vector<8x128xf32>
    %56 = vector.broadcast %cst_29 : f32 to vector<8x128xf32>
    %57 = arith.select %43, %55, %56 : vector<8x128xi1>, vector<8x128xf32>
    %58 = vector.shape_cast %49 : vector<8x1xf32> to vector<8x1xf32>
    %59 = vector.broadcast %58 : vector<8x1xf32> to vector<8x128xf32>
    %60 = arith.select %38, %59, %57 : vector<8x128xi1>, vector<8x128xf32>
    %61 = arith.subf %35, %60 : vector<8x128xf32>
    %62 = math.exp %61 : vector<8x128xf32>
    %cst_30 = arith.constant 0.000000e+00 : f32
    %63 = vector.broadcast %cst_30 : f32 to vector<8x128xf32>
    %64 = arith.select %38, %62, %63 : vector<8x128xi1>, vector<8x128xf32>
    %cst_31 = arith.constant dense<0.000000e+00> : vector<8xf32>
    %65 = vector.multi_reduction <add>, %64, %cst_31 [1] : vector<8x128xf32> to vector<8xf32>
    %66 = vector.shape_cast %65 : vector<8xf32> to vector<8x1xf32>
    %cst_32 = arith.constant 0.000000e+00 : f32
    %67 = vector.broadcast %cst_32 : f32 to vector<8x128xf32>
    %68 = arith.select %43, %62, %67 : vector<8x128xi1>, vector<8x128xf32>
    %cst_33 = arith.constant dense<0.000000e+00> : vector<8xf32>
    %69 = vector.multi_reduction <add>, %68, %cst_33 [1] : vector<8x128xf32> to vector<8xf32>
    %70 = vector.shape_cast %69 : vector<8xf32> to vector<8x1xf32>
    %cst_34 = arith.constant 1.000000e+00 : f32
    %71 = vector.broadcast %cst_34 : f32 to vector<8x1xf32>
    %72 = arith.divf %71, %66 : vector<8x1xf32>
    %cst_35 = arith.constant 1.000000e+00 : f32
    %73 = vector.broadcast %cst_35 : f32 to vector<8x1xf32>
    %74 = arith.divf %73, %70 : vector<8x1xf32>
    %cst_36 = arith.constant 0.000000e+00 : f32
    %75 = vector.shape_cast %74 : vector<8x1xf32> to vector<8x1xf32>
    %76 = vector.broadcast %75 : vector<8x1xf32> to vector<8x128xf32>
    %77 = vector.broadcast %cst_36 : f32 to vector<8x128xf32>
    %78 = arith.select %43, %76, %77 : vector<8x128xi1>, vector<8x128xf32>
    %79 = vector.shape_cast %72 : vector<8x1xf32> to vector<8x1xf32>
    %80 = vector.broadcast %79 : vector<8x1xf32> to vector<8x128xf32>
    %81 = arith.select %38, %80, %78 : vector<8x128xi1>, vector<8x128xf32>
    %82 = arith.mulf %62, %81 : vector<8x128xf32>
    %cst_37 = arith.constant 0.000000e+00 : f32
    %83 = vector.broadcast %cst_37 : f32 to vector<8x128xf32>
    %84 = arith.select %45, %35, %83 : vector<8x128xi1>, vector<8x128xf32>
    %85 = arith.addf %82, %84 : vector<8x128xf32>
    %c0_38 = arith.constant 0 : index
    %c0_39 = arith.constant 0 : index
    %86 = vector.load %arg8[%c0_38, %c0_39] : memref<8x128xf32, #tpu.memory_space<vmem>>, vector<8x128xf32>
    tpu.vector_store %arg8[%c0_38, %c0_39], %85 {strides = array<i32>} : memref<8x128xf32, #tpu.memory_space<vmem>>, vector<8x128xf32>,
    return
  }
  func.func @transform_0(%arg0: i32) -> (i32, i32) {
    %c0_i32 = arith.constant 0 : i32
    %c0_i32_0 = arith.constant 0 : i32
    return %arg0, %c0_i32 : i32, i32
  }
  func.func @transform_1(%arg0: i32) -> (i32, i32) {
    %c0_i32 = arith.constant 0 : i32
    %c0_i32_0 = arith.constant 0 : i32
    %c0_i32_1 = arith.constant 0 : i32
    return %c0_i32, %c0_i32_0 : i32, i32
  }
  func.func @transform_2(%arg0: i32) -> (i32, i32) {
    %c0_i32 = arith.constant 0 : i32
    %c0_i32_0 = arith.constant 0 : i32
    %c0_i32_1 = arith.constant 0 : i32
    return %c0_i32, %c0_i32_0 : i32, i32
  }
  func.func @transform_3(%arg0: i32) -> (i32, i32) {
    %c0_i32 = arith.constant 0 : i32
    %c0_i32_0 = arith.constant 0 : i32
    %c0_i32_1 = arith.constant 0 : i32
    return %c0_i32, %c0_i32_0 : i32, i32
  }
  func.func @transform_4(%arg0: i32) -> (i32, i32) {
    %c0_i32 = arith.constant 0 : i32
    %c0_i32_0 = arith.constant 0 : i32
    %c0_i32_1 = arith.constant 0 : i32
    return %c0_i32, %c0_i32_0 : i32, i32
  }
  func.func @transform_5(%arg0: i32) -> (i32, i32) {
    %c0_i32 = arith.constant 0 : i32
    %c0_i32_0 = arith.constant 0 : i32
    %c0_i32_1 = arith.constant 0 : i32
    return %c0_i32, %c0_i32_0 : i32, i32
  }
  func.func @transform_6(%arg0: i32) -> (i32, i32) {
    %c0_i32 = arith.constant 0 : i32
    %c0_i32_0 = arith.constant 0 : i32
    %c0_i32_1 = arith.constant 0 : i32
    return %c0_i32, %c0_i32_0 : i32, i32
  }
  func.func @transform_7(%arg0: i32) -> (i32, i32) {
    %c0_i32 = arith.constant 0 : i32
    %c0_i32_0 = arith.constant 0 : i32
    return %arg0, %c0_i32 : i32, i32
  }
}

</mosaic_0001>

<bundles_post_ra>
// kernel: policy_network_shared_forward.1
= control target key start
LH: loop header
LB: loop body
LE: loop exit
PB: predicated region body
PF: predicated region fallthrough
CT: control target
= control target key end

     0   :  { %v5855_v16 = vmov 1983009808   ;;  %vm5857_vm0 = vmmov 0   ;;  %vm3723_vm2 = vcmask 261120   ;;  %s8925_s0 = inlined_call_operand.vmem [shape: f32[2,1024], index: 0, kind: input, shape index: {}]   ;;  %s8926_s1 = inlined_call_operand.vmem [shape: f32[1024,32], index: 1, kind: input, shape index: {}]   ;;  %s8927_s2 = inlined_call_operand.vmem [shape: f32[1,32], index: 2, kind: input, shape index: {}]   ;;  %s8928_s3 = inlined_call_operand.vmem [shape: f32[32,32], index: 3, kind: input, shape index: {}]   ;;  %s8929_s4 = inlined_call_operand.vmem [shape: f32[1,32], index: 4, kind: input, shape index: {}]   ;;  %s8930_s5 = inlined_call_operand.vmem [shape: f32[32,128], index: 5, kind: input, shape index: {}]   ;;  %s8931_s6 = inlined_call_operand.vmem [shape: f32[1,128], index: 6, kind: input, shape index: {}]   ;;  %s8932_s7 = inlined_call_operand.vmem [shape: f32[2,128], index: 7, kind: output, shape index: {}]  }
   0x1   :  { %v65_v0 = vld [vmem:[%s8926_s1 + $0xf8] sm:$0xff]  ;;  %v64_v2 = vld [vmem:[%s8926_s1 + $0xf0] sm:$0xff]  ;;  %v63_v7 = vld [vmem:[%s8926_s1 + $0xe8] sm:$0xff]  ;;  %v5939_v17 = vunpack.c.l.s4 %v5855_v16 }
   0x2   :  { %v49_v1 = vld [vmem:[%s8926_s1 + $0x78] sm:$0xff]  ;;  %v5907_v3 = vand.u32 4294901760, %v65_v0  ;;  %v5911_v5 = vand.u32 4294901760, %v64_v2  ;;  %v48_v6 = vld [vmem:[%s8926_s1 + $0x70] sm:$0xff]  ;;  %v47_v8 = vld [vmem:[%s8926_s1 + $0x68] sm:$0xff]  ;;  %v5924_v11 = vand.u32 4294901760, %v63_v7 }
   0x3   :  { %v5909_v4 = vand.u32 4294901760, %v49_v1  ;;  %v5922_v10 = vand.u32 4294901760, %v48_v6  ;;  %v5926_v12 = vand.u32 4294901760, %v47_v8  ;;  %v62_v13 = vld [vmem:[%s8926_s1 + $0xe0] sm:$0xff]  ;;  %v5937_v15 = vld [vmem:[%s8926_s1 + $0xd8] sm:$0xff]  ;;  %v5960_v23 = vld [vmem:[%s8926_s1 + $0xd0] sm:$0xff] }
   0x4   :  { %v46_v14 = vld [vmem:[%s8926_s1 + $0x60] sm:$0xff]  ;;  %4798 = vmatprep.subr.mxu0 %v5907_v3  ;;  %v5942_v18 = vand.u32 4294901760, %v62_v13  ;;  %v5947_v20 = vand.u32 4294901760, %v5937_v15  ;;  %v5950_v21 = vsub.f32 %v65_v0, %v5907_v3  ;;  %v5955_v22 = vld [vmem:[%s8926_s1 + $0x58] sm:$0xff]  ;;  %v5965_v24 = vld [vmem:[%s8926_s1 + $0x50] sm:$0xff]  ;;  %v5975_v27 = vand.u32 4294901760, %v5960_v23 }
   0x5   :  { %v5944_v19 = vand.u32 4294901760, %v46_v14  ;;  %4799 = vmatpush3.msra.mxu0 %v5909_v4  ;;  %v5969_v25 = vand.u32 4294901760, %v5955_v22  ;;  %v5972_v26 = vsub.f32 %v49_v1, %v5909_v4  ;;  %v5978_v28 = vsub.f32 %v64_v2, %v5911_v5  ;;  %v5983_v29 = vld [vmem:[%s8926_s1 + $0xc8] sm:$0xff]  ;;  %v5993_v31 = vld [vmem:[%s8926_s1 + $0xc0] sm:$0xff]  ;;  %v6045_v49 = vld [vmem:[%s8926_s1 + $0xb8] sm:$0xff] }
   0x6   :  { %9207 = vst [vmem:[#allocation3_spill] sm:$0xff] %v5950_v21  ;;  %v5988_v30 = vld [vmem:[%s8926_s1 + $0x48] sm:$0xff]  ;;  %4800 = vmatprep.subr.mxu0 %v5911_v5  ;;  %v8945_v32 = vand.u32 4294901760, %v5950_v21  ;;  %v5998_v33 = vand.u32 4294901760, %v5965_v24  ;;  %v6001_v34 = vsub.f32 %v48_v6, %v5922_v10  ;;  %v6004_v35 = vand.u32 4294901760, %v5983_v29  ;;  %v6018_v40 = vld [vmem:[%s8926_s1 + $0x40] sm:$0xff] }
   0x7   :  { %4801 = vmatpush3.msra.mxu0 %v5922_v10  ;;  %v8944_v36 = vand.u32 4294901760, %v5972_v26  ;;  %v8942_v37 = vand.u32 4294901760, %v5978_v28  ;;  %v6010_v38 = vsub.f32 %v63_v7, %v5924_v11  ;;  %v6013_v39 = vand.u32 4294901760, %v5988_v30  ;;  %v6058_v54 = vld [vmem:[%s8926_s1 + $0x38] sm:$0xff]  ;;  %v6068_v59 = vld [vmem:[%s8926_s1 + $0xb0] sm:$0xff]  ;;  %v6235_v9 = vld [vmem:[%s8926_s1 + $0x88] sm:$0xff] }
   0x8   :  { %4802 = vmatprep.subr.mxu0 %v5924_v11  ;;  %v485_v41 = vsub.f32 %v5950_v21, %v8945_v32  ;;  %v8940_v42 = vand.u32 4294901760, %v6001_v34  ;;  %v6026_v43 = vsub.f32 %v47_v8, %v5926_v12  ;;  %v6029_v44 = vand.u32 4294901760, %v5993_v31  ;;  %v6073_v60 = vld [vmem:[%s8926_s1 + $0x30] sm:$0xff]  ;;  %v6099_v8 = vld [vmem:[%s8926_s1 + $0xa8] sm:$0xff] }
   0x9   :  { %4803 = vmatpush3.msra.mxu0 %v5926_v12  ;;  %v373_v45 = vsub.f32 %v5972_v26, %v8944_v36  ;;  %v492_v46 = vsub.f32 %v5978_v28, %v8942_v37  ;;  %v8939_v47 = vand.u32 4294901760, %v6010_v38  ;;  %v6040_v48 = vsub.f32 %v62_v13, %v5942_v18  ;;  %v6208_v37 = vld [vmem:[%s8926_s1 + $0x90] sm:$0xff] }
   0xa   :  { %9208 = vst [vmem:[#allocation4_spill] sm:$0xff] %v6029_v44  ;;  %4804 = vmatprep.subr.mxu0 %v5942_v18  ;;  %v486_v50 = vand.u32 4294901760, %v485_v41  ;;  %v380_v51 = vsub.f32 %v6001_v34, %v8940_v42  ;;  %v8937_v52 = vand.u32 4294901760, %v6026_v43  ;;  %v6053_v53 = vand.u32 4294901760, %v6018_v40  ;;  %v6113_v41 = vld [vmem:[%s8926_s1 + $0x28] sm:$0xff]  ;;  %v6192_v42 = vld [vmem:[%s8926_s1 + $0x18] sm:$0xff] }
   0xb   :  { %4805 = vmatpush3.msra.mxu0 %v5944_v19  ;;  %v374_v55 = vand.u32 4294901760, %v373_v45  ;;  %v493_v56 = vand.u32 4294901760, %v492_v46  ;;  %v499_v57 = vsub.f32 %v6010_v38, %v8939_v47  ;;  %v8935_v58 = vand.u32 4294901760, %v6040_v48 }
   0xc   :  { %9209 = vst [vmem:[#allocation5_spill] sm:$0xff] %v6053_v53  ;;  %4806 = vmatprep.subr.mxu0 %v5947_v20  ;;  %4833 = vmatprep.subr.mxu1 %v486_v50  ;;  %v381_v61 = vand.u32 4294901760, %v380_v51  ;;  %v387_v62 = vsub.f32 %v6026_v43, %v8937_v52  ;;  %v6080_v63 = vsub.f32 %v46_v14, %v5944_v19  ;;  %v6083_v0 = vand.u32 4294901760, %v6045_v49 }
   0xd   :  { %4807 = vmatpush3.msra.mxu0 %v5969_v25  ;;  %4834 = vmatpush3.msra.mxu1 %v374_v55  ;;  %v500_v1 = vand.u32 4294901760, %v499_v57  ;;  %v506_v2 = vsub.f32 %v6040_v48, %v8935_v58  ;;  %v6091_v6 = vsub.f32 %v5937_v15, %v5947_v20  ;;  %v6094_v7 = vand.u32 4294901760, %v6058_v54 }
   0xe   :  { %9210 = vst [vmem:[#allocation6_spill] sm:$0xff] %v6083_v0  ;;  %4808 = vmatprep.subr.mxu0 %v5975_v27  ;;  %4835 = vmatprep.subr.mxu1 %v493_v56  ;;  %v388_v13 = vand.u32 4294901760, %v387_v62  ;;  %v8933_v14 = vand.u32 4294901760, %v6080_v63  ;;  %v6105_v16 = vsub.f32 %v5955_v22, %v5969_v25  ;;  %v6108_v15 = vand.u32 4294901760, %v6068_v59 }
   0xf   :  { %9211 = vst [vmem:[#allocation7_spill] sm:$0xff] %v6094_v7  ;;  %4809 = vmatpush3.msra.mxu0 %v5998_v33  ;;  %4836 = vmatpush3.msra.mxu1 %v381_v61  ;;  %v507_v45 = vand.u32 4294901760, %v506_v2  ;;  %v8934_v46 = vand.u32 4294901760, %v6091_v6  ;;  %v6119_v50 = vsub.f32 %v5960_v23, %v5975_v27  ;;  %v6122_v22 = vand.u32 4294901760, %v6073_v60  ;;  %v6139_v23 = vld [vmem:[%s8926_s1 + $0xa0] sm:$0xff] }
  0x10   :  { %9212 = vst [vmem:[#allocation8_spill] sm:$0xff] %v6108_v15  ;;  %4810 = vmatprep.subr.mxu0 %v6004_v35  ;;  %4837 = vmatprep.subr.mxu1 %v500_v1  ;;  %v394_v51 = vsub.f32 %v6080_v63, %v8933_v14  ;;  %v8936_v55 = vand.u32 4294901760, %v6105_v16  ;;  %v6131_v56 = vsub.f32 %v5965_v24, %v5998_v33  ;;  %v6134_v57 = vand.u32 4294901760, %v6099_v8 }
  0x11   :  { %9213 = vst [vmem:[#allocation9_spill] sm:$0xff] %v6122_v22  ;;  %4811 = vmatpush3.msra.mxu0 %v6013_v39  ;;  %4838 = vmatpush3.msra.mxu1 %v388_v13  ;;  %v513_v61 = vsub.f32 %v6091_v6, %v8934_v46  ;;  %v8938_v62 = vand.u32 4294901760, %v6119_v50  ;;  %v6148_v24 = vsub.f32 %v5983_v29, %v6004_v35  ;;  %v6151_v1 = vand.u32 4294901760, %v6113_v41  ;;  %v6165_v29 = vld [vmem:[%s8926_s1 + $0x20] sm:$0xff] }
  0x12   :  { %9214 = vst [vmem:[#allocation10_spill] sm:$0xff] %v6134_v57  ;;  %4812 = vmatprep.subr.mxu0 %v6029_v44  ;;  %4839 = vmatprep.subr.mxu1 %v507_v45  ;;  %v395_v2 = vand.u32 4294901760, %v394_v51  ;;  %v401_v13 = vsub.f32 %v6105_v16, %v8936_v55  ;;  %v8941_v14 = vand.u32 4294901760, %v6131_v56  ;;  %v6160_v46 = vsub.f32 %v5988_v30, %v6013_v39  ;;  %v6178_v30 = vld [vmem:[%s8926_s1 + $0x98] sm:$0xff] }
  0x13   :  { %9215 = vst [vmem:[#allocation11_spill] sm:$0xff] %v6151_v1  ;;  %4813 = vmatpush3.msra.mxu0 %v6053_v53  ;;  %v514_v58 = vand.u32 4294901760, %v513_v61  ;;  %v520_v45 = vsub.f32 %v6119_v50, %v8938_v62  ;;  %v8943_v51 = vand.u32 4294901760, %v6148_v24  ;;  %v6173_v55 = vand.u32 4294901760, %v6139_v23 }
  0x14   :  { %4840 = vmatpush3.msra.mxu1 %v395_v2  ;;  %4814 = vmatprep.subr.mxu0 %v6083_v0  ;;  %v402_v52 = vand.u32 4294901760, %v401_v13  ;;  %v408_v61 = vsub.f32 %v6131_v56, %v8941_v14  ;;  %v8946_v62 = vand.u32 4294901760, %v6160_v46  ;;  %v6187_v47 = vsub.f32 %v5993_v31, %v6029_v44 }
  0x15   :  { %9216 = vst [vmem:[#allocation12_spill] sm:$0xff] %v6173_v55  ;;  %4841 = vmatprep.subr.mxu1 %v514_v58  ;;  %4815 = vmatpush3.msra.mxu0 %v6094_v7  ;;  %v521_v2 = vand.u32 4294901760, %v520_v45  ;;  %v527_v13 = vsub.f32 %v6148_v24, %v8943_v51  ;;  %v6199_v14 = vand.u32 4294901760, %v6165_v29  ;;  %v6203_v31 = vsub.f32 %v6018_v40, %v6053_v53  ;;  %v6221_v40 = vld [vmem:[%s8926_s1 + $0x10] sm:$0xff] }
  0x16   :  { %4842 = vmatpush3.msra.mxu1 %v402_v52  ;;  %4816 = vmatprep.subr.mxu0 %v6108_v15  ;;  %v409_v58 = vand.u32 4294901760, %v408_v61  ;;  %v415_v45 = vsub.f32 %v6160_v46, %v8946_v62  ;;  %v8952_v51 = vand.u32 4294901760, %v6187_v47  ;;  %v6216_v36 = vand.u32 4294901760, %v6178_v30 }
  0x17   :  { %9217 = vst [vmem:[#allocation13_spill] sm:$0xff] %v6199_v14  ;;  %9218 = vst [vmem:[#allocation14_spill] sm:$0xff] %v6203_v31  ;;  %4843 = vmatprep.subr.mxu1 %v521_v2  ;;  %4817 = vmatpush3.msra.mxu0 %v6122_v22  ;;  %v528_v52 = vand.u32 4294901760, %v527_v13  ;;  %v6227_v32 = vsub.f32 %v6045_v49, %v6083_v0  ;;  %v6230_v62 = vand.u32 4294901760, %v6192_v42  ;;  %v6246_v61 = vand.u32 4294901760, %v6208_v37 }
  0x18   :  { %9219 = vst [vmem:[#allocation15_spill] sm:$0xff] %v6216_v36  ;;  %4844 = vmatpush3.msra.mxu1 %v409_v58  ;;  %4818 = vmatprep.subr.mxu0 %v6134_v57  ;;  %v416_v2 = vand.u32 4294901760, %v415_v45  ;;  %v534_v13 = vsub.f32 %v6187_v47, %v8952_v51  ;;  %v6243_v49 = vsub.f32 %v6058_v54, %v6094_v7  ;;  %v9223_v0 = vand.u32 4294901760, %v6203_v31  ;;  %v6263_v54 = vld [vmem:[%s8926_s1 + $0x8] sm:$0xff] }
  0x19   :  { %9220 = vst [vmem:[#allocation16_spill] sm:$0xff] %v6230_v62  ;;  %9222 = vst [vmem:[#allocation18_spill] sm:$0xff] %v6246_v61  ;;  %4845 = vmatprep.subr.mxu1 %v528_v52  ;;  %4819 = vmatpush3.msra.mxu0 %v6151_v1  ;;  %v6255_v53 = vsub.f32 %v6068_v59, %v6108_v15  ;;  %v6258_v51 = vand.u32 4294901760, %v6221_v40  ;;  %v6268_v52 = vld [vmem:[%s8926_s1 + $0x80] sm:$0xff]  ;;  %v6274_v45 = vsub.f32 %v6073_v60, %v6122_v22 }
  0x1a   :  { %9221 = vst [vmem:[#allocation17_spill] sm:$0xff] %v6243_v49  ;;  %v422_v58 = vsub.f32 %v6203_v31, %v9223_v0  ;;  %4846 = vmatpush3.msra.mxu1 %v416_v2  ;;  %4820 = vmatprep.subr.mxu0 %v6173_v55  ;;  %v535_v0 = vand.u32 4294901760, %v534_v13  ;;  %v8963_v59 = vand.u32 4294901760, %v6243_v49  ;;  %v6277_v15 = vand.u32 4294901760, %v6235_v9 }
  0x1b   :  { %9224 = vst [vmem:[#allocation19_spill] sm:$0xff] %v6255_v53  ;;  %9225 = vst [vmem:[#allocation20_spill] sm:$0xff] %v6258_v51  ;;  %4821 = vmatpush3.msra.mxu0 %v6199_v14  ;;  %v9227_v31 = vand.u32 4294901760, %v6227_v32  ;;  %v8970_v2 = vand.u32 4294901760, %v6255_v53  ;;  %v6286_v13 = vsub.f32 %v6099_v8, %v6134_v57  ;;  %v6303_v8 = vld [vmem:[%s8926_s1] sm:$0xff]  ;;  %v6311_v57 = vand.u32 4294901760, %v6268_v52 }
  0x1c   :  { %9226 = vst [vmem:[#allocation21_spill] sm:$0xff] %v6277_v15  ;;  %v423_v7 = vand.u32 4294901760, %v422_v58  ;;  %4847 = vmatprep.subr.mxu1 %v535_v0  ;;  %4822 = vmatprep.subr.mxu0 %v6216_v36  ;;  %v429_v60 = vsub.f32 %v6243_v49, %v8963_v59  ;;  %v6294_v58 = vand.u32 4294901760, %v6263_v54 }
  0x1d   :  { %v541_v44 = vsub.f32 %v6227_v32, %v9227_v31  ;;  %9228 = vst [vmem:[#allocation22_spill] sm:$0xff] %v6286_v13  ;;  %v6298_v31 = vsub.f32 %v6113_v41, %v6151_v1  ;;  %4823 = vmatpush3.msra.mxu0 %v6230_v62  ;;  %v548_v59 = vsub.f32 %v6255_v53, %v8970_v2  ;;  %v8973_v22 = vand.u32 4294901760, %v6286_v13 }
  0x1e   :  { %9229 = vst [vmem:[#allocation23_spill] sm:$0xff] %v6294_v58  ;;  %4848 = vmatpush3.msra.mxu1 %v423_v7  ;;  %9230 = vst [vmem:[#allocation24_spill] sm:$0xff] %v6311_v57  ;;  %v430_v41 = vand.u32 4294901760, %v429_v60  ;;  %4824 = vmatprep.subr.mxu0 %v6246_v61  ;;  %v9231_v1 = vand.u32 4294901760, %v6274_v45  ;;  %v6320_v7 = vsub.f32 %v6139_v23, %v6173_v55  ;;  %v6327_v53 = vand.u32 4294901760, %v6303_v8 }
  0x1f   :  { %v542_v0 = vand.u32 4294901760, %v541_v44  ;;  %v549_v2 = vand.u32 4294901760, %v548_v59  ;;  %4825 = vmatpush3.msra.mxu0 %v6258_v51  ;;  %v555_v60 = vsub.f32 %v6286_v13, %v8973_v22  ;;  %v9232_v23 = vand.u32 4294901760, %v6298_v31  ;;  %v5833_v22 = vld [vmem:[%s8925_s0] ss:$16 sps:$4 sm:$0xff]  }
  0x20   :  { %v436_v49 = vsub.f32 %v6274_v45, %v9231_v1  ;;  %v6331_v1 = vsub.f32 %v6165_v29, %v6199_v14  ;;  %4826 = vmatprep.subr.mxu0 %v6277_v15  ;;  %v183_v55 = vunpack.c.0.s8 %v5939_v17  ;;  %v9234_v17 = vand.u32 4294901760, %v6320_v7 }
  0x21   :  { %4849 = vmatprep.subr.mxu1 %v542_v0  ;;  %v443_v59 = vsub.f32 %v6298_v31, %v9232_v23  ;;  %v556_v13 = vand.u32 4294901760, %v555_v60  ;;  %4827 = vmatpush3.msra.mxu0 %v6294_v58  ;;  %v6350_v0 = vsub.f32 %v6178_v30, %v6216_v36  ;;  %v6358_v60 = vsub.f32 %v6192_v42, %v6230_v62 }
  0x22   :  { %4850 = vmatpush3.msra.mxu1 %v430_v41  ;;  %v437_v44 = vand.u32 4294901760, %v436_v49  ;;  %v5836_v49 = vld [vmem:[%s8925_s0 + $0x20] ss:$16 sps:$4 sm:$0xff]   ;;  %v9233_v41 = vlaneseq  ;;  %4828 = vmatprep.subr.mxu0 %v6311_v57  ;;  %v6362_v29 = vsub.f32 %v6208_v37, %v6246_v61  ;;  %v9235_v30 = vand.u32 4294901760, %v6331_v1 }
  0x23   :  { %4851 = vmatprep.subr.mxu1 %v549_v2  ;;  %v444_v14 = vand.u32 4294901760, %v443_v59  ;;  %v562_v2 = vsub.f32 %v6320_v7, %v9234_v17  ;;  %4829 = vmatpush3.msra.mxu0 %v6327_v53  ;;  %v6373_v17 = vsub.f32 %v6221_v40, %v6258_v51  ;;  %v8986_v37 = vand.u32 4294901760, %v6358_v60 }
  0x24   :  { %v185_v23 = vshrl.u32 %v9233_v41, 7  ;;  %4852 = vmatpush3.msra.mxu1 %v437_v44  ;;  %v450_v44 = vsub.f32 %v6331_v1, %v9235_v30  ;;  %v8984_v41 = vand.u32 4294901760, %v6350_v0  ;;  %4868 = vmatprep.subr.mxu0 %v5950_v21  ;;  %v6380_v61 = vsub.f32 %v6235_v9, %v6277_v15 }
  0x25   :  { %4853 = vmatprep.subr.mxu1 %v556_v13  ;;  %v563_v42 = vand.u32 4294901760, %v562_v2  ;;  %v8987_v13 = vand.u32 4294901760, %v6362_v29  ;;  %v457_v40 = vsub.f32 %v6358_v60, %v8986_v37  ;;  %v8992_v9 = vand.u32 4294901760, %v6373_v17 }
  0x26   :  { %v6368_v59 = vsub.s32 %v183_v55, %v185_v23  ;;  %4854 = vmatpush3.msra.mxu1 %v444_v14  ;;  %v451_v55 = vand.u32 4294901760, %v450_v44  ;;  %v569_v14 = vsub.f32 %v6350_v0, %v8984_v41  ;;  %v8990_v44 = vand.u32 4294901760, %v6380_v61 }
  0x27   :  { %4855 = vmatprep.subr.mxu1 %v563_v42  ;;  %v576_v2 = vsub.f32 %v6362_v29, %v8987_v13  ;;  %v6397_v41 = vsub.f32 %v6263_v54, %v6294_v58  ;;  %v458_v42 = vand.u32 4294901760, %v457_v40  ;;  %v464_v37 = vsub.f32 %v6373_v17, %v8992_v9 }
  0x28   :  { %9236 = vst [vmem:[#allocation25_spill] sm:$0xff] %v6368_v59  ;;  %v187_v23 = vrot.slane %v5833_v22, %v6368_v59  ;;  %v201_v30 = vrot.slane %v5836_v49, %v6368_v59  ;;  %4856 = vmatpush3.msra.mxu1 %v451_v55  ;;  %v570_v49 = vand.u32 4294901760, %v569_v14  ;;  %v583_v13 = vsub.f32 %v6380_v61, %v8990_v44 }
  0x29   :  { %v577_v21 = vand.u32 4294901760, %v576_v2  ;;  %v6412_v54 = vsub.f32 %v6268_v52, %v6311_v57  ;;  %v6416_v40 = vsub.f32 %v6303_v8, %v6327_v53 }
  0x2a   :  { %v210_v22 = vcombine.high %v187_v23, %v201_v30  ;;  %v209_v59 = vcombine.low %v187_v23, %v201_v30  ;;  %4857 = vmatprep.subr.mxu1 %v570_v49  ;;  %v8991_v23 = vand.u32 4294901760, %v6397_v41  ;;  %v465_v30 = vand.u32 4294901760, %v464_v37 }
  0x2b   :  { %4858 = vmatpush3.msra.mxu1 %v458_v42  ;;  %v584_v14 = vand.u32 4294901760, %v583_v13  ;;  %v8994_v52 = vand.u32 4294901760, %v6412_v54  ;;  %v8993_v37 = vand.u32 4294901760, %v6416_v40 }
  0x2c   :  { %v6405_v15 = vand.u32 4294901760, %v210_v22  ;;  %v6407_v55 = vand.u32 4294901760, %v209_v59  ;;  %4859 = vmatprep.subr.mxu1 %v577_v21  ;;  %v471_v44 = vsub.f32 %v6397_v41, %v8991_v23 }
  0x2d   :  { %4860 = vmatpush3.msra.mxu1 %v465_v30  ;;  %v590_v21 = vsub.f32 %v6412_v54, %v8994_v52  ;;  %v9249_v52 = vld [vmem:[#allocation10_spill] sm:$0xff] }
  0x2e   :  { %9237 = vst [vmem:[#allocation26_spill] sm:$0xff] %v6405_v15  ;;  %9238 = vst [vmem:[#allocation27_spill] sm:$0xff] %v6407_v55  ;;  %v6419_v2 = vsub.f32 %v210_v22, %v6405_v15  ;;  %v6422_v49 = vsub.f32 %v209_v59, %v6407_v55  ;;  %594 = vmatprep.mubr.f32.mxu1 %v6405_v15  ;;  %4861 = vmatprep.subr.mxu1 %v584_v14  ;;  %v472_v22 = vand.u32 4294901760, %v471_v44  ;;  %v9253_v15 = vld [vmem:[#allocation18_spill] sm:$0xff] }
  0x2f   :  { %v478_v59 = vsub.f32 %v6416_v40, %v8993_v37  ;;  %v591_v23 = vand.u32 4294901760, %v590_v21  ;;  %v9242_v21 = vld [vmem:[#allocation6_spill] sm:$0xff] }
  0x30   :  { %v8996_v8 = vand.u32 4294901760, %v6419_v2  ;;  %v8995_v13 = vand.u32 4294901760, %v6422_v49  ;;  %4862 = vmatpush3.msra.mxu1 %v472_v22  ;;  %v9241_v22 = vld [vmem:[#allocation5_spill] sm:$0xff]  ;;  %v9248_v37 = vld [vmem:[#allocation22_spill] sm:$0xff] }
  0x31   :  { %v479_v14 = vand.u32 4294901760, %v478_v59  ;;  %4863 = vmatprep.subr.mxu1 %v591_v23  ;;  %v9240_v23 = vld [vmem:[#allocation14_spill] sm:$0xff]  ;;  %v9243_v59 = vld [vmem:[#allocation17_spill] sm:$0xff] }
  0x32   :  { %v356_v42 = vsub.f32 %v6419_v2, %v8996_v8  ;;  %v362_v30 = vsub.f32 %v6422_v49, %v8995_v13  ;;  %v9250_v13 = vld [vmem:[#allocation11_spill] sm:$0xff]  ;;  %v9251_v8 = vld [vmem:[#allocation12_spill] sm:$0xff] }
  0x33   :  { %4864 = vmatpush3.msra.mxu1 %v479_v14  ;;  %v9246_v14 = vld [vmem:[#allocation8_spill] sm:$0xff] }
  0x34   :  { %v357_v44 = vand.u32 4294901760, %v356_v42  ;;  %v363_v9 = vand.u32 4294901760, %v362_v30  ;;  %596 = vmatmul.mubr.f32.vlgmr.msra.gmra.mxu1 %v6407_v55  ;;  %4903 = vmatprep.subr.mxu1 %v5907_v3  ;;  %v9244_v42 = vld [vmem:[#allocation7_spill] sm:$0xff]  ;;  %v9252_v55 = vld [vmem:[#allocation13_spill] sm:$0xff] }
  0x35   :  { %4904 = vmatpush3.msra.mxu1 %v5909_v4  ;;  %v9245_v30 = vld [vmem:[#allocation19_spill] sm:$0xff] }
  0x36   :  { %358 = vmatprep.mubr.f32.mxu0 %v357_v44  ;;  %4905 = vmatprep.subr.mxu1 %v5911_v5  ;;  %v9247_v44 = vld [vmem:[#allocation9_spill] sm:$0xff] }
  0x37   :  { %364 = vmatmul.mubr.f32.vlgmr.msra.gmra.mxu0 %v363_v9  ;;  %4906 = vmatpush3.msra.mxu1 %v5922_v10  ;;  %v9239_v9 = vld [vmem:[#allocation4_spill] sm:$0xff] }
  0x38   :  { %4869 = vmatpush3.msra.mxu0 %v5972_v26  ;;  %4907 = vmatprep.subr.mxu1 %v5924_v11 }
  0x39   :  { %4870 = vmatprep.subr.mxu0 %v5978_v28  ;;  %4908 = vmatpush3.msra.mxu1 %v5926_v12 }
  0x3a   :  { %4871 = vmatpush3.msra.mxu0 %v6001_v34  ;;  %4909 = vmatprep.subr.mxu1 %v5942_v18 }
  0x3b   :  { %4872 = vmatprep.subr.mxu0 %v6010_v38  ;;  %4910 = vmatpush3.msra.mxu1 %v5944_v19 }
  0x3c   :  { %4873 = vmatpush3.msra.mxu0 %v6026_v43  ;;  %4911 = vmatprep.subr.mxu1 %v5947_v20 }
  0x3d   :  { %4874 = vmatprep.subr.mxu0 %v6040_v48  ;;  %4912 = vmatpush3.msra.mxu1 %v5969_v25 }
  0x3e   :  { %4875 = vmatpush3.msra.mxu0 %v6080_v63  ;;  %4913 = vmatprep.subr.mxu1 %v5975_v27 }
  0x3f   :  { %4876 = vmatprep.subr.mxu0 %v6091_v6  ;;  %4914 = vmatpush3.msra.mxu1 %v5998_v33 }
  0x40   :  { %4877 = vmatpush3.msra.mxu0 %v6105_v16  ;;  %4915 = vmatprep.subr.mxu1 %v6004_v35 }
  0x41   :  { %4878 = vmatprep.subr.mxu0 %v6119_v50  ;;  %4916 = vmatpush3.msra.mxu1 %v6013_v39 }
  0x42   :  { %4879 = vmatpush3.msra.mxu0 %v6131_v56  ;;  %4917 = vmatprep.subr.mxu1 %v9239_v9 }
  0x43   :  { %4880 = vmatprep.subr.mxu0 %v6148_v24  ;;  %4918 = vmatpush3.msra.mxu1 %v9241_v22 }
  0x44   :  { %4881 = vmatpush3.msra.mxu0 %v6160_v46  ;;  %4919 = vmatprep.subr.mxu1 %v9242_v21 }
  0x45   :  { %4882 = vmatprep.subr.mxu0 %v6187_v47  ;;  %4920 = vmatpush3.msra.mxu1 %v9244_v42 }
  0x46   :  { %4883 = vmatpush3.msra.mxu0 %v9240_v23  ;;  %4921 = vmatprep.subr.mxu1 %v9246_v14 }
  0x47   :  { %4884 = vmatprep.subr.mxu0 %v6227_v32  ;;  %4922 = vmatpush3.msra.mxu1 %v9247_v44 }
  0x48   :  { %4885 = vmatpush3.msra.mxu0 %v9243_v59  ;;  %4923 = vmatprep.subr.mxu1 %v9249_v52 }
  0x49   :  { %4886 = vmatprep.subr.mxu0 %v9245_v30  ;;  %4924 = vmatpush3.msra.mxu1 %v9250_v13 }
  0x4a   :  { %4887 = vmatpush3.msra.mxu0 %v6274_v45  ;;  %4925 = vmatprep.subr.mxu1 %v9251_v8  ;;  %v9254_v8 = vld [vmem:[#allocation21_spill] sm:$0xff] }
  0x4b   :  { %4888 = vmatprep.subr.mxu0 %v9248_v37  ;;  %731 = vmatprep.mubr.f32.mxu0 %v6419_v2 }
  0x4c   :  { %4889 = vmatpush3.msra.mxu0 %v6298_v31  ;;  %4926 = vmatpush3.msra.mxu1 %v9252_v55 }
  0x4d   :  { %4890 = vmatprep.subr.mxu0 %v6320_v7  ;;  %4927 = vmatprep.subr.mxu1 %v6216_v36  ;;  %v9257_v36 = vand.u32 4294901760, %v5972_v26  ;;  %v9263_v26 = vand.u32 4294901760, %v6026_v43 }
  0x4e   :  { %4891 = vmatpush3.msra.mxu0 %v6331_v1  ;;  %4928 = vmatpush3.msra.mxu1 %v6230_v62  ;;  %v9255_v62 = vld [vmem:[#allocation3_spill] sm:$0xff] }
  0x4f   :  { %4892 = vmatprep.subr.mxu0 %v6350_v0  ;;  %4929 = vmatprep.subr.mxu1 %v9253_v15  ;;  %v9256_v15 = vand.u32 4294901760, %v9255_v62  ;;  %v9262_v62 = vand.u32 4294901760, %v6010_v38  ;;  %v9270_v38 = vand.u32 4294901760, %v6148_v24  ;;  %v9280_v24 = vand.u32 4294901760, %v6274_v45 }
  0x50   :  { %4893 = vmatpush3.msra.mxu0 %v6358_v60  ;;  %4930 = vmatpush3.msra.mxu1 %v6258_v51  ;;  %v9259_v51 = vand.u32 4294901760, %v6419_v2  ;;  %v9281_v2 = vand.u32 4294901760, %v9248_v37  ;;  %v9283_v45 = vand.u32 4294901760, %v6298_v31  ;;  %v9285_v31 = vand.u32 4294901760, %v6320_v7 }
  0x51   :  { %4894 = vmatprep.subr.mxu0 %v6362_v29  ;;  %4931 = vmatprep.subr.mxu1 %v9254_v8  ;;  %v9258_v8 = vand.u32 4294901760, %v5978_v28  ;;  %v9264_v28 = vand.u32 4294901760, %v6040_v48  ;;  %v9271_v48 = vand.u32 4294901760, %v6160_v46  ;;  %v9276_v46 = vand.u32 4294901760, %v9243_v59 }
  0x52   :  { %4895 = vmatpush3.msra.mxu0 %v6373_v17  ;;  %4932 = vmatpush3.msra.mxu1 %v6294_v58  ;;  %v9260_v58 = vand.u32 4294901760, %v6001_v34  ;;  %v9265_v34 = vand.u32 4294901760, %v6080_v63  ;;  %v9272_v63 = vand.u32 4294901760, %v6187_v47  ;;  %v9275_v47 = vand.u32 4294901760, %v6227_v32 }
  0x53   :  { %4896 = vmatprep.subr.mxu0 %v6380_v61  ;;  %4933 = vmatprep.subr.mxu1 %v6311_v57  ;;  %v9261_v57 = vand.u32 4294901760, %v6422_v49  ;;  %v9278_v32 = vand.u32 4294901760, %v9245_v30  ;;  %v92_v30 = vld [vmem:[%s8926_s1 + $0x1d0] sm:$0xff] }
  0x54   :  { %4897 = vmatpush3.msra.mxu0 %v6397_v41  ;;  %4934 = vmatpush3.msra.mxu1 %v6327_v53 }
  0x55   :  { %4898 = vmatprep.subr.mxu0 %v6412_v54  ;;  %838 = vmatprep.mubr.f32.mxu1 %v9259_v51  ;;  %v77_v51 = vld [vmem:[%s8926_s1 + $0x158] sm:$0xff] }
  0x56   :  { %4899 = vmatpush3.msra.mxu0 %v6416_v40  ;;  %842 = vmatmul.mubr.f32.vlgmr.msra.gmra.mxu1 %v9261_v57 }
  0x57   :  { %734 = vmatmul.mubr.f32.vlgmr.msra.gmra.mxu0 %v6422_v49  ;;  %4938 = vmatprep.subr.mxu0 %v9256_v15 }
  0x58   :  { %4939 = vmatpush3.msra.mxu0 %v9257_v36  ;;  %4973 = vmatprep.subr.mxu1 %v5907_v3  ;;  %v9266_v36 = vand.u32 4294901760, %v6091_v6  ;;  %v9267_v3 = vand.u32 4294901760, %v6105_v16  ;;  %v9274_v16 = vand.u32 4294901760, %v9240_v23  ;;  %v93_v23 = vld [vmem:[%s8926_s1 + $0x1d8] sm:$0xff] }
  0x59   :  { %4940 = vmatprep.subr.mxu0 %v9258_v8  ;;  %4974 = vmatpush3.msra.mxu1 %v5909_v4  ;;  %v81_v4 = vld [vmem:[%s8926_s1 + $0x178] sm:$0xff] }
  0x5a   :  { %4941 = vmatpush3.msra.mxu0 %v9260_v58  ;;  %4975 = vmatprep.subr.mxu1 %v5911_v5  ;;  %v9268_v5 = vand.u32 4294901760, %v6119_v50  ;;  %v6558_v43 = vand.u32 4294901760, %v81_v4  ;;  %v78_v50 = vld [vmem:[%s8926_s1 + $0x160] sm:$0xff] }
  0x5b   :  { %4942 = vmatprep.subr.mxu0 %v9262_v62  ;;  %4976 = vmatpush3.msra.mxu1 %v5922_v10  ;;  %v97_v10 = vld [vmem:[%s8926_s1 + $0x1f8] sm:$0xff]  ;;  %v6624_v49 = vand.u32 4294901760, %v78_v50 }
  0x5c   :  { %4943 = vmatpush3.msra.mxu0 %v9263_v26  ;;  %4977 = vmatprep.subr.mxu1 %v5924_v11  ;;  %v9269_v11 = vand.u32 4294901760, %v6131_v56  ;;  %v9287_v26 = vand.u32 4294901760, %v6331_v1 }
  0x5d   :  { %4944 = vmatprep.subr.mxu0 %v9264_v28  ;;  %4978 = vmatpush3.msra.mxu1 %v5926_v12  ;;  %v80_v12 = vld [vmem:[%s8926_s1 + $0x170] sm:$0xff]  ;;  %9282 = vst [vmem:[#allocation6_spill] sm:$0xff] %v6624_v49  ;;  %v6662_v28 = vsub.f32 %v78_v50, %v6624_v49 }
  0x5e   :  { %4945 = vmatpush3.msra.mxu0 %v9265_v34  ;;  %4979 = vmatprep.subr.mxu1 %v5942_v18  ;;  %v96_v18 = vld [vmem:[%s8926_s1 + $0x1f0] sm:$0xff]  ;;  %v6571_v6 = vand.u32 4294901760, %v80_v12  ;;  %v6664_v34 = vand.u32 4294901760, %v93_v23 }
  0x5f   :  { %4946 = vmatprep.subr.mxu0 %v9266_v36  ;;  %4980 = vmatpush3.msra.mxu1 %v5944_v19  ;;  %v6566_v19 = vand.u32 4294901760, %v97_v10  ;;  %v6579_v15 = vand.u32 4294901760, %v96_v18  ;;  %v9009_v50 = vand.u32 4294901760, %v6662_v28 }
  0x60   :  { %4947 = vmatpush3.msra.mxu0 %v9267_v3  ;;  %4981 = vmatprep.subr.mxu1 %v5947_v20  ;;  %9273 = vst [vmem:[#allocation4_spill] sm:$0xff] %v6571_v6  ;;  %v95_v20 = vld [vmem:[%s8926_s1 + $0x1e8] sm:$0xff]  ;;  %9289 = vst [vmem:[#allocation19_spill] sm:$0xff] %v6664_v34 }
  0x61   :  { %4948 = vmatprep.subr.mxu0 %v9268_v5  ;;  %4982 = vmatpush3.msra.mxu1 %v5969_v25  ;;  %v79_v25 = vld [vmem:[%s8926_s1 + $0x168] sm:$0xff]  ;;  %v6599_v56 = vsub.f32 %v97_v10, %v6566_v19  ;;  %v6619_v58 = vsub.f32 %v96_v18, %v6579_v15  ;;  %v9295_v18 = vand.u32 4294901760, %v6373_v17 }
  0x62   :  { %4949 = vmatpush3.msra.mxu0 %v9269_v11  ;;  %4983 = vmatprep.subr.mxu1 %v5975_v27  ;;  %v6588_v27 = vsub.f32 %v81_v4, %v6558_v43  ;;  %v6607_v57 = vand.u32 4294901760, %v79_v25  ;;  %v6687_v4 = vand.u32 4294901760, %v92_v30  ;;  %v9293_v11 = vand.u32 4294901760, %v6362_v29 }
  0x63   :  { %4950 = vmatprep.subr.mxu0 %v9270_v38  ;;  %4984 = vmatpush3.msra.mxu1 %v5998_v33  ;;  %v6593_v33 = vand.u32 4294901760, %v95_v20  ;;  %v9012_v37 = vand.u32 4294901760, %v6599_v56  ;;  %v9010_v7 = vand.u32 4294901760, %v6619_v58 }
  0x64   :  { %4951 = vmatpush3.msra.mxu0 %v9271_v48  ;;  %4985 = vmatprep.subr.mxu1 %v6004_v35  ;;  %v6605_v35 = vsub.f32 %v80_v12, %v6571_v6  ;;  %9279 = vst [vmem:[#allocation5_spill] sm:$0xff] %v6607_v57  ;;  %v9011_v8 = vand.u32 4294901760, %v6588_v27  ;;  %v6646_v59 = vsub.f32 %v79_v25, %v6607_v57  ;;  %9292 = vst [vmem:[#allocation9_spill] sm:$0xff] %v6687_v4  ;;  %v9294_v12 = vld [vmem:[#allocation12_spill] sm:$0xff]  ;;  %v9296_v48 = vld [vmem:[#allocation26_spill] sm:$0xff] }
  0x65   :  { %4952 = vmatprep.subr.mxu0 %v9272_v63  ;;  %4986 = vmatpush3.msra.mxu1 %v6013_v39  ;;  %9277 = vst [vmem:[#allocation14_spill] sm:$0xff] %v6593_v33  ;;  %v94_v39 = vld [vmem:[%s8926_s1 + $0x1e0] sm:$0xff]  ;;  %v6685_v3 = vsub.f32 %v6599_v56, %v9012_v37  ;;  %v6711_v29 = vsub.f32 %v6619_v58, %v9010_v7  ;;  %v9299_v25 = vand.u32 4294901760, %v6380_v61  ;;  %v9314_v37 = vld [vmem:[#allocation21_spill] sm:$0xff] }
  0x66   :  { %4953 = vmatpush3.msra.mxu0 %v9274_v16  ;;  %4987 = vmatprep.subr.mxu1 %v9239_v9  ;;  %v6630_v9 = vand.u32 4294901760, %v94_v39  ;;  %v9008_v62 = vand.u32 4294901760, %v6605_v35  ;;  %v6669_v36 = vsub.f32 %v6588_v27, %v9011_v8  ;;  %v9006_v38 = vand.u32 4294901760, %v6646_v59  ;;  %v74_v16 = vld [vmem:[%s8926_s1 + $0x140] sm:$0xff] }
  0x67   :  { %4954 = vmatprep.subr.mxu0 %v9275_v47  ;;  %4988 = vmatpush3.msra.mxu1 %v9241_v22  ;;  %v76_v22 = vld [vmem:[%s8926_s1 + $0x150] sm:$0xff]  ;;  %v6737_v61 = vsub.f32 %v93_v23, %v6664_v34  ;;  %v6753_v23 = vsub.f32 %v92_v30, %v6687_v4 }
  0x68   :  { %4955 = vmatpush3.msra.mxu0 %v9276_v46  ;;  %4989 = vmatprep.subr.mxu1 %v9242_v21  ;;  %9284 = vst [vmem:[#allocation17_spill] sm:$0xff] %v6630_v9  ;;  %v6640_v21 = vsub.f32 %v95_v20, %v6593_v33  ;;  %v6671_v1 = vand.u32 4294901760, %v76_v22  ;;  %v6691_v10 = vsub.f32 %v94_v39, %v6630_v9  ;;  %v90_v46 = vld [vmem:[%s8926_s1 + $0x1c0] sm:$0xff]  ;;  %v9302_v39 = vld [vmem:[#allocation15_spill] sm:$0xff] }
  0x69   :  { %4956 = vmatprep.subr.mxu0 %v9278_v32  ;;  %4990 = vmatpush3.msra.mxu1 %v9244_v42  ;;  %v6648_v42 = vand.u32 4294901760, %v77_v51  ;;  %v6734_v32 = vld [vmem:[%s8926_s1 + $0x1b8] sm:$0xff]  ;;  %v6768_v30 = vsub.f32 %v6646_v59, %v9006_v38 }
  0x6a   :  { %4957 = vmatpush3.msra.mxu0 %v9280_v24  ;;  %4991 = vmatprep.subr.mxu1 %v9246_v14  ;;  %v9288_v14 = vand.u32 4294901760, %v6350_v0  ;;  %9290 = vst [vmem:[#allocation8_spill] sm:$0xff] %v6671_v1  ;;  %v75_v0 = vld [vmem:[%s8926_s1 + $0x148] sm:$0xff]  ;;  %v9007_v5 = vand.u32 4294901760, %v6640_v21  ;;  %v6725_v47 = vsub.f32 %v76_v22, %v6671_v1  ;;  %v5835_v22 = vld [vmem:[%s8925_s0 + $0x4] ss:$16 sps:$4 sm:$0xff]  }
  0x6b   :  { %4958 = vmatprep.subr.mxu0 %v9281_v2  ;;  %9286 = vst [vmem:[#allocation7_spill] sm:$0xff] %v6648_v42  ;;  %4992 = vmatpush3.msra.mxu1 %v9247_v44  ;;  %v91_v44 = vld [vmem:[%s8926_s1 + $0x1c8] sm:$0xff]  ;;  %v6715_v20 = vand.u32 4294901760, %v75_v0  ;;  %v9013_v2 = vand.u32 4294901760, %v6691_v10  ;;  %v9318_v24 = vld [vmem:[#allocation24_spill] sm:$0xff] }
  0x6c   :  { %4959 = vmatpush3.msra.mxu0 %v9283_v45  ;;  %4993 = vmatprep.subr.mxu1 %v9249_v52  ;;  %v9291_v52 = vand.u32 4294901760, %v6358_v60  ;;  %v6697_v60 = vsub.f32 %v77_v51, %v6648_v42  ;;  %v6713_v63 = vand.u32 4294901760, %v91_v44  ;;  %9300 = vst [vmem:[#allocation11_spill] sm:$0xff] %v6725_v47  ;;  %v6746_v51 = vsub.f32 %v6640_v21, %v9007_v5  ;;  %v73_v45 = vld [vmem:[%s8926_s1 + $0x138] sm:$0xff]  ;;  %v9313_v5 = vld [vmem:[#allocation20_spill] sm:$0xff] }
  0x6d   :  { %4960 = vmatprep.subr.mxu0 %v9285_v31  ;;  %4994 = vmatpush3.msra.mxu1 %v9250_v13  ;;  %v6702_v13 = vsub.f32 %v6605_v35, %v9008_v62  ;;  %9298 = vst [vmem:[#allocation10_spill] sm:$0xff] %v6715_v20  ;;  %v9303_v31 = vand.u32 4294901760, %v6412_v54  ;;  %v9306_v54 = vand.u32 4294901760, %v6416_v40  ;;  %v6793_v40 = vsub.f32 %v6662_v28, %v9009_v50 }
  0x6e   :  { %4961 = vmatpush3.msra.mxu0 %v9287_v26  ;;  %4995 = vmatprep.subr.mxu1 %v9294_v12  ;;  %9297 = vst [vmem:[#allocation22_spill] sm:$0xff] %v6713_v63  ;;  %v9304_v26 = vld [vmem:[#allocation16_spill] sm:$0xff]  ;;  %v6811_v50 = vsub.f32 %v6691_v10, %v9013_v2  ;;  %v6815_v8 = vsub.f32 %v91_v44, %v6713_v63  ;;  %v9315_v44 = vld [vmem:[#allocation23_spill] sm:$0xff] }
  0x6f   :  { %4962 = vmatprep.subr.mxu0 %v9288_v14  ;;  %1008 = vmatprep.mubr.f32.mxu0 %v9296_v48  ;;  %v5838_v12 = vld [vmem:[%s8925_s0 + $0x24] ss:$16 sps:$4 sm:$0xff]   ;;  %v9317_v14 = vld [vmem:[#allocation25_spill] sm:$0xff] }
  0x70   :  { %4963 = vmatpush3.msra.mxu0 %v9291_v52  ;;  %4996 = vmatpush3.msra.mxu1 %v9252_v55  ;;  %v9301_v55 = vand.u32 4294901760, %v6397_v41  ;;  %v72_v41 = vld [vmem:[%s8926_s1 + $0x130] sm:$0xff]  ;;  %v6770_v52 = vand.u32 4294901760, %v74_v16  ;;  %v194_v17 = vrot.slane %v5835_v22, %v9317_v14  ;;  %v70_v22 = vld [vmem:[%s8926_s1 + $0x120] sm:$0xff] }
  0x71   :  { %4964 = vmatprep.subr.mxu0 %v9293_v11  ;;  %4997 = vmatprep.subr.mxu1 %v9302_v39  ;;  %v9014_v11 = vand.u32 4294901760, %v6697_v60  ;;  %v6783_v39 = vand.u32 4294901760, %v90_v46  ;;  %v6803_v38 = vand.u32 4294901760, %v72_v41 }
  0x72   :  { %4965 = vmatpush3.msra.mxu0 %v9295_v18  ;;  %4998 = vmatpush3.msra.mxu1 %v9304_v26  ;;  %9305 = vst [vmem:[#allocation13_spill] sm:$0xff] %v6770_v52  ;;  %v9307_v18 = vld [vmem:[#allocation18_spill] sm:$0xff]  ;;  %v9310_v26 = vld [vmem:[#allocation27_spill] sm:$0xff] }
  0x73   :  { %4966 = vmatprep.subr.mxu0 %v9299_v25  ;;  %4999 = vmatprep.subr.mxu1 %v9307_v18  ;;  %9308 = vst [vmem:[#allocation3_spill] sm:$0xff] %v6783_v39  ;;  %v6796_v18 = vand.u32 4294901760, %v73_v45  ;;  %9312 = vst [vmem:[#allocation15_spill] sm:$0xff] %v6803_v38  ;;  %v6826_v62 = vsub.f32 %v6697_v60, %v9014_v11  ;;  %v208_v11 = vrot.slane %v5838_v12, %v9317_v14  ;;  %v86_v14 = vld [vmem:[%s8926_s1 + $0x1a0] sm:$0xff] }
  0x74   :  { %4967 = vmatpush3.msra.mxu0 %v9301_v55  ;;  %v6781_v55 = vsub.f32 %v75_v0, %v6715_v20  ;;  %v6801_v0 = vld [vmem:[%s8926_s1 + $0x1b0] sm:$0xff]  ;;  %5000 = vmatpush3.msra.mxu1 %v9313_v5  ;;  %v6821_v5 = vsub.f32 %v74_v16, %v6770_v52  ;;  %v6838_v16 = vsub.f32 %v90_v46, %v6783_v39  ;;  %v9320_v12 = vand.u32 4294901760, %v6753_v23 }
  0x75   :  { %4968 = vmatprep.subr.mxu0 %v9303_v31  ;;  %v6786_v31 = vand.u32 4294901760, %v6734_v32  ;;  %9311 = vst [vmem:[#allocation26_spill] sm:$0xff] %v6796_v18  ;;  %5001 = vmatprep.subr.mxu1 %v9314_v37  ;;  %v6832_v25 = vand.u32 4294901760, %v6801_v0  ;;  %v71_v37 = vld [vmem:[%s8926_s1 + $0x128] sm:$0xff]  ;;  %v6851_v7 = vsub.f32 %v73_v45, %v6796_v18  ;;  %v6854_v46 = vsub.f32 %v72_v41, %v6803_v38  ;;  %v69_v41 = vld [vmem:[%s8926_s1 + $0x118] sm:$0xff] }
  0x76   :  { %4969 = vmatpush3.msra.mxu0 %v9306_v54  ;;  %v9015_v54 = vand.u32 4294901760, %v6737_v61  ;;  %5002 = vmatpush3.msra.mxu1 %v9315_v44  ;;  %v87_v45 = vld [vmem:[%s8926_s1 + $0x1a8] sm:$0xff] }
  0x77   :  { %9309 = vst [vmem:[#allocation12_spill] sm:$0xff] %v6786_v31  ;;  %1010 = vmatmul.mubr.f32.vlgmr.msra.gmra.mxu0 %v9310_v26  ;;  %5008 = vmatprep.subr.mxu0 %v6566_v19  ;;  %9316 = vst [vmem:[#allocation16_spill] sm:$0xff] %v6832_v25  ;;  %v6887_v44 = vsub.f32 %v6734_v32, %v6786_v31  ;;  %v9325_v32 = vand.u32 4294901760, %v6685_v3  ;;  %v9329_v3 = vand.u32 4294901760, %v6781_v55 }
  0x78   :  { %5009 = vmatpush3.msra.mxu0 %v6558_v43  ;;  %5003 = vmatprep.subr.mxu1 %v9318_v24  ;;  %v6848_v2 = vsub.f32 %v6737_v61, %v9015_v54  ;;  %9319 = vst [vmem:[#allocation18_spill] sm:$0xff] %v6851_v7  ;;  %v1369_v24 = vand.u32 4294901760, %v6811_v50  ;;  %v6865_v54 = vsub.f32 %v6753_v23, %v9320_v12  ;;  %v9321_v50 = vand.u32 4294901760, %v6725_v47 }
  0x79   :  { %5010 = vmatprep.subr.mxu0 %v6579_v15  ;;  %5004 = vmatpush3.msra.mxu1 %v6327_v53  ;;  %9323 = vst [vmem:[#allocation20_spill] sm:$0xff] %v6887_v44  ;;  %v6895_v53 = vand.u32 4294901760, %v70_v22 }
  0x7a   :  { %5011 = vmatpush3.msra.mxu0 %v6571_v6  ;;  %1112 = vmatprep.mubr.f32.mxu1 %v9296_v48  ;;  %v6881_v12 = vsub.f32 %v6725_v47, %v9321_v50  ;;  %v6902_v6 = vand.u32 4294901760, %v87_v45  ;;  %v6904_v47 = vand.u32 4294901760, %v86_v14  ;;  %v1383_v50 = vand.u32 4294901760, %v6865_v54 }
  0x7b   :  { %5012 = vmatprep.subr.mxu0 %v6593_v33  ;;  %1114 = vmatmul.mubr.f32.vlgmr.msra.gmra.mxu1 %v9310_v26  ;;  %9324 = vst [vmem:[#allocation21_spill] sm:$0xff] %v6895_v53  ;;  %v1376_v33 = vand.u32 4294901760, %v6848_v2  ;;  %v9327_v26 = vand.u32 4294901760, %v6669_v36  ;;  %v9328_v48 = vand.u32 4294901760, %v6815_v8  ;;  %v6918_v2 = vsub.f32 %v6781_v55, %v9329_v3  ;;  %v68_v3 = vld [vmem:[%s8926_s1 + $0x110] sm:$0xff] }
  0x7c   :  { %5013 = vmatpush3.msra.mxu0 %v6607_v57  ;;  %v6883_v57 = vand.u32 4294901760, %v71_v37  ;;  %5043 = vmatprep.subr.mxu1 %v9325_v32  ;;  %9326 = vst [vmem:[#allocation23_spill] sm:$0xff] %v6902_v6  ;;  %v9330_v36 = vand.u32 4294901760, %v6711_v29  ;;  %v1271_v54 = vand.u32 4294901760, %v6881_v12  ;;  %v9331_v29 = vand.u32 4294901760, %v6702_v13 }
  0x7d   :  { %5014 = vmatprep.subr.mxu0 %v6630_v9  ;;  %v212_v9 = vcombine.high %v194_v17, %v208_v11  ;;  %5044 = vmatpush3.msra.mxu1 %v9327_v26  ;;  %v6935_v26 = vsub.f32 %v6801_v0, %v6832_v25  ;;  %v9332_v12 = vand.u32 4294901760, %v6838_v16  ;;  %v9333_v0 = vand.u32 4294901760, %v6821_v5 }
  0x7e   :  { %9322 = vst [vmem:[#allocation27_spill] sm:$0xff] %v6883_v57  ;;  %5015 = vmatpush3.msra.mxu0 %v6624_v49  ;;  %v211_v49 = vcombine.low %v194_v17, %v208_v11  ;;  %v85_v17 = vld [vmem:[%s8926_s1 + $0x198] sm:$0xff]  ;;  %v6923_v11 = vand.u32 4294901760, %v69_v41  ;;  %5045 = vmatprep.subr.mxu1 %v9330_v36  ;;  %v6949_v36 = vsub.f32 %v70_v22, %v6895_v53  ;;  %v9335_v13 = vand.u32 4294901760, %v6746_v51  ;;  %v84_v22 = vld [vmem:[%s8926_s1 + $0x190] sm:$0xff] }
  0x7f   :  { %5016 = vmatprep.subr.mxu0 %v6664_v34  ;;  %v6913_v34 = vsub.f32 %v6815_v8, %v9328_v48  ;;  %v6930_v48 = vsub.f32 %v71_v37, %v6883_v57  ;;  %5046 = vmatpush3.msra.mxu1 %v9331_v29  ;;  %v6946_v37 = vsub.f32 %v6838_v16, %v9332_v12  ;;  %v6961_v29 = vand.u32 4294901760, %v85_v17 }
  0x80   :  { %5017 = vmatpush3.msra.mxu0 %v6648_v42  ;;  %v6954_v32 = vsub.f32 %v6821_v5, %v9333_v0  ;;  %5047 = vmatprep.subr.mxu1 %v9335_v13  ;;  %v6970_v0 = vand.u32 4294901760, %v211_v49  ;;  %v1278_v13 = vand.u32 4294901760, %v6918_v2  ;;  %v6978_v12 = vsub.f32 %v69_v41, %v6923_v11  ;;  %v67_v41 = vld [vmem:[%s8926_s1 + $0x108] sm:$0xff] }
  0x81   :  { %5018 = vmatprep.subr.mxu0 %v6687_v4  ;;  %v6956_v4 = vand.u32 4294901760, %v212_v9  ;;  %v1390_v51 = vand.u32 4294901760, %v6913_v34  ;;  %v6980_v42 = vand.u32 4294901760, %v68_v3  ;;  %v6995_v2 = vsub.f32 %v86_v14, %v6904_v47 }
  0x82   :  { %5019 = vmatpush3.msra.mxu0 %v6671_v1  ;;  %v6968_v1 = vsub.f32 %v87_v45, %v6902_v6  ;;  %9336 = vst [vmem:[#allocation28_spill] sm:$0xff] %v6970_v0  ;;  %v83_v45 = vld [vmem:[%s8926_s1 + $0x188] sm:$0xff]  ;;  %v9341_v14 = vand.u32 4294901760, %v6851_v7 }
  0x83   :  { %9334 = vst [vmem:[#allocation24_spill] sm:$0xff] %v6956_v4  ;;  %5020 = vmatprep.subr.mxu0 %v6713_v63  ;;  %v9337_v63 = vand.u32 4294901760, %v6768_v30  ;;  %v7005_v30 = vsub.f32 %v212_v9, %v6956_v4  ;;  %v66_v9 = vld [vmem:[%s8926_s1 + $0x100] sm:$0xff]  ;;  %1456 = vmatprep.mubr.f32.mxu1 %v6956_v4  ;;  %v9378_v4 = vld [vmem:[#allocation23_spill] sm:$0xff] }
  0x84   :  { %5021 = vmatpush3.msra.mxu0 %v6715_v20  ;;  %v9338_v20 = vand.u32 4294901760, %v6887_v44  ;;  %v1291_v34 = vsub.f32 %v6851_v7, %v9341_v14  ;;  %v7029_v14 = vand.u32 4294901760, %v67_v41  ;;  %v9343_v7 = vand.u32 4294901760, %v6935_v26 }
  0x85   :  { %5048 = vmatpush3.msra.mxu1 %v9337_v63  ;;  %5022 = vmatprep.subr.mxu0 %v6783_v39  ;;  %v9339_v39 = vand.u32 4294901760, %v6793_v40  ;;  %v82_v40 = vld [vmem:[%s8926_s1 + $0x180] sm:$0xff] }
  0x86   :  { %5049 = vmatprep.subr.mxu1 %v1369_v24  ;;  %v1403_v63 = vsub.f32 %v6887_v44, %v9338_v20  ;;  %5023 = vmatpush3.msra.mxu0 %v6770_v52  ;;  %v1397_v24 = vand.u32 4294901760, %v6946_v37  ;;  %v1285_v20 = vand.u32 4294901760, %v6954_v32  ;;  %v7002_v44 = vand.u32 4294901760, %v84_v22 }
  0x87   :  { %5050 = vmatpush3.msra.mxu1 %v9339_v39  ;;  %5024 = vmatprep.subr.mxu0 %v6786_v31  ;;  %v7011_v52 = vand.u32 4294901760, %v83_v45  ;;  %v7021_v32 = vsub.f32 %v211_v49, %v6970_v0  ;;  %v7027_v37 = vsub.f32 %v68_v3, %v6980_v42  ;;  %v7033_v31 = vsub.f32 %v85_v17, %v6961_v29 }
  0x88   :  { %9340 = vst [vmem:[#allocation29_spill] sm:$0xff] %v7002_v44  ;;  %5051 = vmatprep.subr.mxu1 %v1376_v33  ;;  %5025 = vmatpush3.msra.mxu0 %v6796_v18  ;;  %v9342_v33 = vand.u32 4294901760, %v6826_v62  ;;  %v1404_v49 = vand.u32 4294901760, %v1403_v63  ;;  %v1410_v18 = vsub.f32 %v6935_v26, %v9343_v7  ;;  %v9344_v62 = vand.u32 4294901760, %v6854_v46 }
  0x89   :  { %5026 = vmatprep.subr.mxu0 %v6832_v25  ;;  %v7044_v39 = vand.u32 4294901760, %v82_v40  ;;  %v7046_v17 = vand.u32 4294901760, %v66_v9  ;;  %v7050_v63 = vsub.f32 %v84_v22, %v7002_v44  ;;  %v1292_v7 = vand.u32 4294901760, %v1291_v34 }
  0x8a   :  { %5052 = vmatpush3.msra.mxu1 %v9342_v33  ;;  %v1298_v3 = vsub.f32 %v6854_v46, %v9344_v62  ;;  %5027 = vmatpush3.msra.mxu0 %v6803_v38  ;;  %v9345_v62 = vand.u32 4294901760, %v6968_v1  ;;  %v9346_v22 = vand.u32 4294901760, %v6930_v48  ;;  %v7067_v34 = vsub.f32 %v83_v45, %v7011_v52 }
  0x8b   :  { %5053 = vmatprep.subr.mxu1 %v1383_v50  ;;  %5028 = vmatprep.subr.mxu0 %v6902_v6  ;;  %v7060_v50 = vsub.f32 %v67_v41, %v7029_v14  ;;  %v9347_v38 = vand.u32 4294901760, %v6995_v2  ;;  %v9349_v45 = vand.u32 4294901760, %v7005_v30 }
  0x8c   :  { %5054 = vmatpush3.msra.mxu1 %v1271_v54  ;;  %v1417_v33 = vsub.f32 %v6968_v1, %v9345_v62  ;;  %5029 = vmatpush3.msra.mxu0 %v6883_v57  ;;  %v1305_v6 = vsub.f32 %v6930_v48, %v9346_v22  ;;  %v1411_v62 = vand.u32 4294901760, %v1410_v18  ;;  %v1299_v54 = vand.u32 4294901760, %v1298_v3 }
  0x8d   :  { %5055 = vmatprep.subr.mxu1 %v1390_v51  ;;  %5030 = vmatprep.subr.mxu0 %v6904_v47  ;;  %v7076_v22 = vsub.f32 %v66_v9, %v7046_v17  ;;  %v1218_v51 = vsub.f32 %v7005_v30, %v9349_v45  ;;  %v7083_v18 = vsub.f32 %v82_v40, %v7044_v39  ;;  %v9351_v3 = vand.u32 4294901760, %v6949_v36 }
  0x8e   :  { %5056 = vmatpush3.msra.mxu1 %v1278_v13  ;;  %v1424_v13 = vsub.f32 %v6995_v2, %v9347_v38  ;;  %5031 = vmatpush3.msra.mxu0 %v6895_v53  ;;  %v1418_v38 = vand.u32 4294901760, %v1417_v33  ;;  %v9352_v9 = vand.u32 4294901760, %v7021_v32  ;;  %v1306_v45 = vand.u32 4294901760, %v1305_v6 }
  0x8f   :  { %5057 = vmatprep.subr.mxu1 %v1397_v24  ;;  %9348 = vst [vmem:[#allocation30_spill] sm:$0xff] %v7076_v22  ;;  %9350 = vst [vmem:[#allocation31_spill] sm:$0xff] %v7083_v18  ;;  %5032 = vmatprep.subr.mxu0 %v6961_v29  ;;  %v9353_v40 = vand.u32 4294901760, %v7033_v31  ;;  %v1219_v6 = vand.u32 4294901760, %v1218_v51  ;;  %v9061_v53 = vand.u32 4294901760, %v7076_v22  ;;  %v9357_v51 = vand.u32 4294901760, %v7067_v34 }
  0x90   :  { %5058 = vmatpush3.msra.mxu1 %v1285_v20  ;;  %v1312_v20 = vsub.f32 %v6949_v36, %v9351_v3  ;;  %v1224_v41 = vsub.f32 %v7021_v32, %v9352_v9  ;;  %5033 = vmatpush3.msra.mxu0 %v6923_v11  ;;  %v1425_v33 = vand.u32 4294901760, %v1424_v13  ;;  %v9354_v3 = vand.u32 4294901760, %v6978_v12 }
  0x91   :  { %5059 = vmatprep.subr.mxu1 %v1404_v49  ;;  %v1431_v24 = vsub.f32 %v7033_v31, %v9353_v40  ;;  %5034 = vmatprep.subr.mxu0 %v7002_v44  ;;  %v9062_v49 = vand.u32 4294901760, %v7083_v18  ;;  %v9356_v44 = vand.u32 4294901760, %v7027_v37 }
  0x92   :  { %5060 = vmatpush3.msra.mxu1 %v1292_v7  ;;  %v1319_v9 = vsub.f32 %v6978_v12, %v9354_v3  ;;  %5035 = vmatpush3.msra.mxu0 %v6980_v42  ;;  %v9355_v7 = vand.u32 4294901760, %v7050_v63  ;;  %v1225_v13 = vand.u32 4294901760, %v1224_v41  ;;  %v9358_v41 = vand.u32 4294901760, %v7060_v50 }
  0x93   :  { %5061 = vmatprep.subr.mxu1 %v1411_v62  ;;  %5036 = vmatprep.subr.mxu0 %v7011_v52  ;;  %v1313_v62 = vand.u32 4294901760, %v1312_v20  ;;  %v1326_v3 = vsub.f32 %v7027_v37, %v9356_v44 }
  0x94   :  { %5062 = vmatpush3.msra.mxu1 %v1299_v54  ;;  %v1438_v40 = vsub.f32 %v7050_v63, %v9355_v7  ;;  %5037 = vmatpush3.msra.mxu0 %v7029_v14  ;;  %v1432_v54 = vand.u32 4294901760, %v1431_v24  ;;  %v1445_v7 = vsub.f32 %v7067_v34, %v9357_v51  ;;  %v1333_v20 = vsub.f32 %v7060_v50, %v9358_v41  ;;  %v9362_v51 = vld [vmem:[#allocation5_spill] sm:$0xff]  ;;  %v9365_v41 = vld [vmem:[#allocation20_spill] sm:$0xff] }
  0x95   :  { %5063 = vmatprep.subr.mxu1 %v1418_v38  ;;  %5038 = vmatprep.subr.mxu0 %v7044_v39  ;;  %v1320_v38 = vand.u32 4294901760, %v1319_v9  ;;  %v1452_v24 = vsub.f32 %v7083_v18, %v9062_v49  ;;  %v9376_v49 = vld [vmem:[#allocation26_spill] sm:$0xff] }
  0x96   :  { %5064 = vmatpush3.msra.mxu1 %v1306_v45  ;;  %5039 = vmatpush3.msra.mxu0 %v7046_v17  ;;  %v1439_v44 = vand.u32 4294901760, %v1438_v40  ;;  %v1327_v45 = vand.u32 4294901760, %v1326_v3  ;;  %v1446_v9 = vand.u32 4294901760, %v1445_v7  ;;  %v9360_v3 = vld [vmem:[#allocation4_spill] sm:$0xff]  ;;  %v9363_v7 = vld [vmem:[#allocation17_spill] sm:$0xff] }
  0x97   :  { %5065 = vmatprep.subr.mxu1 %v1425_v33  ;;  %1220 = vmatprep.mubr.f32.mxu0 %v1219_v6  ;;  %v1340_v33 = vsub.f32 %v7076_v22, %v9061_v53  ;;  %v1334_v6 = vand.u32 4294901760, %v1333_v20  ;;  %v1453_v40 = vand.u32 4294901760, %v1452_v24  ;;  %v9366_v20 = vld [vmem:[#allocation19_spill] sm:$0xff]  ;;  %v9375_v53 = vld [vmem:[#allocation12_spill] sm:$0xff] }
  0x98   :  { %5066 = vmatpush3.msra.mxu1 %v1313_v62  ;;  %1226 = vmatmul.mubr.f32.vlgmr.msra.gmra.mxu0 %v1225_v13  ;;  %v9359_v13 = vld [vmem:[#allocation11_spill] sm:$0xff] }
  0x99   :  { %5067 = vmatprep.subr.mxu1 %v1432_v54  ;;  %5078 = vmatprep.subr.mxu0 %v6599_v56  ;;  %v1341_v62 = vand.u32 4294901760, %v1340_v33  ;;  %v9361_v54 = vld [vmem:[#allocation14_spill] sm:$0xff]  ;;  %v9368_v24 = vld [vmem:[#allocation7_spill] sm:$0xff]  ;;  %v9370_v33 = vld [vmem:[#allocation8_spill] sm:$0xff] }
  0x9a   :  { %5068 = vmatpush3.msra.mxu1 %v1320_v38  ;;  %5079 = vmatpush3.msra.mxu0 %v6588_v27  ;;  %v9364_v38 = vld [vmem:[#allocation6_spill] sm:$0xff] }
  0x9b   :  { %5069 = vmatprep.subr.mxu1 %v1439_v44  ;;  %5080 = vmatprep.subr.mxu0 %v6619_v58  ;;  %v9367_v44 = vld [vmem:[#allocation18_spill] sm:$0xff] }
  0x9c   :  { %5070 = vmatpush3.msra.mxu1 %v1327_v45  ;;  %5081 = vmatpush3.msra.mxu0 %v6605_v35  ;;  %v9369_v45 = vld [vmem:[#allocation9_spill] sm:$0xff] }
  0x9d   :  { %5071 = vmatprep.subr.mxu1 %v1446_v9  ;;  %5082 = vmatprep.subr.mxu0 %v6640_v21  ;;  %v9371_v9 = vld [vmem:[#allocation22_spill] sm:$0xff] }
  0x9e   :  { %5072 = vmatpush3.msra.mxu1 %v1334_v6  ;;  %5083 = vmatpush3.msra.mxu0 %v6646_v59  ;;  %v9372_v6 = vld [vmem:[#allocation10_spill] sm:$0xff] }
  0x9f   :  { %5073 = vmatprep.subr.mxu1 %v1453_v40  ;;  %5084 = vmatprep.subr.mxu0 %v6691_v10  ;;  %v9373_v40 = vld [vmem:[#allocation3_spill] sm:$0xff] }
  0xa0   :  { %5074 = vmatpush3.msra.mxu1 %v1341_v62  ;;  %5085 = vmatpush3.msra.mxu0 %v6662_v28  ;;  %v9374_v62 = vld [vmem:[#allocation13_spill] sm:$0xff] }
  0xa1   :  { %1458 = vmatmul.mubr.f32.vlgmr.msra.gmra.mxu1 %v6970_v0  ;;  %5086 = vmatprep.subr.mxu0 %v6737_v61  ;;  %v9377_v0 = vld [vmem:[#allocation15_spill] sm:$0xff] }
  0xa2   :  { %5113 = vmatprep.subr.mxu1 %v6566_v19  ;;  %5087 = vmatpush3.msra.mxu0 %v6697_v60 }
  0xa3   :  { %5114 = vmatpush3.msra.mxu1 %v6558_v43  ;;  %5088 = vmatprep.subr.mxu0 %v6753_v23 }
  0xa4   :  { %5115 = vmatprep.subr.mxu1 %v6579_v15  ;;  %5089 = vmatpush3.msra.mxu0 %v9359_v13 }
  0xa5   :  { %5116 = vmatpush3.msra.mxu1 %v9360_v3  ;;  %5090 = vmatprep.subr.mxu0 %v6815_v8 }
  0xa6   :  { %5117 = vmatprep.subr.mxu1 %v9361_v54  ;;  %5091 = vmatpush3.msra.mxu0 %v6781_v55 }
  0xa7   :  { %5118 = vmatpush3.msra.mxu1 %v9362_v51  ;;  %5092 = vmatprep.subr.mxu0 %v6838_v16 }
  0xa8   :  { %5119 = vmatprep.subr.mxu1 %v9363_v7  ;;  %5093 = vmatpush3.msra.mxu0 %v6821_v5 }
  0xa9   :  { %5120 = vmatpush3.msra.mxu1 %v9364_v38  ;;  %5094 = vmatprep.subr.mxu0 %v9365_v41 }
  0xaa   :  { %5121 = vmatprep.subr.mxu1 %v9366_v20  ;;  %5095 = vmatpush3.msra.mxu0 %v9367_v44 }
  0xab   :  { %5122 = vmatpush3.msra.mxu1 %v9368_v24  ;;  %5096 = vmatprep.subr.mxu0 %v6935_v26 }
  0xac   :  { %5123 = vmatprep.subr.mxu1 %v9369_v45  ;;  %5097 = vmatpush3.msra.mxu0 %v6854_v46 }
  0xad   :  { %5124 = vmatpush3.msra.mxu1 %v9370_v33  ;;  %5098 = vmatprep.subr.mxu0 %v6968_v1 }
  0xae   :  { %5125 = vmatprep.subr.mxu1 %v9371_v9  ;;  %5099 = vmatpush3.msra.mxu0 %v6930_v48 }
  0xaf   :  { %5126 = vmatpush3.msra.mxu1 %v9372_v6  ;;  %5100 = vmatprep.subr.mxu0 %v6995_v2 }
  0xb0   :  { %5127 = vmatprep.subr.mxu1 %v9373_v40  ;;  %5101 = vmatpush3.msra.mxu0 %v6949_v36 }
  0xb1   :  { %5128 = vmatpush3.msra.mxu1 %v9374_v62  ;;  %5102 = vmatprep.subr.mxu0 %v7033_v31 }
  0xb2   :  { %5129 = vmatprep.subr.mxu1 %v9375_v53  ;;  %5103 = vmatpush3.msra.mxu0 %v6978_v12 }
  0xb3   :  { %5130 = vmatpush3.msra.mxu1 %v9376_v49  ;;  %5104 = vmatprep.subr.mxu0 %v7050_v63 }
  0xb4   :  { %5131 = vmatprep.subr.mxu1 %v6832_v25  ;;  %5105 = vmatpush3.msra.mxu0 %v7027_v37  ;;  %v9379_v25 = vld [vmem:[#allocation21_spill] sm:$0xff] }
  0xb5   :  { %5132 = vmatpush3.msra.mxu1 %v9377_v0  ;;  %5106 = vmatprep.subr.mxu0 %v7067_v34 }
  0xb6   :  { %5133 = vmatprep.subr.mxu1 %v9378_v4  ;;  %5107 = vmatpush3.msra.mxu0 %v7060_v50  ;;  %v9380_v4 = vand.u32 4294901760, %v6599_v56  ;;  %v9385_v56 = vand.u32 4294901760, %v6640_v21  ;;  %v9390_v21 = vand.u32 4294901760, %v7021_v32 }
  0xb7   :  { %5134 = vmatpush3.msra.mxu1 %v6883_v57  ;;  %5108 = vmatprep.subr.mxu0 %v7083_v18  ;;  %v9381_v57 = vand.u32 4294901760, %v6588_v27  ;;  %v9382_v18 = vld [vmem:[#allocation29_spill] sm:$0xff]  ;;  %v9386_v27 = vand.u32 4294901760, %v6646_v59  ;;  %v9392_v59 = vand.u32 4294901760, %v6697_v60  ;;  %v9396_v60 = vand.u32 4294901760, %v6781_v55 }
  0xb8   :  { %5135 = vmatprep.subr.mxu1 %v6904_v47  ;;  %5109 = vmatpush3.msra.mxu0 %v7076_v22  ;;  %v9383_v22 = vand.u32 4294901760, %v6619_v58  ;;  %v9389_v58 = vand.u32 4294901760, %v6662_v28  ;;  %v129_v28 = vld [vmem:[%s8926_s1 + $0x2f8] sm:$0xff] }
  0xb9   :  { %1593 = vmatprep.mubr.f32.mxu0 %v7005_v30  ;;  %5136 = vmatpush3.msra.mxu1 %v9379_v25  ;;  %v9384_v25 = vand.u32 4294901760, %v6605_v35  ;;  %v9388_v35 = vand.u32 4294901760, %v7005_v30  ;;  %v112_v30 = vld [vmem:[%s8926_s1 + $0x270] sm:$0xff] }
  0xba   :  { %1596 = vmatmul.mubr.f32.vlgmr.msra.gmra.mxu0 %v7021_v32  ;;  %5137 = vmatprep.subr.mxu1 %v6961_v29  ;;  %v9398_v32 = vand.u32 4294901760, %v6821_v5  ;;  %v9400_v5 = vand.u32 4294901760, %v9367_v44 }
  0xbb   :  { %5148 = vmatprep.subr.mxu0 %v9380_v4  ;;  %5138 = vmatpush3.msra.mxu1 %v6923_v11  ;;  %v9391_v4 = vand.u32 4294901760, %v6737_v61  ;;  %v7243_v61 = vand.u32 4294901760, %v129_v28 }
  0xbc   :  { %5149 = vmatpush3.msra.mxu0 %v9381_v57  ;;  %5139 = vmatprep.subr.mxu1 %v9382_v18  ;;  %v9387_v57 = vand.u32 4294901760, %v6691_v10  ;;  %v9393_v10 = vand.u32 4294901760, %v6753_v23  ;;  %v9397_v23 = vand.u32 4294901760, %v6838_v16  ;;  %v127_v16 = vld [vmem:[%s8926_s1 + $0x2e8] sm:$0xff] }
  0xbd   :  { %5150 = vmatprep.subr.mxu0 %v9383_v22  ;;  %5140 = vmatpush3.msra.mxu1 %v6980_v42  ;;  %v9399_v22 = vand.u32 4294901760, %v9365_v41  ;;  %v7284_v41 = vand.u32 4294901760, %v127_v16 }
  0xbe   :  { %5151 = vmatpush3.msra.mxu0 %v9384_v25  ;;  %5141 = vmatprep.subr.mxu1 %v7011_v52  ;;  %v9394_v25 = vand.u32 4294901760, %v9359_v13  ;;  %v111_v13 = vld [vmem:[%s8926_s1 + $0x268] sm:$0xff] }
  0xbf   :  { %5152 = vmatprep.subr.mxu0 %v9385_v56  ;;  %5142 = vmatpush3.msra.mxu1 %v7029_v14  ;;  %9402 = vst [vmem:[#allocation11_spill] sm:$0xff] %v7284_v41  ;;  %v7289_v44 = vand.u32 4294901760, %v111_v13 }
  0xc0   :  { %5153 = vmatpush3.msra.mxu0 %v9386_v27  ;;  %5143 = vmatprep.subr.mxu1 %v7044_v39 }
  0xc1   :  { %5154 = vmatprep.subr.mxu0 %v9387_v57  ;;  %5144 = vmatpush3.msra.mxu1 %v7046_v17  ;;  %9404 = vst [vmem:[#allocation4_spill] sm:$0xff] %v7289_v44  ;;  %v9408_v57 = vand.u32 4294901760, %v6995_v2 }
  0xc2   :  { %1700 = vmatprep.mubr.f32.mxu1 %v9388_v35  ;;  %5155 = vmatpush3.msra.mxu0 %v9389_v58  ;;  %v9410_v58 = vand.u32 4294901760, %v6949_v36 }
  0xc3   :  { %1704 = vmatmul.mubr.f32.vlgmr.msra.gmra.mxu1 %v9390_v21  ;;  %5156 = vmatprep.subr.mxu0 %v9391_v4  ;;  %v7328_v21 = vsub.f32 %v111_v13, %v7289_v44 }
  0xc4   :  { %5183 = vmatprep.subr.mxu1 %v6566_v19  ;;  %5157 = vmatpush3.msra.mxu0 %v9392_v59  ;;  %v113_v19 = vld [vmem:[%s8926_s1 + $0x278] sm:$0xff]  ;;  %v9412_v59 = vand.u32 4294901760, %v7033_v31  ;;  %v124_v31 = vld [vmem:[%s8926_s1 + $0x2d0] sm:$0xff] }
  0xc5   :  { %5184 = vmatpush3.msra.mxu1 %v6558_v43  ;;  %5158 = vmatprep.subr.mxu0 %v9393_v10  ;;  %v9395_v43 = vand.u32 4294901760, %v6815_v8  ;;  %v7248_v8 = vand.u32 4294901760, %v113_v19  ;;  %v9414_v10 = vand.u32 4294901760, %v6978_v12  ;;  %v9415_v12 = vand.u32 4294901760, %v7050_v63 }
  0xc6   :  { %5185 = vmatprep.subr.mxu1 %v6579_v15  ;;  %5159 = vmatpush3.msra.mxu0 %v9394_v25  ;;  %v128_v15 = vld [vmem:[%s8926_s1 + $0x2f0] sm:$0xff]  ;;  %v123_v25 = vld [vmem:[%s8926_s1 + $0x2c8] sm:$0xff]  ;;  %v7388_v13 = vand.u32 4294901760, %v124_v31 }
  0xc7   :  { %5186 = vmatpush3.msra.mxu1 %v9360_v3  ;;  %5160 = vmatprep.subr.mxu0 %v9395_v43  ;;  %v7256_v55 = vand.u32 4294901760, %v128_v15  ;;  %v7270_v3 = vand.u32 4294901760, %v112_v30 }
  0xc8   :  { %5187 = vmatprep.subr.mxu1 %v9361_v54  ;;  %5161 = vmatpush3.msra.mxu0 %v9396_v60  ;;  %v126_v54 = vld [vmem:[%s8926_s1 + $0x2e0] sm:$0xff]  ;;  %9421 = vst [vmem:[#allocation19_spill] sm:$0xff] %v7388_v13 }
  0xc9   :  { %5188 = vmatpush3.msra.mxu1 %v9362_v51  ;;  %5162 = vmatprep.subr.mxu0 %v9397_v23  ;;  %v7276_v51 = vsub.f32 %v129_v28, %v7243_v61  ;;  %v7300_v56 = vand.u32 4294901760, %v126_v54  ;;  %v7309_v27 = vsub.f32 %v112_v30, %v7270_v3  ;;  %v9418_v23 = vand.u32 4294901760, %v7027_v37 }
  0xca   :  { %5189 = vmatprep.subr.mxu1 %v9363_v7  ;;  %5163 = vmatpush3.msra.mxu0 %v9398_v32  ;;  %v9401_v7 = vand.u32 4294901760, %v6935_v26  ;;  %v7295_v26 = vsub.f32 %v128_v15, %v7256_v55  ;;  %v9072_v32 = vand.u32 4294901760, %v7328_v21  ;;  %v7390_v37 = vand.u32 4294901760, %v123_v25 }
  0xcb   :  { %5190 = vmatpush3.msra.mxu1 %v9364_v38  ;;  %5164 = vmatprep.subr.mxu0 %v9399_v22  ;;  %v7282_v38 = vsub.f32 %v113_v19, %v7248_v8  ;;  %9406 = vst [vmem:[#allocation14_spill] sm:$0xff] %v7300_v56  ;;  %v9416_v19 = vld [vmem:[#allocation16_spill] sm:$0xff]  ;;  %v9420_v22 = vld [vmem:[#allocation23_spill] sm:$0xff] }
  0xcc   :  { %5191 = vmatprep.subr.mxu1 %v9366_v20  ;;  %5165 = vmatpush3.msra.mxu0 %v9400_v5  ;;  %v9403_v20 = vand.u32 4294901760, %v6854_v46  ;;  %v109_v46 = vld [vmem:[%s8926_s1 + $0x258] sm:$0xff]  ;;  %v9075_v2 = vand.u32 4294901760, %v7295_v26  ;;  %9422 = vst [vmem:[#allocation18_spill] sm:$0xff] %v7390_v37 }
  0xcd   :  { %5192 = vmatpush3.msra.mxu1 %v9368_v24  ;;  %5166 = vmatprep.subr.mxu0 %v9401_v7  ;;  %v110_v24 = vld [vmem:[%s8926_s1 + $0x260] sm:$0xff]  ;;  %v7330_v4 = vand.u32 4294901760, %v109_v46  ;;  %v9423_v7 = vand.u32 4294901760, %v7060_v50 }
  0xce   :  { %5193 = vmatprep.subr.mxu1 %v9369_v45  ;;  %5167 = vmatpush3.msra.mxu0 %v9403_v20  ;;  %v9405_v45 = vand.u32 4294901760, %v6968_v1  ;;  %v125_v1 = vld [vmem:[%s8926_s1 + $0x2d8] sm:$0xff]  ;;  %v7318_v35 = vand.u32 4294901760, %v110_v24  ;;  %v7382_v30 = vsub.f32 %v7295_v26, %v9075_v2 }
  0xcf   :  { %5194 = vmatpush3.msra.mxu1 %v9370_v33  ;;  %v9407_v33 = vand.u32 4294901760, %v6930_v48  ;;  %v9076_v48 = vand.u32 4294901760, %v7282_v38  ;;  %9411 = vst [vmem:[#allocation17_spill] sm:$0xff] %v7330_v4  ;;  %v7339_v36 = vand.u32 4294901760, %v125_v1  ;;  %v7377_v63 = vsub.f32 %v109_v46, %v7330_v4 }
  0xd0   :  { %5168 = vmatprep.subr.mxu0 %v9405_v45  ;;  %5195 = vmatprep.subr.mxu1 %v9371_v9  ;;  %v9078_v9 = vand.u32 4294901760, %v7276_v51  ;;  %9409 = vst [vmem:[#allocation5_spill] sm:$0xff] %v7318_v35  ;;  %v9425_v45 = vld [vmem:[#allocation31_spill] sm:$0xff] }
  0xd1   :  { %5169 = vmatpush3.msra.mxu0 %v9407_v33  ;;  %5196 = vmatpush3.msra.mxu1 %v9372_v6  ;;  %v7322_v6 = vsub.f32 %v127_v16, %v7284_v41  ;;  %9413 = vst [vmem:[#allocation6_spill] sm:$0xff] %v7339_v36  ;;  %v7368_v43 = vsub.f32 %v7282_v38, %v9076_v48  ;;  %v9419_v16 = vand.u32 4294901760, %v7067_v34  ;;  %v9424_v34 = vld [vmem:[#allocation27_spill] sm:$0xff]  ;;  %v9426_v46 = vand.u32 4294901760, %v9425_v45  ;;  %v120_v48 = vld [vmem:[%s8926_s1 + $0x2b0] sm:$0xff] }
  0xd2   :  { %5170 = vmatprep.subr.mxu0 %v9408_v57  ;;  %5197 = vmatprep.subr.mxu1 %v9373_v40  ;;  %v108_v40 = vld [vmem:[%s8926_s1 + $0x250] sm:$0xff]  ;;  %v7350_v28 = vsub.f32 %v7276_v51, %v9078_v9  ;;  %v106_v57 = vld [vmem:[%s8926_s1 + $0x240] sm:$0xff] }
  0xd3   :  { %5171 = vmatpush3.msra.mxu0 %v9410_v58  ;;  %5198 = vmatpush3.msra.mxu1 %v9374_v62  ;;  %v7342_v62 = vsub.f32 %v126_v54, %v7300_v56  ;;  %v7370_v15 = vand.u32 4294901760, %v108_v40  ;;  %v9073_v60 = vand.u32 4294901760, %v7322_v6  ;;  %v7397_v54 = vsub.f32 %v125_v1, %v7339_v36 }
  0xd4   :  { %5172 = vmatprep.subr.mxu0 %v9412_v59  ;;  %5199 = vmatprep.subr.mxu1 %v9375_v53  ;;  %v9074_v53 = vand.u32 4294901760, %v7309_v27  ;;  %v9427_v59 = vld [vmem:[#allocation30_spill] sm:$0xff] }
  0xd5   :  { %5173 = vmatpush3.msra.mxu0 %v9414_v10  ;;  %5200 = vmatpush3.msra.mxu1 %v9376_v49  ;;  %v7363_v49 = vsub.f32 %v110_v24, %v7318_v35  ;;  %9417 = vst [vmem:[#allocation20_spill] sm:$0xff] %v7370_v15  ;;  %v9071_v5 = vand.u32 4294901760, %v7342_v62  ;;  %v7413_v1 = vsub.f32 %v108_v40, %v7370_v15  ;;  %v9428_v10 = vand.u32 4294901760, %v9427_v59 }
  0xd6   :  { %5174 = vmatprep.subr.mxu0 %v9415_v12  ;;  %5201 = vmatprep.subr.mxu1 %v9416_v19  ;;  %v7406_v24 = vsub.f32 %v7309_v27, %v9074_v53  ;;  %v7418_v50 = vsub.f32 %v7322_v6, %v9073_v60  ;;  %v7433_v19 = vsub.f32 %v7328_v21, %v9072_v32  ;;  %v9080_v45 = vand.u32 4294901760, %v7397_v54  ;;  %v5839_v32 = vld [vmem:[%s8925_s0 + $0x8] ss:$16 sps:$4 sm:$0xff]   ;;  %v104_v53 = vld [vmem:[%s8926_s1 + $0x230] sm:$0xff] }
  0xd7   :  { %5175 = vmatpush3.msra.mxu0 %v9418_v23  ;;  %5202 = vmatpush3.msra.mxu1 %v9377_v0  ;;  %v107_v0 = vld [vmem:[%s8926_s1 + $0x248] sm:$0xff]  ;;  %v9077_v58 = vand.u32 4294901760, %v7363_v49  ;;  %v122_v23 = vld [vmem:[%s8926_s1 + $0x2c0] sm:$0xff]  ;;  %v7451_v59 = vsub.f32 %v124_v31, %v7388_v13  ;;  %v9081_v2 = vand.u32 4294901760, %v7413_v1  ;;  %v9439_v12 = vld [vmem:[#allocation25_spill] sm:$0xff] }
  0xd8   :  { %5176 = vmatprep.subr.mxu0 %v9419_v16  ;;  %5203 = vmatprep.subr.mxu1 %v9420_v22  ;;  %v7428_v40 = vand.u32 4294901760, %v107_v0  ;;  %v9079_v16 = vand.u32 4294901760, %v7377_v63  ;;  %v9431_v22 = vld [vmem:[#allocation21_spill] sm:$0xff]  ;;  %v223_v33 = vrot.slane %v5839_v32, %v9439_v12 }
  0xd9   :  { %5177 = vmatpush3.msra.mxu0 %v9423_v7  ;;  %5204 = vmatpush3.msra.mxu1 %v9424_v34  ;;  %v9432_v7 = vld [vmem:[#allocation28_spill] sm:$0xff]  ;;  %v7444_v34 = vsub.f32 %v7342_v62, %v9071_v5  ;;  %v7459_v5 = vand.u32 4294901760, %v106_v57  ;;  %v5841_v31 = vld [vmem:[%s8925_s0 + $0x28] ss:$16 sps:$4 sm:$0xff]   ;;  %v7475_v60 = vsub.f32 %v7363_v49, %v9077_v58 }
  0xda   :  { %5178 = vmatprep.subr.mxu0 %v9426_v46  ;;  %5205 = vmatprep.subr.mxu1 %v6904_v47  ;;  %v9429_v47 = vld [vmem:[#allocation24_spill] sm:$0xff]  ;;  %9430 = vst [vmem:[#allocation7_spill] sm:$0xff] %v7428_v40  ;;  %v105_v46 = vld [vmem:[%s8926_s1 + $0x238] sm:$0xff]  ;;  %v237_v20 = vrot.slane %v5841_v31, %v9439_v12  ;;  %v9443_v12 = vand.u32 4294901760, %v7451_v59 }
  0xdb   :  { %5179 = vmatpush3.msra.mxu0 %v9428_v10  ;;  %1870 = vmatprep.mubr.f32.mxu0 %v9429_v47  ;;  %v7454_v10 = vsub.f32 %v123_v25, %v7390_v37  ;;  %9434 = vst [vmem:[#allocation8_spill] sm:$0xff] %v7459_v5  ;;  %v7470_v25 = vand.u32 4294901760, %v122_v23  ;;  %v121_v58 = vld [vmem:[%s8926_s1 + $0x2b8] sm:$0xff]  ;;  %v7490_v9 = vand.u32 4294901760, %v105_v46 }
  0xdc   :  { %5206 = vmatpush3.msra.mxu1 %v9431_v22  ;;  %1872 = vmatmul.mubr.f32.vlgmr.msra.gmra.mxu0 %v9432_v7  ;;  %v119_v22 = vld [vmem:[%s8926_s1 + $0x2a8] sm:$0xff] }
  0xdd   :  { %9433 = vst [vmem:[#allocation9_spill] sm:$0xff] %v7454_v10  ;;  %5207 = vmatprep.subr.mxu1 %v6961_v29  ;;  %5218 = vmatprep.subr.mxu0 %v7243_v61  ;;  %9435 = vst [vmem:[#allocation22_spill] sm:$0xff] %v7470_v25  ;;  %v7495_v29 = vsub.f32 %v7377_v63, %v9079_v16  ;;  %v7525_v16 = vand.u32 4294901760, %v121_v58  ;;  %v7536_v32 = vsub.f32 %v122_v23, %v7470_v25 }
  0xde   :  { %5208 = vmatpush3.msra.mxu1 %v6923_v11  ;;  %5219 = vmatpush3.msra.mxu0 %v7248_v8  ;;  %v7484_v11 = vsub.f32 %v107_v0, %v7428_v40  ;;  %9436 = vst [vmem:[#allocation10_spill] sm:$0xff] %v7490_v9  ;;  %v7503_v0 = vsub.f32 %v7397_v54, %v9080_v45  ;;  %v103_v45 = vld [vmem:[%s8926_s1 + $0x228] sm:$0xff]  ;;  %v7573_v23 = vand.u32 4294901760, %v119_v22 }
  0xdf   :  { %5209 = vmatprep.subr.mxu1 %v9382_v18  ;;  %5220 = vmatprep.subr.mxu0 %v7256_v55  ;;  %v7515_v18 = vand.u32 4294901760, %v104_v53  ;;  %9440 = vst [vmem:[#allocation12_spill] sm:$0xff] %v7525_v16  ;;  %9441 = vst [vmem:[#allocation26_spill] sm:$0xff] %v7536_v32  ;;  %v7560_v31 = vand.u32 4294901760, %v103_v45 }
  0xe0   :  { %5210 = vmatpush3.msra.mxu1 %v6980_v42  ;;  %5221 = vmatpush3.msra.mxu0 %v7270_v3  ;;  %v7513_v42 = vsub.f32 %v106_v57, %v7459_v5  ;;  %v7530_v57 = vsub.f32 %v7413_v1, %v9081_v2  ;;  %9446 = vst [vmem:[#allocation16_spill] sm:$0xff] %v7573_v23 }
  0xe1   :  { %5211 = vmatprep.subr.mxu1 %v7011_v52  ;;  %5222 = vmatprep.subr.mxu0 %v7284_v41  ;;  %9438 = vst [vmem:[#allocation13_spill] sm:$0xff] %v7515_v18  ;;  %v7544_v52 = vand.u32 4294901760, %v120_v48  ;;  %9445 = vst [vmem:[#allocation29_spill] sm:$0xff] %v7560_v31  ;;  %v246_v2 = vcombine.high %v223_v33, %v237_v20 }
  0xe2   :  { %9437 = vst [vmem:[#allocation3_spill] sm:$0xff] %v7513_v42  ;;  %5212 = vmatpush3.msra.mxu1 %v7029_v14  ;;  %5223 = vmatpush3.msra.mxu0 %v7289_v44  ;;  %v7541_v14 = vsub.f32 %v105_v46, %v7490_v9  ;;  %v9444_v46 = vand.u32 4294901760, %v7454_v10  ;;  %v9447_v44 = vand.u32 4294901760, %v7350_v28  ;;  %v9449_v28 = vand.u32 4294901760, %v7484_v11 }
  0xe3   :  { %5213 = vmatprep.subr.mxu1 %v7044_v39  ;;  %5224 = vmatprep.subr.mxu0 %v7300_v56  ;;  %9442 = vst [vmem:[#allocation15_spill] sm:$0xff] %v7544_v52  ;;  %v7553_v39 = vsub.f32 %v7451_v59, %v9443_v12  ;;  %v7571_v12 = vsub.f32 %v104_v53, %v7515_v18  ;;  %v101_v53 = vld [vmem:[%s8926_s1 + $0x218] sm:$0xff] }
  0xe4   :  { %5214 = vmatpush3.msra.mxu1 %v7046_v17  ;;  %1974 = vmatprep.mubr.f32.mxu1 %v9429_v47  ;;  %v7558_v56 = vsub.f32 %v7454_v10, %v9444_v46  ;;  %v118_v17 = vld [vmem:[%s8926_s1 + $0x2a0] sm:$0xff]  ;;  %v9448_v46 = vand.u32 4294901760, %v7368_v43  ;;  %v9452_v43 = vand.u32 4294901760, %v7382_v30  ;;  %v9454_v30 = vand.u32 4294901760, %v7513_v42 }
  0xe5   :  { %v102_v47 = vld [vmem:[%s8926_s1 + $0x220] sm:$0xff]  ;;  %5225 = vmatpush3.msra.mxu0 %v7318_v35  ;;  %1976 = vmatmul.mubr.f32.vlgmr.msra.gmra.mxu1 %v9432_v7  ;;  %v7582_v35 = vsub.f32 %v121_v58, %v7525_v16  ;;  %v245_v7 = vcombine.low %v223_v33, %v237_v20  ;;  %v7595_v41 = vand.u32 4294901760, %v118_v17  ;;  %v7600_v58 = vsub.f32 %v120_v48, %v7544_v52  ;;  %v100_v20 = vld [vmem:[%s8926_s1 + $0x210] sm:$0xff]  ;;  %v117_v48 = vld [vmem:[%s8926_s1 + $0x298] sm:$0xff] }
  0xe6   :  { %5226 = vmatprep.subr.mxu0 %v7339_v36  ;;  %5253 = vmatprep.subr.mxu1 %v9447_v44  ;;  %v7593_v44 = vsub.f32 %v7484_v11, %v9449_v28  ;;  %v7597_v10 = vand.u32 4294901760, %v102_v47  ;;  %v2245_v33 = vand.u32 4294901760, %v7553_v39  ;;  %v7611_v28 = vsub.f32 %v103_v45, %v7560_v31  ;;  %v116_v45 = vld [vmem:[%s8926_s1 + $0x290] sm:$0xff] }
  0xe7   :  { %5227 = vmatpush3.msra.mxu0 %v7330_v4  ;;  %5254 = vmatpush3.msra.mxu1 %v9448_v46  ;;  %9451 = vst [vmem:[#allocation27_spill] sm:$0xff] %v7600_v58  ;;  %v7623_v39 = vsub.f32 %v7513_v42, %v9454_v30  ;;  %v7631_v46 = vsub.f32 %v119_v22, %v7573_v23  ;;  %v7633_v4 = vand.u32 4294901760, %v246_v2  ;;  %v7644_v36 = vand.u32 4294901760, %v100_v20 }
  0xe8   :  { %9450 = vst [vmem:[#allocation23_spill] sm:$0xff] %v7597_v10  ;;  %5228 = vmatprep.subr.mxu0 %v7388_v13  ;;  %5255 = vmatprep.subr.mxu1 %v9452_v43  ;;  %v9453_v13 = vand.u32 4294901760, %v7406_v24  ;;  %v7625_v43 = vand.u32 4294901760, %v101_v53  ;;  %v9457_v24 = vand.u32 4294901760, %v7536_v32  ;;  %v7646_v42 = vand.u32 4294901760, %v245_v7 }
  0xe9   :  { %5229 = vmatpush3.msra.mxu0 %v7370_v15  ;;  %9455 = vst [vmem:[#allocation31_spill] sm:$0xff] %v7633_v4  ;;  %v9459_v22 = vand.u32 4294901760, %v7433_v19  ;;  %v9461_v15 = vand.u32 4294901760, %v7444_v34  ;;  %v7666_v19 = vand.u32 4294901760, %v116_v45  ;;  %v2147_v34 = vand.u32 4294901760, %v7623_v39  ;;  %2318 = vmatprep.mubr.f32.mxu1 %v7633_v4 }
  0xea   :  { %5256 = vmatpush3.msra.mxu1 %v9453_v13  ;;  %5230 = vmatprep.subr.mxu0 %v7390_v37  ;;  %v9456_v13 = vand.u32 4294901760, %v7418_v50  ;;  %v7641_v30 = vsub.f32 %v7536_v32, %v9457_v24  ;;  %9458 = vst [vmem:[#allocation30_spill] sm:$0xff] %v7646_v42  ;;  %v2140_v37 = vand.u32 4294901760, %v7593_v44  ;;  %v7653_v50 = vsub.f32 %v102_v47, %v7597_v10  ;;  %v115_v47 = vld [vmem:[%s8926_s1 + $0x288] sm:$0xff]  ;;  %v114_v24 = vld [vmem:[%s8926_s1 + $0x280] sm:$0xff] }
  0xeb   :  { %5231 = vmatpush3.msra.mxu0 %v7428_v40  ;;  %v9462_v32 = vand.u32 4294901760, %v7541_v14  ;;  %9463 = vst [vmem:[#allocation21_spill] sm:$0xff] %v7666_v19  ;;  %v99_v44 = vld [vmem:[%s8926_s1 + $0x208] sm:$0xff]  ;;  %v9466_v39 = vand.u32 4294901760, %v7582_v35 }
  0xec   :  { %5257 = vmatprep.subr.mxu1 %v9456_v13  ;;  %9460 = vst [vmem:[#allocation24_spill] sm:$0xff] %v7653_v50  ;;  %v7655_v13 = vand.u32 4294901760, %v117_v48  ;;  %5232 = vmatprep.subr.mxu0 %v7470_v25  ;;  %v7687_v25 = vsub.f32 %v246_v2, %v7633_v4  ;;  %v7703_v2 = vsub.f32 %v245_v7, %v7646_v42  ;;  %v9503_v4 = vld [vmem:[#allocation13_spill] sm:$0xff] }
  0xed   :  { %5258 = vmatpush3.msra.mxu1 %v9459_v22  ;;  %v7664_v40 = vsub.f32 %v7541_v14, %v9462_v32  ;;  %v7673_v22 = vsub.f32 %v118_v17, %v7595_v41  ;;  %5233 = vmatpush3.msra.mxu0 %v7459_v5  ;;  %v7680_v32 = vsub.f32 %v101_v53, %v7625_v43  ;;  %v9465_v17 = vand.u32 4294901760, %v7503_v0 }
  0xee   :  { %5259 = vmatprep.subr.mxu1 %v9461_v15  ;;  %v9464_v15 = vand.u32 4294901760, %v7475_v60  ;;  %5234 = vmatprep.subr.mxu0 %v7525_v16  ;;  %v2259_v60 = vand.u32 4294901760, %v7641_v30  ;;  %v2265_v53 = vsub.f32 %v7582_v35, %v9466_v39  ;;  %v9467_v0 = vand.u32 4294901760, %v7495_v29  ;;  %v98_v16 = vld [vmem:[%s8926_s1 + $0x200] sm:$0xff] }
  0xef   :  { %5235 = vmatpush3.msra.mxu0 %v7490_v9  ;;  %v9468_v30 = vand.u32 4294901760, %v7600_v58  ;;  %v7711_v39 = vand.u32 4294901760, %v115_v47  ;;  %v7718_v7 = vsub.f32 %v117_v48, %v7655_v13  ;;  %v2154_v29 = vand.u32 4294901760, %v7664_v40 }
  0xf0   :  { %5260 = vmatpush3.msra.mxu1 %v9464_v15  ;;  %v7697_v15 = vsub.f32 %v100_v20, %v7644_v36  ;;  %5236 = vmatprep.subr.mxu0 %v7544_v52  ;;  %v7725_v9 = vand.u32 4294901760, %v99_v44  ;;  %v9470_v5 = vand.u32 4294901760, %v7530_v57  ;;  %v9471_v48 = vand.u32 4294901760, %v7631_v46 }
  0xf1   :  { %5261 = vmatprep.subr.mxu1 %v9465_v17  ;;  %v2272_v17 = vsub.f32 %v7600_v58, %v9468_v30  ;;  %5237 = vmatpush3.msra.mxu0 %v7515_v18  ;;  %v7738_v58 = vsub.f32 %v116_v45, %v7666_v19  ;;  %v2266_v20 = vand.u32 4294901760, %v2265_v53  ;;  %v7743_v18 = vand.u32 4294901760, %v98_v16 }
  0xf2   :  { %5262 = vmatpush3.msra.mxu1 %v9467_v0  ;;  %v9469_v0 = vand.u32 4294901760, %v7571_v12  ;;  %v2279_v52 = vsub.f32 %v7631_v46, %v9471_v48  ;;  %5238 = vmatprep.subr.mxu0 %v7573_v23  ;;  %v9473_v40 = vand.u32 4294901760, %v7611_v28  ;;  %v9474_v57 = vand.u32 4294901760, %v7673_v22 }
  0xf3   :  { %5263 = vmatprep.subr.mxu1 %v2245_v33  ;;  %v7734_v33 = vand.u32 4294901760, %v114_v24  ;;  %5239 = vmatpush3.msra.mxu0 %v7560_v31  ;;  %v2273_v48 = vand.u32 4294901760, %v2272_v17  ;;  %v9128_v17 = vand.u32 4294901760, %v7680_v32 }
  0xf4   :  { %v2160_v30 = vsub.f32 %v7571_v12, %v9469_v0  ;;  %5264 = vmatpush3.msra.mxu1 %v9470_v5  ;;  %v9472_v0 = vand.u32 4294901760, %v7558_v56  ;;  %v9125_v5 = vand.u32 4294901760, %v7653_v50  ;;  %v2167_v45 = vsub.f32 %v7611_v28, %v9473_v40  ;;  %5240 = vmatprep.subr.mxu0 %v7595_v41 }
  0xf5   :  { %v7753_v56 = vsub.f32 %v115_v47, %v7711_v39  ;;  %5241 = vmatpush3.msra.mxu0 %v7597_v10  ;;  %v2280_v40 = vand.u32 4294901760, %v2279_v52  ;;  %v9475_v47 = vand.u32 4294901760, %v7687_v25  ;;  %v9478_v52 = vand.u32 4294901760, %v7703_v2 }
  0xf6   :  { %5265 = vmatprep.subr.mxu1 %v9472_v0  ;;  %v2161_v53 = vand.u32 4294901760, %v2160_v30  ;;  %v7757_v0 = vsub.f32 %v99_v44, %v7725_v9  ;;  %v7769_v30 = vsub.f32 %v114_v24, %v7734_v33  ;;  %5242 = vmatprep.subr.mxu0 %v7655_v13  ;;  %v7773_v44 = vsub.f32 %v98_v16, %v7743_v18 }
  0xf7   :  { %5266 = vmatpush3.msra.mxu1 %v2140_v37  ;;  %v2286_v37 = vsub.f32 %v7673_v22, %v9474_v57  ;;  %v2080_v23 = vsub.f32 %v7687_v25, %v9475_v47  ;;  %v2086_v57 = vsub.f32 %v7703_v2, %v9478_v52  ;;  %5243 = vmatpush3.msra.mxu0 %v7625_v43  ;;  %v2168_v24 = vand.u32 4294901760, %v2167_v45 }
  0xf8   :  { %5267 = vmatprep.subr.mxu1 %v2259_v60  ;;  %9476 = vst [vmem:[#allocation28_spill] sm:$0xff] %v7769_v30  ;;  %9477 = vst [vmem:[#allocation32_spill] sm:$0xff] %v7773_v44  ;;  %v9479_v60 = vand.u32 4294901760, %v7718_v7  ;;  %5244 = vmatprep.subr.mxu0 %v7666_v19  ;;  %v2181_v52 = vsub.f32 %v7680_v32, %v9128_v17  ;;  %v9480_v45 = vand.u32 4294901760, %v7738_v58  ;;  %v9130_v16 = vand.u32 4294901760, %v7769_v30 }
  0xf9   :  { %5268 = vmatpush3.msra.mxu1 %v2147_v34  ;;  %v2174_v34 = vsub.f32 %v7653_v50, %v9125_v5  ;;  %v2287_v5 = vand.u32 4294901760, %v2286_v37  ;;  %5245 = vmatpush3.msra.mxu0 %v7644_v36  ;;  %v2087_v37 = vand.u32 4294901760, %v2086_v57  ;;  %v9481_v19 = vand.u32 4294901760, %v7697_v15 }
  0xfa   :  { %5269 = vmatprep.subr.mxu1 %v2266_v20  ;;  %v2293_v20 = vsub.f32 %v7718_v7, %v9479_v60  ;;  %v2300_v60 = vsub.f32 %v7738_v58, %v9480_v45  ;;  %5246 = vmatprep.subr.mxu0 %v7711_v39  ;;  %v9129_v47 = vand.u32 4294901760, %v7773_v44 }
  0xfb   :  { %5270 = vmatpush3.msra.mxu1 %v2154_v29  ;;  %v2081_v29 = vand.u32 4294901760, %v2080_v23  ;;  %v2188_v17 = vsub.f32 %v7697_v15, %v9481_v19  ;;  %5247 = vmatpush3.msra.mxu0 %v7725_v9 }
  0xfc   :  { %5271 = vmatprep.subr.mxu1 %v2273_v48  ;;  %v2175_v48 = vand.u32 4294901760, %v2174_v34  ;;  %v2294_v23 = vand.u32 4294901760, %v2293_v20  ;;  %5248 = vmatprep.subr.mxu0 %v7734_v33  ;;  %v9483_v34 = vand.u32 4294901760, %v7757_v0  ;;  %v2301_v19 = vand.u32 4294901760, %v2300_v60 }
  0xfd   :  { %5272 = vmatpush3.msra.mxu1 %v2161_v53  ;;  %v9482_v53 = vand.u32 4294901760, %v7753_v56  ;;  %5249 = vmatpush3.msra.mxu0 %v7743_v18  ;;  %v2189_v20 = vand.u32 4294901760, %v2188_v17 }
  0xfe   :  { %5273 = vmatprep.subr.mxu1 %v2280_v40  ;;  %v2182_v40 = vand.u32 4294901760, %v2181_v52  ;;  %v2195_v57 = vsub.f32 %v7757_v0, %v9483_v34  ;;  %2082 = vmatprep.mubr.f32.mxu0 %v2081_v29  ;;  %v9490_v34 = vld [vmem:[#allocation5_spill] sm:$0xff] }
  0xff   :  { %5274 = vmatpush3.msra.mxu1 %v2168_v24  ;;  %v2307_v45 = vsub.f32 %v7753_v56, %v9482_v53  ;;  %v2314_v24 = vsub.f32 %v7769_v30, %v9130_v16  ;;  %2088 = vmatmul.mubr.f32.vlgmr.msra.gmra.mxu0 %v2087_v37  ;;  %v9485_v37 = vld [vmem:[#allocation11_spill] sm:$0xff]  ;;  %v9487_v53 = vld [vmem:[#allocation26_spill] sm:$0xff] }
 0x100   :  { %5275 = vmatprep.subr.mxu1 %v2287_v5  ;;  %v2202_v5 = vsub.f32 %v7773_v44, %v9129_v47  ;;  %5288 = vmatprep.subr.mxu0 %v7276_v51  ;;  %v2196_v29 = vand.u32 4294901760, %v2195_v57  ;;  %v9491_v57 = vld [vmem:[#allocation6_spill] sm:$0xff]  ;;  %v9500_v47 = vld [vmem:[#allocation12_spill] sm:$0xff] }
 0x101   :  { %5276 = vmatpush3.msra.mxu1 %v2175_v48  ;;  %v2308_v52 = vand.u32 4294901760, %v2307_v45  ;;  %5289 = vmatpush3.msra.mxu0 %v7282_v38  ;;  %v2315_v60 = vand.u32 4294901760, %v2314_v24  ;;  %v9484_v48 = vld [vmem:[#allocation9_spill] sm:$0xff]  ;;  %v9488_v45 = vld [vmem:[#allocation14_spill] sm:$0xff]  ;;  %v9493_v24 = vld [vmem:[#allocation27_spill] sm:$0xff] }
 0x102   :  { %5277 = vmatprep.subr.mxu1 %v2294_v23  ;;  %5290 = vmatprep.subr.mxu0 %v7295_v26  ;;  %v2203_v17 = vand.u32 4294901760, %v2202_v5  ;;  %v9486_v23 = vld [vmem:[#allocation4_spill] sm:$0xff]  ;;  %v9501_v16 = vld [vmem:[#allocation10_spill] sm:$0xff] }
 0x103   :  { %5278 = vmatpush3.msra.mxu1 %v2182_v40  ;;  %5291 = vmatpush3.msra.mxu0 %v7309_v27  ;;  %v9489_v40 = vld [vmem:[#allocation3_spill] sm:$0xff]  ;;  %v9495_v5 = vld [vmem:[#allocation20_spill] sm:$0xff] }
 0x104   :  { %5279 = vmatprep.subr.mxu1 %v2301_v19  ;;  %5292 = vmatprep.subr.mxu0 %v7322_v6  ;;  %v9492_v19 = vld [vmem:[#allocation17_spill] sm:$0xff] }
 0x105   :  { %5280 = vmatpush3.msra.mxu1 %v2189_v20  ;;  %5293 = vmatpush3.msra.mxu0 %v7328_v21  ;;  %v9494_v20 = vld [vmem:[#allocation19_spill] sm:$0xff] }
 0x106   :  { %5281 = vmatprep.subr.mxu1 %v2308_v52  ;;  %5294 = vmatprep.subr.mxu0 %v7342_v62  ;;  %v9496_v52 = vld [vmem:[#allocation18_spill] sm:$0xff] }
 0x107   :  { %5282 = vmatpush3.msra.mxu1 %v2196_v29  ;;  %5295 = vmatpush3.msra.mxu0 %v7363_v49  ;;  %v9497_v29 = vld [vmem:[#allocation7_spill] sm:$0xff] }
 0x108   :  { %5283 = vmatprep.subr.mxu1 %v2315_v60  ;;  %5296 = vmatprep.subr.mxu0 %v7397_v54  ;;  %v9498_v60 = vld [vmem:[#allocation22_spill] sm:$0xff] }
 0x109   :  { %5284 = vmatpush3.msra.mxu1 %v2203_v17  ;;  %5297 = vmatpush3.msra.mxu0 %v7377_v63  ;;  %v9499_v17 = vld [vmem:[#allocation8_spill] sm:$0xff] }
 0x10a   :  { %2320 = vmatmul.mubr.f32.vlgmr.msra.gmra.mxu1 %v7646_v42  ;;  %5323 = vmatprep.subr.mxu1 %v7243_v61  ;;  %v9502_v42 = vld [vmem:[#allocation15_spill] sm:$0xff] }
 0x10b   :  { %5324 = vmatpush3.msra.mxu1 %v7248_v8  ;;  %5298 = vmatprep.subr.mxu0 %v7451_v59 }
 0x10c   :  { %5325 = vmatprep.subr.mxu1 %v7256_v55  ;;  %5299 = vmatpush3.msra.mxu0 %v7413_v1 }
 0x10d   :  { %5326 = vmatpush3.msra.mxu1 %v7270_v3  ;;  %5300 = vmatprep.subr.mxu0 %v9484_v48 }
 0x10e   :  { %5327 = vmatprep.subr.mxu1 %v9485_v37  ;;  %5301 = vmatpush3.msra.mxu0 %v7484_v11 }
 0x10f   :  { %5328 = vmatpush3.msra.mxu1 %v9486_v23  ;;  %5302 = vmatprep.subr.mxu0 %v9487_v53 }
 0x110   :  { %5329 = vmatprep.subr.mxu1 %v9488_v45  ;;  %5303 = vmatpush3.msra.mxu0 %v9489_v40 }
 0x111   :  { %5330 = vmatpush3.msra.mxu1 %v9490_v34  ;;  %5304 = vmatprep.subr.mxu0 %v7582_v35 }
 0x112   :  { %5331 = vmatprep.subr.mxu1 %v9491_v57  ;;  %5305 = vmatpush3.msra.mxu0 %v7541_v14 }
 0x113   :  { %5332 = vmatpush3.msra.mxu1 %v9492_v19  ;;  %5306 = vmatprep.subr.mxu0 %v9493_v24 }
 0x114   :  { %5333 = vmatprep.subr.mxu1 %v9494_v20  ;;  %5307 = vmatpush3.msra.mxu0 %v7571_v12 }
 0x115   :  { %5334 = vmatpush3.msra.mxu1 %v9495_v5  ;;  %5308 = vmatprep.subr.mxu0 %v7631_v46 }
 0x116   :  { %5335 = vmatprep.subr.mxu1 %v9496_v52  ;;  %5309 = vmatpush3.msra.mxu0 %v7611_v28 }
 0x117   :  { %5336 = vmatpush3.msra.mxu1 %v9497_v29  ;;  %5310 = vmatprep.subr.mxu0 %v7673_v22 }
 0x118   :  { %5337 = vmatprep.subr.mxu1 %v9498_v60  ;;  %5311 = vmatpush3.msra.mxu0 %v7653_v50  ;;  %v9504_v50 = vld [vmem:[#allocation16_spill] sm:$0xff] }
 0x119   :  { %5338 = vmatpush3.msra.mxu1 %v9499_v17  ;;  %5312 = vmatprep.subr.mxu0 %v7718_v7 }
 0x11a   :  { %5339 = vmatprep.subr.mxu1 %v9500_v47  ;;  %5313 = vmatpush3.msra.mxu0 %v7680_v32 }
 0x11b   :  { %5340 = vmatpush3.msra.mxu1 %v9501_v16  ;;  %5314 = vmatprep.subr.mxu0 %v7738_v58 }
 0x11c   :  { %5341 = vmatprep.subr.mxu1 %v9502_v42  ;;  %5315 = vmatpush3.msra.mxu0 %v7697_v15 }
 0x11d   :  { %5342 = vmatpush3.msra.mxu1 %v9503_v4  ;;  %5316 = vmatprep.subr.mxu0 %v7753_v56 }
 0x11e   :  { %5343 = vmatprep.subr.mxu1 %v9504_v50  ;;  %5317 = vmatpush3.msra.mxu0 %v7757_v0  ;;  %v9505_v50 = vand.u32 4294901760, %v7276_v51  ;;  %v9510_v51 = vand.u32 4294901760, %v7322_v6  ;;  %v9515_v6 = vand.u32 4294901760, %v7703_v2 }
 0x11f   :  { %5344 = vmatpush3.msra.mxu1 %v7560_v31  ;;  %5318 = vmatprep.subr.mxu0 %v7769_v30  ;;  %v9506_v31 = vand.u32 4294901760, %v7282_v38  ;;  %v9507_v30 = vld [vmem:[#allocation21_spill] sm:$0xff]  ;;  %v9511_v38 = vand.u32 4294901760, %v7328_v21  ;;  %v9517_v21 = vand.u32 4294901760, %v7377_v63  ;;  %v9521_v63 = vand.u32 4294901760, %v7484_v11 }
 0x120   :  { %5345 = vmatprep.subr.mxu1 %v7595_v41  ;;  %5319 = vmatpush3.msra.mxu0 %v7773_v44  ;;  %v9508_v44 = vand.u32 4294901760, %v7295_v26  ;;  %v9512_v26 = vand.u32 4294901760, %v7342_v62  ;;  %v9518_v62 = vand.u32 4294901760, %v7451_v59 }
 0x121   :  { %2455 = vmatprep.mubr.f32.mxu0 %v7687_v25  ;;  %5346 = vmatpush3.msra.mxu1 %v7597_v10  ;;  %v9509_v10 = vand.u32 4294901760, %v7309_v27  ;;  %v9513_v27 = vand.u32 4294901760, %v7687_v25  ;;  %v9522_v25 = vand.u32 4294901760, %v9487_v53 }
 0x122   :  { %2458 = vmatmul.mubr.f32.vlgmr.msra.gmra.mxu0 %v7703_v2  ;;  %5347 = vmatprep.subr.mxu1 %v7655_v13  ;;  %v159_v2 = vld [vmem:[%s8926_s1 + $0x3e8] sm:$0xff] }
 0x123   :  { %5358 = vmatprep.subr.mxu0 %v9505_v50  ;;  %5348 = vmatpush3.msra.mxu1 %v7625_v43  ;;  %v9523_v50 = vand.u32 4294901760, %v9489_v40  ;;  %v9528_v40 = vand.u32 4294901760, %v7571_v12 }
 0x124   :  { %5359 = vmatpush3.msra.mxu0 %v9506_v31  ;;  %5349 = vmatprep.subr.mxu1 %v9507_v30  ;;  %v9516_v31 = vand.u32 4294901760, %v7397_v54  ;;  %v145_v54 = vld [vmem:[%s8926_s1 + $0x378] sm:$0xff] }
 0x125   :  { %5360 = vmatprep.subr.mxu0 %v9508_v44  ;;  %5350 = vmatpush3.msra.mxu1 %v7644_v36  ;;  %v9524_v44 = vand.u32 4294901760, %v7582_v35  ;;  %v7967_v35 = vand.u32 4294901760, %v159_v2 }
 0x126   :  { %5361 = vmatpush3.msra.mxu0 %v9509_v10  ;;  %5351 = vmatprep.subr.mxu1 %v7711_v39  ;;  %v9514_v10 = vand.u32 4294901760, %v7363_v49  ;;  %v161_v49 = vld [vmem:[%s8926_s1 + $0x3f8] sm:$0xff] }
 0x127   :  { %5362 = vmatprep.subr.mxu0 %v9510_v51  ;;  %5352 = vmatpush3.msra.mxu1 %v7725_v9  ;;  %v7932_v59 = vand.u32 4294901760, %v161_v49  ;;  %9527 = vst [vmem:[#allocation9_spill] sm:$0xff] %v7967_v35 }
 0x128   :  { %5363 = vmatpush3.msra.mxu0 %v9511_v38  ;;  %5353 = vmatprep.subr.mxu1 %v7734_v33 }
 0x129   :  { %5364 = vmatprep.subr.mxu0 %v9512_v26  ;;  %5354 = vmatpush3.msra.mxu1 %v7743_v18  ;;  %v7962_v53 = vsub.f32 %v161_v49, %v7932_v59  ;;  %v9532_v26 = vand.u32 4294901760, %v7673_v22  ;;  %v140_v22 = vld [vmem:[%s8926_s1 + $0x350] sm:$0xff] }
 0x12a   :  { %2562 = vmatprep.mubr.f32.mxu1 %v9513_v27  ;;  %5365 = vmatpush3.msra.mxu0 %v9514_v10  ;;  %v9535_v10 = vld [vmem:[#allocation24_spill] sm:$0xff] }
 0x12b   :  { %2566 = vmatmul.mubr.f32.vlgmr.msra.gmra.mxu1 %v9515_v6  ;;  %5366 = vmatprep.subr.mxu0 %v9516_v31  ;;  %v9145_v38 = vand.u32 4294901760, %v7962_v53  ;;  %v9536_v6 = vand.u32 4294901760, %v9535_v10  ;;  %v156_v49 = vld [vmem:[%s8926_s1 + $0x3d0] sm:$0xff] }
 0x12c   :  { %5393 = vmatprep.subr.mxu1 %v7243_v61  ;;  %5367 = vmatpush3.msra.mxu0 %v9517_v21  ;;  %v9519_v61 = vand.u32 4294901760, %v7413_v1  ;;  %v7934_v1 = vand.u32 4294901760, %v145_v54 }
 0x12d   :  { %5394 = vmatpush3.msra.mxu1 %v7248_v8  ;;  %5368 = vmatprep.subr.mxu0 %v9518_v62  ;;  %v9520_v8 = vand.u32 4294901760, %v9484_v48 }
 0x12e   :  { %5395 = vmatprep.subr.mxu1 %v7256_v55  ;;  %5369 = vmatpush3.msra.mxu0 %v9519_v61  ;;  %v160_v55 = vld [vmem:[%s8926_s1 + $0x3f0] sm:$0xff] }
 0x12f   :  { %5396 = vmatpush3.msra.mxu1 %v7270_v3  ;;  %5370 = vmatprep.subr.mxu0 %v9520_v8  ;;  %v144_v3 = vld [vmem:[%s8926_s1 + $0x370] sm:$0xff]  ;;  %v7945_v11 = vand.u32 4294901760, %v160_v55  ;;  %v9541_v8 = vand.u32 4294901760, %v7738_v58 }
 0x130   :  { %5397 = vmatprep.subr.mxu1 %v9485_v37  ;;  %5371 = vmatpush3.msra.mxu0 %v9521_v63  ;;  %v7953_v48 = vand.u32 4294901760, %v144_v3  ;;  %v9525_v37 = vand.u32 4294901760, %v7541_v14  ;;  %v143_v14 = vld [vmem:[%s8926_s1 + $0x368] sm:$0xff] }
 0x131   :  { %5398 = vmatpush3.msra.mxu1 %v9486_v23  ;;  %5372 = vmatprep.subr.mxu0 %v9522_v25  ;;  %v7959_v23 = vsub.f32 %v145_v54, %v7934_v1  ;;  %v7996_v51 = vand.u32 4294901760, %v143_v14  ;;  %v9540_v54 = vand.u32 4294901760, %v7680_v32  ;;  %v155_v32 = vld [vmem:[%s8926_s1 + $0x3c8] sm:$0xff]  ;;  %v9543_v25 = vand.u32 4294901760, %v7697_v15 }
 0x132   :  { %5399 = vmatprep.subr.mxu1 %v9488_v45  ;;  %5373 = vmatpush3.msra.mxu0 %v9523_v50  ;;  %v9526_v45 = vand.u32 4294901760, %v9493_v24  ;;  %v9529_v24 = vand.u32 4294901760, %v7631_v46  ;;  %v7988_v12 = vsub.f32 %v144_v3, %v7953_v48  ;;  %v141_v46 = vld [vmem:[%s8926_s1 + $0x358] sm:$0xff]  ;;  %v8065_v50 = vand.u32 4294901760, %v156_v49 }
 0x133   :  { %5400 = vmatpush3.msra.mxu1 %v9490_v34  ;;  %5374 = vmatprep.subr.mxu0 %v9524_v44  ;;  %v158_v34 = vld [vmem:[%s8926_s1 + $0x3e0] sm:$0xff]  ;;  %9531 = vst [vmem:[#allocation11_spill] sm:$0xff] %v7996_v51  ;;  %v8025_v62 = vand.u32 4294901760, %v141_v46  ;;  %v8035_v61 = vsub.f32 %v143_v14, %v7996_v51  ;;  %v9546_v44 = vld [vmem:[#allocation16_spill] sm:$0xff]  ;;  %v9548_v14 = vand.u32 4294901760, %v7757_v0 }
 0x134   :  { %5401 = vmatprep.subr.mxu1 %v9491_v57  ;;  %5375 = vmatpush3.msra.mxu0 %v9525_v37  ;;  %v142_v57 = vld [vmem:[%s8926_s1 + $0x360] sm:$0xff]  ;;  %v8006_v27 = vand.u32 4294901760, %v158_v34  ;;  %9544 = vst [vmem:[#allocation6_spill] sm:$0xff] %v8065_v50  ;;  %v8086_v37 = vand.u32 4294901760, %v155_v32 }
 0x135   :  { %5402 = vmatpush3.msra.mxu1 %v9492_v19  ;;  %5376 = vmatprep.subr.mxu0 %v9526_v45  ;;  %v7982_v19 = vsub.f32 %v160_v55, %v7945_v11  ;;  %9539 = vst [vmem:[#allocation3_spill] sm:$0xff] %v8025_v62  ;;  %v8056_v55 = vand.u32 4294901760, %v140_v22  ;;  %v8079_v15 = vsub.f32 %v141_v46, %v8025_v62  ;;  %v139_v45 = vld [vmem:[%s8926_s1 + $0x348] sm:$0xff] }
 0x136   :  { %5403 = vmatprep.subr.mxu1 %v9494_v20  ;;  %5377 = vmatpush3.msra.mxu0 %v9528_v40  ;;  %v157_v20 = vld [vmem:[%s8926_s1 + $0x3d8] sm:$0xff]  ;;  %9533 = vst [vmem:[#allocation4_spill] sm:$0xff] %v8006_v27  ;;  %v8060_v3 = vsub.f32 %v158_v34, %v8006_v27  ;;  %9547 = vst [vmem:[#allocation17_spill] sm:$0xff] %v8086_v37 }
 0x137   :  { %5404 = vmatpush3.msra.mxu1 %v9495_v5  ;;  %5378 = vmatprep.subr.mxu0 %v9529_v24  ;;  %v9530_v5 = vand.u32 4294901760, %v7611_v28  ;;  %v8008_v28 = vand.u32 4294901760, %v142_v57  ;;  %v8016_v31 = vand.u32 4294901760, %v157_v20  ;;  %v9143_v21 = vand.u32 4294901760, %v7982_v19  ;;  %9542 = vst [vmem:[#allocation5_spill] sm:$0xff] %v8056_v55  ;;  %v138_v24 = vld [vmem:[%s8926_s1 + $0x340] sm:$0xff] }
 0x138   :  { %5405 = vmatprep.subr.mxu1 %v9496_v52  ;;  %v9144_v52 = vand.u32 4294901760, %v7959_v23  ;;  %v8104_v0 = vsub.f32 %v140_v22, %v8056_v55  ;;  %v9146_v10 = vand.u32 4294901760, %v8060_v3 }
 0x139   :  { %5379 = vmatpush3.msra.mxu0 %v9530_v5  ;;  %5406 = vmatpush3.msra.mxu1 %v9497_v29  ;;  %9534 = vst [vmem:[#allocation26_spill] sm:$0xff] %v8008_v28  ;;  %v8011_v29 = vsub.f32 %v159_v2, %v7967_v35  ;;  %9537 = vst [vmem:[#allocation14_spill] sm:$0xff] %v8016_v31  ;;  %v8073_v58 = vsub.f32 %v157_v20, %v8016_v31  ;;  %v9545_v2 = vand.u32 4294901760, %v7753_v56  ;;  %v9549_v56 = vld [vmem:[#allocation29_spill] sm:$0xff]  ;;  %v9550_v20 = vld [vmem:[#allocation28_spill] sm:$0xff] }
 0x13a   :  { %5380 = vmatprep.subr.mxu0 %v9532_v26  ;;  %5407 = vmatprep.subr.mxu1 %v9498_v60  ;;  %v9538_v60 = vand.u32 4294901760, %v7718_v7  ;;  %v8040_v7 = vsub.f32 %v7962_v53, %v9145_v38  ;;  %v9551_v5 = vand.u32 4294901760, %v9550_v20  ;;  %v154_v26 = vld [vmem:[%s8926_s1 + $0x3c0] sm:$0xff]  ;;  %v8129_v20 = vand.u32 4294901760, %v138_v24 }
 0x13b   :  { %5381 = vmatpush3.msra.mxu0 %v9536_v6  ;;  %5408 = vmatpush3.msra.mxu1 %v9499_v17  ;;  %v9142_v17 = vand.u32 4294901760, %v7988_v12  ;;  %v9140_v63 = vand.u32 4294901760, %v8011_v29 }
 0x13c   :  { %5382 = vmatprep.subr.mxu0 %v9538_v60  ;;  %5409 = vmatprep.subr.mxu1 %v9500_v47  ;;  %v8045_v47 = vsub.f32 %v7959_v23, %v9144_v52  ;;  %v9552_v60 = vld [vmem:[#allocation32_spill] sm:$0xff]  ;;  %9558 = vst [vmem:[#allocation19_spill] sm:$0xff] %v8129_v20  ;;  %v9152_v52 = vand.u32 4294901760, %v8104_v0 }
 0x13d   :  { %5383 = vmatpush3.msra.mxu0 %v9540_v54  ;;  %5410 = vmatpush3.msra.mxu1 %v9501_v16  ;;  %v8054_v16 = vsub.f32 %v142_v57, %v8008_v28  ;;  %v9141_v57 = vand.u32 4294901760, %v8035_v61  ;;  %v8109_v46 = vsub.f32 %v8011_v29, %v9140_v63  ;;  %v9553_v54 = vand.u32 4294901760, %v9552_v60  ;;  %v137_v63 = vld [vmem:[%s8926_s1 + $0x338] sm:$0xff] }
 0x13e   :  { %5384 = vmatprep.subr.mxu0 %v9541_v8  ;;  %5411 = vmatprep.subr.mxu1 %v9502_v42  ;;  %v8070_v42 = vsub.f32 %v7982_v19, %v9143_v21  ;;  %v8120_v8 = vand.u32 4294901760, %v139_v45  ;;  %v9149_v60 = vand.u32 4294901760, %v8079_v15 }
 0x13f   :  { %5385 = vmatpush3.msra.mxu0 %v9543_v25  ;;  %5412 = vmatpush3.msra.mxu1 %v9503_v4  ;;  %v8084_v4 = vsub.f32 %v7988_v12, %v9142_v17  ;;  %v9147_v6 = vand.u32 4294901760, %v8054_v16  ;;  %v9148_v25 = vand.u32 4294901760, %v8073_v58  ;;  %v8162_v17 = vsub.f32 %v8060_v3, %v9146_v10 }
 0x140   :  { %5386 = vmatprep.subr.mxu0 %v9545_v2  ;;  %5413 = vmatprep.subr.mxu1 %v9546_v44  ;;  %9555 = vst [vmem:[#allocation27_spill] sm:$0xff] %v8120_v8  ;;  %v8124_v2 = vsub.f32 %v156_v49, %v8065_v50  ;;  %v9556_v44 = vld [vmem:[#allocation23_spill] sm:$0xff]  ;;  %v8143_v49 = vsub.f32 %v8035_v61, %v9141_v57 }
 0x141   :  { %5387 = vmatpush3.msra.mxu0 %v9548_v14  ;;  %5414 = vmatpush3.msra.mxu1 %v9549_v56  ;;  %v9557_v14 = vld [vmem:[#allocation30_spill] sm:$0xff]  ;;  %v8167_v21 = vsub.f32 %v8054_v16, %v9147_v6  ;;  %v8180_v10 = vsub.f32 %v8073_v58, %v9148_v25  ;;  %v136_v6 = vld [vmem:[%s8926_s1 + $0x330] sm:$0xff]  ;;  %v8196_v25 = vsub.f32 %v8079_v15, %v9149_v60  ;;  %v9565_v60 = vld [vmem:[#allocation25_spill] sm:$0xff] }
 0x142   :  { %5388 = vmatprep.subr.mxu0 %v9551_v5  ;;  %5415 = vmatprep.subr.mxu1 %v7595_v41  ;;  %v9554_v41 = vld [vmem:[#allocation31_spill] sm:$0xff]  ;;  %v153_v5 = vld [vmem:[%s8926_s1 + $0x3b8] sm:$0xff]  ;;  %v152_v56 = vld [vmem:[%s8926_s1 + $0x3b0] sm:$0xff] }
 0x143   :  { %5389 = vmatpush3.msra.mxu0 %v9553_v54  ;;  %2732 = vmatprep.mubr.f32.mxu0 %v9554_v41  ;;  %v8136_v54 = vsub.f32 %v155_v32, %v8086_v37  ;;  %v5843_v32 = vld [vmem:[%s8925_s0 + $0xc] ss:$16 sps:$4 sm:$0xff]   ;;  %v8175_v38 = vand.u32 4294901760, %v153_v5 }
 0x144   :  { %5416 = vmatpush3.msra.mxu1 %v9556_v44  ;;  %2734 = vmatmul.mubr.f32.vlgmr.msra.gmra.mxu0 %v9557_v14  ;;  %v8145_v44 = vand.u32 4294901760, %v154_v26  ;;  %v230_v40 = vrot.slane %v5843_v32, %v9565_v60 }
 0x145   :  { %9559 = vst [vmem:[#allocation20_spill] sm:$0xff] %v8136_v54  ;;  %5417 = vmatprep.subr.mxu1 %v7655_v13  ;;  %5428 = vmatprep.subr.mxu0 %v7932_v59  ;;  %v5844_v13 = vld [vmem:[%s8925_s0 + $0x2c] ss:$16 sps:$4 sm:$0xff]   ;;  %9561 = vst [vmem:[#allocation7_spill] sm:$0xff] %v8175_v38 }
 0x146   :  { %9560 = vst [vmem:[#allocation18_spill] sm:$0xff] %v8145_v44  ;;  %5418 = vmatpush3.msra.mxu1 %v7625_v43  ;;  %5429 = vmatpush3.msra.mxu0 %v7934_v1  ;;  %v8173_v43 = vsub.f32 %v139_v45, %v8120_v8  ;;  %v8191_v45 = vand.u32 4294901760, %v137_v63  ;;  %v8209_v34 = vsub.f32 %v154_v26, %v8145_v44  ;;  %v9569_v26 = vand.u32 4294901760, %v8136_v54 }
 0x147   :  { %5419 = vmatprep.subr.mxu1 %v9507_v30  ;;  %5430 = vmatprep.subr.mxu0 %v7945_v11  ;;  %v8189_v30 = vsub.f32 %v138_v24, %v8129_v20  ;;  %v135_v24 = vld [vmem:[%s8926_s1 + $0x328] sm:$0xff]  ;;  %v244_v57 = vrot.slane %v5844_v13, %v9565_v60  ;;  %v9568_v60 = vand.u32 4294901760, %v8124_v2 }
 0x148   :  { %5420 = vmatpush3.msra.mxu1 %v7644_v36  ;;  %5431 = vmatpush3.msra.mxu0 %v7953_v48  ;;  %9563 = vst [vmem:[#allocation8_spill] sm:$0xff] %v8191_v45  ;;  %9564 = vst [vmem:[#allocation12_spill] sm:$0xff] %v8209_v34  ;;  %v8217_v36 = vand.u32 4294901760, %v136_v6  ;;  %v151_v13 = vld [vmem:[%s8926_s1 + $0x3a8] sm:$0xff]  ;;  %v8246_v22 = vsub.f32 %v8136_v54, %v9569_v26 }
 0x149   :  { %9562 = vst [vmem:[#allocation22_spill] sm:$0xff] %v8189_v30  ;;  %5421 = vmatprep.subr.mxu1 %v7711_v39  ;;  %5432 = vmatprep.subr.mxu0 %v7967_v35  ;;  %v8222_v35 = vsub.f32 %v8104_v0, %v9152_v52  ;;  %v8232_v32 = vsub.f32 %v8124_v2, %v9568_v60  ;;  %v8248_v60 = vand.u32 4294901760, %v135_v24  ;;  %v150_v39 = vld [vmem:[%s8926_s1 + $0x3a0] sm:$0xff]  ;;  %v9574_v52 = vand.u32 4294901760, %v8045_v47 }
 0x14a   :  { %5422 = vmatpush3.msra.mxu1 %v7725_v9  ;;  %5433 = vmatpush3.msra.mxu0 %v7996_v51  ;;  %9566 = vst [vmem:[#allocation10_spill] sm:$0xff] %v8217_v36  ;;  %v8227_v9 = vand.u32 4294901760, %v152_v56  ;;  %v9571_v51 = vand.u32 4294901760, %v8040_v7  ;;  %v8268_v54 = vsub.f32 %v136_v6, %v8217_v36  ;;  %v9577_v47 = vand.u32 4294901760, %v8070_v42 }
 0x14b   :  { %5423 = vmatprep.subr.mxu1 %v7734_v33  ;;  %5434 = vmatprep.subr.mxu0 %v8006_v27  ;;  %v8241_v33 = vsub.f32 %v137_v63, %v8191_v45  ;;  %9570 = vst [vmem:[#allocation13_spill] sm:$0xff] %v8248_v60  ;;  %v248_v27 = vcombine.high %v230_v40, %v244_v57  ;;  %v3107_v7 = vand.u32 4294901760, %v8232_v32  ;;  %v149_v32 = vld [vmem:[%s8926_s1 + $0x398] sm:$0xff]  ;;  %v9579_v42 = vand.u32 4294901760, %v8209_v34 }
 0x14c   :  { %9567 = vst [vmem:[#allocation15_spill] sm:$0xff] %v8227_v9  ;;  %5424 = vmatpush3.msra.mxu1 %v7743_v18  ;;  %2836 = vmatprep.mubr.f32.mxu1 %v9554_v41  ;;  %v134_v18 = vld [vmem:[%s8926_s1 + $0x320] sm:$0xff]  ;;  %v8257_v41 = vsub.f32 %v153_v5, %v8175_v38  ;;  %9572 = vst [vmem:[#allocation21_spill] sm:$0xff] %v8268_v54  ;;  %v247_v63 = vcombine.low %v230_v40, %v244_v57  ;;  %v8285_v5 = vand.u32 4294901760, %v150_v39  ;;  %v132_v40 = vld [vmem:[%s8926_s1 + $0x310] sm:$0xff] }
 0x14d   :  { %5435 = vmatpush3.msra.mxu0 %v8008_v28  ;;  %2838 = vmatmul.mubr.f32.vlgmr.msra.gmra.mxu1 %v9557_v14  ;;  %v8271_v28 = vand.u32 4294901760, %v151_v13  ;;  %v133_v14 = vld [vmem:[%s8926_s1 + $0x318] sm:$0xff]  ;;  %v8287_v26 = vand.u32 4294901760, %v134_v18  ;;  %v8297_v57 = vsub.f32 %v135_v24, %v8248_v60  ;;  %v9580_v24 = vand.u32 4294901760, %v8189_v30 }
 0x14e   :  { %5436 = vmatprep.subr.mxu0 %v8016_v31  ;;  %5463 = vmatprep.subr.mxu1 %v9571_v51  ;;  %v9575_v51 = vand.u32 4294901760, %v8173_v43  ;;  %v8319_v31 = vand.u32 4294901760, %v133_v14 }
 0x14f   :  { %9573 = vst [vmem:[#allocation24_spill] sm:$0xff] %v8271_v28  ;;  %5437 = vmatpush3.msra.mxu0 %v8025_v62  ;;  %5464 = vmatpush3.msra.mxu1 %v9574_v52  ;;  %9576 = vst [vmem:[#allocation16_spill] sm:$0xff] %v8287_v26  ;;  %v8304_v62 = vsub.f32 %v152_v56, %v8227_v9  ;;  %v8317_v52 = vsub.f32 %v8189_v30, %v9580_v24  ;;  %v148_v56 = vld [vmem:[%s8926_s1 + $0x390] sm:$0xff]  ;;  %v9584_v30 = vand.u32 4294901760, %v8143_v49 }
 0x150   :  { %v8283_v6 = vsub.f32 %v8173_v43, %v9575_v51  ;;  %5438 = vmatprep.subr.mxu0 %v8065_v50  ;;  %5465 = vmatprep.subr.mxu1 %v9577_v47  ;;  %v9578_v50 = vand.u32 4294901760, %v8084_v4  ;;  %v8312_v47 = vsub.f32 %v8209_v34, %v9579_v42  ;;  %v8324_v51 = vand.u32 4294901760, %v248_v27 }
 0x151   :  { %5439 = vmatpush3.msra.mxu0 %v8056_v55  ;;  %v8330_v42 = vand.u32 4294901760, %v132_v40  ;;  %v8333_v24 = vsub.f32 %v151_v13, %v8271_v28  ;;  %v8335_v55 = vand.u32 4294901760, %v247_v63  ;;  %v9586_v13 = vand.u32 4294901760, %v8162_v17 }
 0x152   :  { %5466 = vmatpush3.msra.mxu1 %v9578_v50  ;;  %9581 = vst [vmem:[#allocation29_spill] sm:$0xff] %v8324_v51  ;;  %5440 = vmatprep.subr.mxu0 %v8086_v37  ;;  %v9582_v50 = vand.u32 4294901760, %v8109_v46  ;;  %v3002_v34 = vand.u32 4294901760, %v8283_v6  ;;  %v8342_v37 = vsub.f32 %v134_v18, %v8287_v26  ;;  %v8344_v46 = vand.u32 4294901760, %v149_v32  ;;  %v147_v18 = vld [vmem:[%s8926_s1 + $0x388] sm:$0xff] }
 0x153   :  { %9583 = vst [vmem:[#allocation28_spill] sm:$0xff] %v8335_v55  ;;  %5441 = vmatpush3.msra.mxu0 %v8120_v8  ;;  %v9587_v4 = vand.u32 4294901760, %v8257_v41  ;;  %v8355_v49 = vand.u32 4294901760, %v148_v56  ;;  %v8362_v6 = vsub.f32 %v150_v39, %v8285_v5  ;;  %v9589_v17 = vand.u32 4294901760, %v8167_v21  ;;  %3180 = vmatprep.mubr.f32.mxu1 %v8324_v51 }
 0x154   :  { %5467 = vmatprep.subr.mxu1 %v9582_v50  ;;  %9585 = vst [vmem:[#allocation32_spill] sm:$0xff] %v8342_v37  ;;  %5442 = vmatprep.subr.mxu0 %v8145_v44  ;;  %v8370_v50 = vsub.f32 %v133_v14, %v8319_v31  ;;  %v8376_v44 = vsub.f32 %v248_v27, %v8324_v51  ;;  %v9590_v39 = vand.u32 4294901760, %v8180_v10  ;;  %v9591_v21 = vand.u32 4294901760, %v8241_v33  ;;  %v130_v27 = vld [vmem:[%s8926_s1 + $0x300] sm:$0xff] }
 0x155   :  { %5468 = vmatpush3.msra.mxu1 %v9584_v30  ;;  %v8353_v8 = vsub.f32 %v8257_v41, %v9587_v4  ;;  %9588 = vst [vmem:[#allocation31_spill] sm:$0xff] %v8355_v49  ;;  %5443 = vmatpush3.msra.mxu0 %v8129_v20  ;;  %v3009_v4 = vand.u32 4294901760, %v8317_v52  ;;  %v131_v30 = vld [vmem:[%s8926_s1 + $0x308] sm:$0xff]  ;;  %v8385_v52 = vsub.f32 %v132_v40, %v8330_v42  ;;  %v9593_v40 = vand.u32 4294901760, %v8268_v54  ;;  %v9629_v51 = vld [vmem:[#allocation10_spill] sm:$0xff] }
 0x156   :  { %5469 = vmatprep.subr.mxu1 %v9586_v13  ;;  %v3121_v13 = vand.u32 4294901760, %v8312_v47  ;;  %5444 = vmatprep.subr.mxu0 %v8175_v38  ;;  %v3015_v47 = vsub.f32 %v8241_v33, %v9591_v21  ;;  %v8395_v10 = vsub.f32 %v247_v63, %v8335_v55  ;;  %v8403_v14 = vand.u32 4294901760, %v147_v18 }
 0x157   :  { %5470 = vmatpush3.msra.mxu1 %v9589_v17  ;;  %v146_v17 = vld [vmem:[%s8926_s1 + $0x380] sm:$0xff]  ;;  %5445 = vmatpush3.msra.mxu0 %v8191_v45  ;;  %v3022_v21 = vsub.f32 %v8268_v54, %v9593_v40  ;;  %v8407_v20 = vsub.f32 %v149_v32, %v8344_v46  ;;  %v3128_v63 = vand.u32 4294901760, %v8353_v8  ;;  %v9594_v45 = vand.u32 4294901760, %v8304_v62 }
 0x158   :  { %5471 = vmatprep.subr.mxu1 %v9590_v39  ;;  %v9592_v39 = vand.u32 4294901760, %v8196_v25  ;;  %5446 = vmatprep.subr.mxu0 %v8227_v9  ;;  %v9595_v38 = vand.u32 4294901760, %v8222_v35  ;;  %v8420_v32 = vand.u32 4294901760, %v146_v17  ;;  %v8422_v54 = vand.u32 4294901760, %v130_v27 }
 0x159   :  { %v3134_v25 = vsub.f32 %v8304_v62, %v9594_v45  ;;  %5447 = vmatpush3.msra.mxu0 %v8217_v36  ;;  %v8426_v8 = vsub.f32 %v148_v56, %v8355_v49  ;;  %v9596_v45 = vand.u32 4294901760, %v8246_v22  ;;  %v3016_v40 = vand.u32 4294901760, %v3015_v47 }
 0x15a   :  { %5472 = vmatpush3.msra.mxu1 %v9592_v39  ;;  %v8414_v39 = vand.u32 4294901760, %v131_v30  ;;  %5448 = vmatprep.subr.mxu0 %v8271_v28  ;;  %v9597_v36 = vand.u32 4294901760, %v8333_v24  ;;  %v9598_v56 = vand.u32 4294901760, %v8297_v57  ;;  %v8442_v47 = vsub.f32 %v147_v18, %v8403_v14 }
 0x15b   :  { %5473 = vmatprep.subr.mxu1 %v3107_v7  ;;  %5449 = vmatpush3.msra.mxu0 %v8248_v60  ;;  %v3023_v7 = vand.u32 4294901760, %v3022_v21  ;;  %v9599_v9 = vand.u32 4294901760, %v8362_v6  ;;  %v9601_v18 = vand.u32 4294901760, %v8376_v44 }
 0x15c   :  { %5474 = vmatpush3.msra.mxu1 %v9595_v38  ;;  %v3141_v35 = vsub.f32 %v8333_v24, %v9597_v36  ;;  %v9193_v38 = vand.u32 4294901760, %v8342_v37  ;;  %v3029_v28 = vsub.f32 %v8297_v57, %v9598_v56  ;;  %5450 = vmatprep.subr.mxu0 %v8285_v5  ;;  %v3135_v36 = vand.u32 4294901760, %v3134_v25 }
 0x15d   :  { %5475 = vmatprep.subr.mxu1 %v9596_v45  ;;  %v8446_v45 = vsub.f32 %v131_v30, %v8414_v39  ;;  %5451 = vmatpush3.msra.mxu0 %v8287_v26  ;;  %v8454_v56 = vsub.f32 %v130_v27, %v8422_v54  ;;  %v8461_v30 = vsub.f32 %v146_v17, %v8420_v32  ;;  %v9603_v27 = vand.u32 4294901760, %v8395_v10 }
 0x15e   :  { %5476 = vmatpush3.msra.mxu1 %v3002_v34  ;;  %v3148_v34 = vsub.f32 %v8362_v6, %v9599_v9  ;;  %5452 = vmatprep.subr.mxu0 %v8344_v46  ;;  %v3142_v9 = vand.u32 4294901760, %v3141_v35  ;;  %v9604_v17 = vand.u32 4294901760, %v8407_v20 }
 0x15f   :  { %5477 = vmatprep.subr.mxu1 %v3121_v13  ;;  %9600 = vst [vmem:[#allocation23_spill] sm:$0xff] %v8454_v56  ;;  %v2942_v13 = vsub.f32 %v8376_v44, %v9601_v18  ;;  %9602 = vst [vmem:[#allocation30_spill] sm:$0xff] %v8461_v30  ;;  %v2948_v21 = vsub.f32 %v8395_v10, %v9603_v27  ;;  %5453 = vmatpush3.msra.mxu0 %v8319_v31  ;;  %v3030_v18 = vand.u32 4294901760, %v3029_v28 }
 0x160   :  { %5478 = vmatpush3.msra.mxu1 %v3009_v4  ;;  %v3036_v4 = vsub.f32 %v8342_v37, %v9193_v38  ;;  %v3155_v25 = vsub.f32 %v8407_v20, %v9604_v17  ;;  %5454 = vmatprep.subr.mxu0 %v8355_v49  ;;  %v3149_v35 = vand.u32 4294901760, %v3148_v34  ;;  %v9605_v38 = vand.u32 4294901760, %v8370_v50 }
 0x161   :  { %5479 = vmatprep.subr.mxu1 %v3128_v63  ;;  %5455 = vmatpush3.msra.mxu0 %v8330_v42  ;;  %v2943_v28 = vand.u32 4294901760, %v2942_v13  ;;  %v9197_v63 = vand.u32 4294901760, %v8461_v30  ;;  %v2949_v34 = vand.u32 4294901760, %v2948_v21  ;;  %v9607_v49 = vand.u32 4294901760, %v8385_v52 }
 0x162   :  { %5480 = vmatpush3.msra.mxu1 %v3016_v40  ;;  %v3043_v27 = vsub.f32 %v8370_v50, %v9605_v38  ;;  %v9606_v40 = vand.u32 4294901760, %v8426_v8  ;;  %5456 = vmatprep.subr.mxu0 %v8403_v14  ;;  %v9196_v22 = vand.u32 4294901760, %v8454_v56  ;;  %v9608_v13 = vand.u32 4294901760, %v8442_v47 }
 0x163   :  { %5481 = vmatprep.subr.mxu1 %v3135_v36  ;;  %v3037_v36 = vand.u32 4294901760, %v3036_v4  ;;  %v3050_v38 = vsub.f32 %v8385_v52, %v9607_v49  ;;  %5457 = vmatpush3.msra.mxu0 %v8414_v39  ;;  %v9609_v21 = vand.u32 4294901760, %v8446_v45 }
 0x164   :  { %5482 = vmatpush3.msra.mxu1 %v3023_v7  ;;  %v3162_v17 = vsub.f32 %v8426_v8, %v9606_v40  ;;  %v3156_v7 = vand.u32 4294901760, %v3155_v25  ;;  %v3169_v40 = vsub.f32 %v8442_v47, %v9608_v13  ;;  %5458 = vmatprep.subr.mxu0 %v8420_v32  ;;  %v3176_v25 = vsub.f32 %v8461_v30, %v9197_v63  ;;  %v9613_v13 = vld [vmem:[#allocation12_spill] sm:$0xff] }
 0x165   :  { %5483 = vmatprep.subr.mxu1 %v3142_v9  ;;  %v3044_v9 = vand.u32 4294901760, %v3043_v27  ;;  %v3057_v4 = vsub.f32 %v8446_v45, %v9609_v21  ;;  %5459 = vmatpush3.msra.mxu0 %v8422_v54  ;;  %v9616_v21 = vld [vmem:[#allocation26_spill] sm:$0xff]  ;;  %v9627_v63 = vld [vmem:[#allocation8_spill] sm:$0xff] }
 0x166   :  { %5484 = vmatpush3.msra.mxu1 %v3030_v18  ;;  %2944 = vmatprep.mubr.f32.mxu0 %v2943_v28  ;;  %v3163_v49 = vand.u32 4294901760, %v3162_v17  ;;  %v3051_v18 = vand.u32 4294901760, %v3050_v38  ;;  %v3170_v27 = vand.u32 4294901760, %v3169_v40  ;;  %v3177_v17 = vand.u32 4294901760, %v3176_v25  ;;  %v9611_v38 = vld [vmem:[#allocation9_spill] sm:$0xff]  ;;  %v9614_v40 = vld [vmem:[#allocation4_spill] sm:$0xff] }
 0x167   :  { %5485 = vmatprep.subr.mxu1 %v3149_v35  ;;  %2950 = vmatmul.mubr.f32.vlgmr.msra.gmra.mxu0 %v2949_v34  ;;  %v3064_v35 = vsub.f32 %v8454_v56, %v9196_v22  ;;  %v3058_v28 = vand.u32 4294901760, %v3057_v4  ;;  %v9610_v34 = vld [vmem:[#allocation20_spill] sm:$0xff]  ;;  %v9617_v4 = vld [vmem:[#allocation14_spill] sm:$0xff]  ;;  %v9626_v22 = vld [vmem:[#allocation7_spill] sm:$0xff] }
 0x168   :  { %5486 = vmatpush3.msra.mxu1 %v3037_v36  ;;  %5498 = vmatprep.subr.mxu0 %v7962_v53  ;;  %v9619_v25 = vld [vmem:[#allocation6_spill] sm:$0xff] }
 0x169   :  { %5487 = vmatprep.subr.mxu1 %v3156_v7  ;;  %5499 = vmatpush3.msra.mxu0 %v7959_v23  ;;  %v3065_v36 = vand.u32 4294901760, %v3064_v35  ;;  %v9612_v7 = vld [vmem:[#allocation11_spill] sm:$0xff]  ;;  %v9621_v35 = vld [vmem:[#allocation5_spill] sm:$0xff] }
 0x16a   :  { %5488 = vmatpush3.msra.mxu1 %v3044_v9  ;;  %5500 = vmatprep.subr.mxu0 %v7982_v19  ;;  %v9615_v9 = vld [vmem:[#allocation22_spill] sm:$0xff] }
 0x16b   :  { %5489 = vmatprep.subr.mxu1 %v3163_v49  ;;  %5501 = vmatpush3.msra.mxu0 %v7988_v12  ;;  %v9618_v49 = vld [vmem:[#allocation3_spill] sm:$0xff] }
 0x16c   :  { %5490 = vmatpush3.msra.mxu1 %v3051_v18  ;;  %5502 = vmatprep.subr.mxu0 %v8011_v29  ;;  %v9620_v18 = vld [vmem:[#allocation21_spill] sm:$0xff] }
 0x16d   :  { %5491 = vmatprep.subr.mxu1 %v3170_v27  ;;  %5503 = vmatpush3.msra.mxu0 %v8035_v61  ;;  %v9622_v27 = vld [vmem:[#allocation17_spill] sm:$0xff] }
 0x16e   :  { %5492 = vmatpush3.msra.mxu1 %v3058_v28  ;;  %5504 = vmatprep.subr.mxu0 %v8060_v3  ;;  %v9623_v28 = vld [vmem:[#allocation27_spill] sm:$0xff] }
 0x16f   :  { %5493 = vmatprep.subr.mxu1 %v3177_v17  ;;  %5505 = vmatpush3.msra.mxu0 %v8054_v16  ;;  %v9624_v17 = vld [vmem:[#allocation18_spill] sm:$0xff] }
 0x170   :  { %5494 = vmatpush3.msra.mxu1 %v3065_v36  ;;  %5506 = vmatprep.subr.mxu0 %v8073_v58  ;;  %v9625_v36 = vld [vmem:[#allocation19_spill] sm:$0xff] }
 0x171   :  { %3182 = vmatmul.mubr.f32.vlgmr.msra.gmra.mxu1 %v8335_v55  ;;  %5533 = vmatprep.subr.mxu1 %v7932_v59  ;;  %v9628_v55 = vld [vmem:[#allocation15_spill] sm:$0xff] }
 0x172   :  { %5507 = vmatpush3.msra.mxu0 %v8079_v15  ;;  %5534 = vmatpush3.msra.mxu1 %v7934_v1 }
 0x173   :  { %5508 = vmatprep.subr.mxu0 %v8124_v2  ;;  %5535 = vmatprep.subr.mxu1 %v7945_v11 }
 0x174   :  { %5509 = vmatpush3.msra.mxu0 %v8104_v0  ;;  %5536 = vmatpush3.msra.mxu1 %v7953_v48 }
 0x175   :  { %5510 = vmatprep.subr.mxu0 %v9610_v34  ;;  %5537 = vmatprep.subr.mxu1 %v9611_v38 }
 0x176   :  { %5511 = vmatpush3.msra.mxu0 %v8173_v43  ;;  %5538 = vmatpush3.msra.mxu1 %v9612_v7 }
 0x177   :  { %5512 = vmatprep.subr.mxu0 %v9613_v13  ;;  %5539 = vmatprep.subr.mxu1 %v9614_v40 }
 0x178   :  { %5513 = vmatpush3.msra.mxu0 %v9615_v9  ;;  %5540 = vmatpush3.msra.mxu1 %v9616_v21 }
 0x179   :  { %5514 = vmatprep.subr.mxu0 %v8257_v41  ;;  %5541 = vmatprep.subr.mxu1 %v9617_v4 }
 0x17a   :  { %5515 = vmatpush3.msra.mxu0 %v8241_v33  ;;  %5542 = vmatpush3.msra.mxu1 %v9618_v49 }
 0x17b   :  { %5516 = vmatprep.subr.mxu0 %v8304_v62  ;;  %5543 = vmatprep.subr.mxu1 %v9619_v25 }
 0x17c   :  { %5517 = vmatpush3.msra.mxu0 %v9620_v18  ;;  %5544 = vmatpush3.msra.mxu1 %v9621_v35 }
 0x17d   :  { %5518 = vmatprep.subr.mxu0 %v8333_v24  ;;  %5545 = vmatprep.subr.mxu1 %v9622_v27 }
 0x17e   :  { %5519 = vmatpush3.msra.mxu0 %v8297_v57  ;;  %5546 = vmatpush3.msra.mxu1 %v9623_v28 }
 0x17f   :  { %5520 = vmatprep.subr.mxu0 %v8362_v6  ;;  %5547 = vmatprep.subr.mxu1 %v9624_v17 }
 0x180   :  { %5521 = vmatpush3.msra.mxu0 %v8342_v37  ;;  %5548 = vmatpush3.msra.mxu1 %v9625_v36  ;;  %v9630_v37 = vld [vmem:[#allocation24_spill] sm:$0xff] }
 0x181   :  { %5522 = vmatprep.subr.mxu0 %v8407_v20  ;;  %5549 = vmatprep.subr.mxu1 %v9626_v22 }
 0x182   :  { %5523 = vmatpush3.msra.mxu0 %v8370_v50  ;;  %5550 = vmatpush3.msra.mxu1 %v9627_v63 }
 0x183   :  { %5524 = vmatprep.subr.mxu0 %v8426_v8  ;;  %5551 = vmatprep.subr.mxu1 %v9628_v55 }
 0x184   :  { %5525 = vmatpush3.msra.mxu0 %v8385_v52  ;;  %5552 = vmatpush3.msra.mxu1 %v9629_v51 }
 0x185   :  { %5526 = vmatprep.subr.mxu0 %v8442_v47  ;;  %5553 = vmatprep.subr.mxu1 %v9630_v37  ;;  %v9631_v37 = vand.u32 4294901760, %v7962_v53  ;;  %v9636_v53 = vand.u32 4294901760, %v8011_v29  ;;  %v9641_v29 = vand.u32 4294901760, %v8395_v10 }
 0x186   :  { %5527 = vmatpush3.msra.mxu0 %v8446_v45  ;;  %5554 = vmatpush3.msra.mxu1 %v8248_v60  ;;  %v9632_v60 = vand.u32 4294901760, %v7959_v23  ;;  %v9637_v23 = vand.u32 4294901760, %v8035_v61  ;;  %v9643_v61 = vand.u32 4294901760, %v8079_v15  ;;  %v9651_v15 = vand.u32 4294901760, %v8241_v33  ;;  %v9657_v33 = vld [vmem:[#allocation32_spill] sm:$0xff] }
 0x187   :  { %5528 = vmatprep.subr.mxu0 %v8461_v30  ;;  %5555 = vmatprep.subr.mxu1 %v8285_v5  ;;  %v9633_v30 = vld [vmem:[#allocation31_spill] sm:$0xff] }
 0x188   :  { %5529 = vmatpush3.msra.mxu0 %v8454_v56  ;;  %3317 = vmatprep.mubr.f32.mxu0 %v8376_v44  ;;  %v9634_v56 = vand.u32 4294901760, %v7982_v19  ;;  %v9638_v19 = vand.u32 4294901760, %v8060_v3  ;;  %v9644_v3 = vand.u32 4294901760, %v8124_v2  ;;  %v9653_v2 = vand.u32 4294901760, %v9620_v18 }
 0x189   :  { %5556 = vmatpush3.msra.mxu1 %v8287_v26  ;;  %3320 = vmatmul.mubr.f32.vlgmr.msra.gmra.mxu0 %v8395_v10  ;;  %v9635_v26 = vand.u32 4294901760, %v7988_v12  ;;  %v9639_v12 = vand.u32 4294901760, %v8376_v44  ;;  %v9654_v44 = vand.u32 4294901760, %v8333_v24  ;;  %v9661_v24 = vand.u32 4294901760, %v8426_v8  ;;  %v9664_v10 = vld [vmem:[#allocation24_spill] sm:$0xff] }
 0x18a   :  { %5557 = vmatprep.subr.mxu1 %v8344_v46  ;;  %5568 = vmatprep.subr.mxu0 %v9631_v37  ;;  %v9640_v37 = vand.u32 4294901760, %v8054_v16  ;;  %v9645_v16 = vand.u32 4294901760, %v8104_v0  ;;  %v9652_v0 = vand.u32 4294901760, %v8304_v62  ;;  %v9656_v62 = vand.u32 4294901760, %v8362_v6 }
 0x18b   :  { %5558 = vmatpush3.msra.mxu1 %v8319_v31  ;;  %5569 = vmatpush3.msra.mxu0 %v9632_v60  ;;  %v9642_v60 = vand.u32 4294901760, %v8073_v58  ;;  %v9646_v58 = vand.u32 4294901760, %v9610_v34  ;;  %v9662_v6 = vand.u32 4294901760, %v8385_v52 }
 0x18c   :  { %5559 = vmatprep.subr.mxu1 %v9633_v30  ;;  %5570 = vmatprep.subr.mxu0 %v9634_v56  ;;  %v9667_v56 = vld [vmem:[#allocation30_spill] sm:$0xff] }
 0x18d   :  { %5560 = vmatpush3.msra.mxu1 %v8330_v42  ;;  %5571 = vmatpush3.msra.mxu0 %v9635_v26  ;;  %v9659_v26 = vand.u32 4294901760, %v8407_v20  ;;  %v9663_v20 = vand.u32 4294901760, %v8442_v47  ;;  %v9668_v8 = vand.u32 4294901760, %v9667_v56  ;;  %v9673_v47 = vld [vmem:[#allocation28_spill] sm:$0xff] }
 0x18e   :  { %5561 = vmatprep.subr.mxu1 %v8403_v14  ;;  %5572 = vmatprep.subr.mxu0 %v9636_v53 }
 0x18f   :  { %5562 = vmatpush3.msra.mxu1 %v8414_v39  ;;  %5573 = vmatpush3.msra.mxu0 %v9637_v23  ;;  %v4865_v23 = vpop.f32.mrf.mxu1 }
 0x190   :  { %5563 = vmatprep.subr.mxu1 %v8420_v32  ;;  %5574 = vmatprep.subr.mxu0 %v9638_v19 }
 0x191   :  { %5564 = vmatpush3.msra.mxu1 %v8422_v54  ;;  %3424 = vmatprep.mubr.f32.mxu1 %v9639_v12  ;;  %v4866_v12 = vpop.f32.mrf.mxu1 }
 0x192   :  { %5575 = vmatpush3.msra.mxu0 %v9640_v37  ;;  %3428 = vmatmul.mubr.f32.vlgmr.msra.gmra.mxu1 %v9641_v29 }
 0x193   :  { %5576 = vmatprep.subr.mxu0 %v9642_v60  ;;  %5603 = vmatprep.subr.mxu1 %v7932_v59  ;;  %v9647_v59 = vand.u32 4294901760, %v8173_v43  ;;  %v9655_v43 = vand.u32 4294901760, %v8297_v57  ;;  %v9660_v57 = vand.u32 4294901760, %v8370_v50  ;;  %v9665_v50 = vand.u32 4294901760, %v8446_v45  ;;  %v4935_v29 = vpop.f32.mrf.mxu1 }
 0x194   :  { %5577 = vmatpush3.msra.mxu0 %v9643_v61  ;;  %5604 = vmatpush3.msra.mxu1 %v7934_v1  ;;  %v9648_v1 = vand.u32 4294901760, %v9613_v13 }
 0x195   :  { %5578 = vmatprep.subr.mxu0 %v9644_v3  ;;  %5605 = vmatprep.subr.mxu1 %v7945_v11  ;;  %v9649_v11 = vand.u32 4294901760, %v9615_v9  ;;  %v4936_v61 = vpop.f32.mrf.mxu1 }
 0x196   :  { %5579 = vmatpush3.msra.mxu0 %v9645_v16  ;;  %5606 = vmatpush3.msra.mxu1 %v7953_v48  ;;  %v9650_v48 = vand.u32 4294901760, %v8257_v41  ;;  %v9658_v41 = vand.u32 4294901760, %v9657_v33 }
 0x197   :  { %5580 = vmatprep.subr.mxu0 %v9646_v58  ;;  %5607 = vmatprep.subr.mxu1 %v9611_v38  ;;  %v5005_v16 = vpop.f32.mrf.mxu1 }
 0x198   :  { %5581 = vmatpush3.msra.mxu0 %v9647_v59  ;;  %5608 = vmatpush3.msra.mxu1 %v9612_v7 }
 0x199   :  { %5582 = vmatprep.subr.mxu0 %v9648_v1  ;;  %5609 = vmatprep.subr.mxu1 %v9614_v40  ;;  %v5006_v59 = vpop.f32.mrf.mxu1 }
 0x19a   :  { %5583 = vmatpush3.msra.mxu0 %v9649_v11  ;;  %5610 = vmatpush3.msra.mxu1 %v9616_v21 }
 0x19b   :  { %5584 = vmatprep.subr.mxu0 %v9650_v48  ;;  %5611 = vmatprep.subr.mxu1 %v9617_v4  ;;  %v5856_v4 = vmov 0.0   ;;  %v5075_v11 = vpop.f32.mrf.mxu1 }
 0x19c   :  { %5585 = vmatpush3.msra.mxu0 %v9651_v15  ;;  %5612 = vmatpush3.msra.mxu1 %v9618_v49 }
 0x19d   :  { %5586 = vmatprep.subr.mxu0 %v9652_v0  ;;  %5613 = vmatprep.subr.mxu1 %v9619_v25  ;;  %v5076_v15 = vpop.f32.mrf.mxu1 }
 0x19e   :  { %5587 = vmatpush3.msra.mxu0 %v9653_v2  ;;  %5614 = vmatpush3.msra.mxu1 %v9621_v35  ;;  %v4793_v2 = vld [vmem:[%s8927_s2] ss:$0 sm:$0xff] }
 0x19f   :  { %5588 = vmatprep.subr.mxu0 %v9654_v44  ;;  %5615 = vmatprep.subr.mxu1 %v9622_v27 }
 0x1a0   :  { %5589 = vmatpush3.msra.mxu0 %v9655_v43  ;;  %5616 = vmatpush3.msra.mxu1 %v9623_v28  ;;  %v5145_v43 = vpop.f32.mrf.mxu1 }
 0x1a1   :  { %5590 = vmatprep.subr.mxu0 %v9656_v62  ;;  %5617 = vmatprep.subr.mxu1 %v9624_v17 }
 0x1a2   :  { %5591 = vmatpush3.msra.mxu0 %v9658_v41  ;;  %5618 = vmatpush3.msra.mxu1 %v9625_v36  ;;  %v4830_v36 = vpop.f32.mrf.mxu0  ;;  %v4867_v41 = vadd.f32 %v4866_v12, %v4865_v23 }
 0x1a3   :  { %5592 = vmatprep.subr.mxu0 %v9659_v26  ;;  %5619 = vmatprep.subr.mxu1 %v9626_v22  ;;  %v9666_v22 = vld [vmem:[#allocation13_spill] sm:$0xff]  ;;  %v5146_v26 = vpop.f32.mrf.mxu1 }
 0x1a4   :  { %5593 = vmatpush3.msra.mxu0 %v9660_v57  ;;  %5620 = vmatpush3.msra.mxu1 %v9627_v63  ;;  %v9671_v63 = vld [vmem:[#allocation29_spill] sm:$0xff]  ;;  %v4831_v53 = vpop.f32.mrf.mxu0 }
 0x1a5   :  { %5594 = vmatprep.subr.mxu0 %v9661_v24  ;;  %5621 = vmatprep.subr.mxu1 %v9628_v55  ;;  %v9669_v55 = vld [vmem:[#allocation23_spill] sm:$0xff]  ;;  %v4832_v0 = vadd.f32 %v4831_v53, %v4830_v36 }
 0x1a6   :  { %5595 = vmatpush3.msra.mxu0 %v9662_v6  ;;  %5622 = vmatpush3.msra.mxu1 %v9629_v51  ;;  %v9670_v52 = vand.u32 4294901760, %v9669_v55  ;;  %v9672_v51 = vld [vmem:[#allocation16_spill] sm:$0xff]  ;;  %v4900_v19 = vpop.f32.mrf.mxu0  ;;  %v5215_v6 = vpop.f32.mrf.mxu1 }
 0x1a7   :  { %5596 = vmatprep.subr.mxu0 %v9663_v20  ;;  %5623 = vmatprep.subr.mxu1 %v9664_v10  ;;  %v366_v33 = vadd.f32 %v4832_v0, %v4793_v2  ;;  %v4937_v10 = vadd.f32 %v4936_v61, %v4935_v29 }
 0x1a8   :  { %5597 = vmatpush3.msra.mxu0 %v9665_v50  ;;  %5624 = vmatpush3.msra.mxu1 %v9666_v22  ;;  %v4901_v37 = vpop.f32.mrf.mxu0 }
 0x1a9   :  { %5598 = vmatprep.subr.mxu0 %v9668_v8  ;;  %5625 = vmatprep.subr.mxu1 %v8285_v5  ;;  %v3715_v5 = vld [vmem:[%s8928_s3 + $0x18] sm:$0xff]  ;;  %v4902_v57 = vadd.f32 %v4901_v37, %v4900_v19  ;;  %v598_v20 = vadd.f32 %v4867_v41, %v366_v33  ;;  %v5216_v8 = vpop.f32.mrf.mxu1 }
 0x1aa   :  { %5599 = vmatpush3.msra.mxu0 %v9670_v52  ;;  %3594 = vmatprep.mubr.f32.mxu0 %v9671_v63  ;;  %v4970_v60 = vpop.f32.mrf.mxu0  ;;  %v5007_v52 = vadd.f32 %v5006_v59, %v5005_v16  ;;  %v5217_v12 = vadd.f32 %v5216_v8, %v5215_v6 }
 0x1ab   :  { %5626 = vmatpush3.msra.mxu1 %v9672_v51  ;;  %3596 = vmatmul.mubr.f32.vlgmr.msra.gmra.mxu0 %v9673_v47  ;;  %v736_v22 = vadd.f32 %v4902_v57, %v598_v20 }
 0x1ac   :  { %5627 = vmatprep.subr.mxu1 %v8344_v46  ;;  %3698 = vmatprep.mubr.f32.mxu1 %v9671_v63  ;;  %v8681_v46 = vand.u32 4294901760, %v3715_v5  ;;  %v4971_v3 = vpop.f32.mrf.mxu0 }
 0x1ad   :  { %5628 = vmatpush3.msra.mxu1 %v8319_v31  ;;  %v3714_v31 = vld [vmem:[%s8928_s3 + $0x10] sm:$0xff]  ;;  %5698 = vmatprep.subr.mxu0 %v5856_v4  ;;  %v4972_v56 = vadd.f32 %v4971_v3, %v4970_v60  ;;  %v844_v55 = vadd.f32 %v4937_v10, %v736_v22 }
 0x1ae   :  { %5629 = vmatprep.subr.mxu1 %v9633_v30  ;;  %v3712_v30 = vld [vmem:[%s8928_s3] sm:$0xff]  ;;  %5699 = vmatpush3.msra.mxu0 %v8681_v46  ;;  %v5040_v58 = vpop.f32.mrf.mxu0 }
 0x1af   :  { %5630 = vmatpush3.msra.mxu1 %v8330_v42  ;;  %v8687_v42 = vsub.f32 %v3715_v5, %v8681_v46  ;;  %v8710_v13 = vand.u32 4294901760, %v3712_v30  ;;  %5700 = vmatprep.subr.mxu0 %v5856_v4 }
 0x1b0   :  { %5631 = vmatprep.subr.mxu1 %v8403_v14  ;;  %v8689_v14 = vand.u32 4294901760, %v3714_v31  ;;  %5706 = vmatprep.mubr.msk.f32.mxu0 %vm5857_vm0, %v5856_v4  ;;  %v5041_v1 = vpop.f32.mrf.mxu0 }
 0x1b1   :  { %5632 = vmatpush3.msra.mxu1 %v8414_v39  ;;  %v3833_v39 = vand.u32 4294901760, %v8687_v42  ;;  %v8718_v49 = vsub.f32 %v3712_v30, %v8710_v13  ;;  %v5042_v5 = vadd.f32 %v5041_v1, %v5040_v58  ;;  %v5077_v30 = vadd.f32 %v5076_v15, %v5075_v11 }
 0x1b2   :  { %5633 = vmatprep.subr.mxu1 %v8420_v32  ;;  %v8696_v32 = vsub.f32 %v3714_v31, %v8689_v14  ;;  %5701 = vmatpush3.msra.mxu0 %v8689_v14  ;;  %v5110_v48 = vpop.f32.mrf.mxu0 }
 0x1b3   :  { %5634 = vmatpush3.msra.mxu1 %v8422_v54  ;;  %v3713_v54 = vld [vmem:[%s8928_s3 + $0x8] sm:$0xff]  ;;  %v3834_v34 = vsub.f32 %v8687_v42, %v3833_v39  ;;  %v3854_v35 = vand.u32 4294901760, %v8718_v49  ;;  %5702 = vmatprep.subr.mxu0 %v5856_v4 }
 0x1b4   :  { %3700 = vmatmul.mubr.f32.vlgmr.msra.gmra.mxu1 %v9673_v47  ;;  %v8698_v45 = vand.u32 4294901760, %v3713_v54  ;;  %v3840_v38 = vand.u32 4294901760, %v8696_v32  ;;  %5709 = vmatprep.subr.mxu1 %v5856_v4  ;;  %v5111_v44 = vpop.f32.mrf.mxu0  ;;  %v1012_v47 = vadd.f32 %v4972_v56, %v844_v55 }
 0x1b5   :  { %v3835_v40 = vand.u32 4294901760, %v3834_v34  ;;  %v3855_v28 = vsub.f32 %v8718_v49, %v3854_v35  ;;  %5717 = vmatprep.mubr.msk.f32.mxu1 %vm5857_vm0, %v5856_v4 }
 0x1b6   :  { %v8708_v7 = vsub.f32 %v3713_v54, %v8698_v45  ;;  %v3841_v9 = vsub.f32 %v8696_v32, %v3840_v38  ;;  %5703 = vmatpush3.msra.mxu0 %v8698_v45  ;;  %v5180_v62 = vpop.f32.mrf.mxu0  ;;  %v1116_v54 = vadd.f32 %v5007_v52, %v1012_v47 }
 0x1b7   :  { %5710 = vmatpush3.msra.mxu1 %v3835_v40  ;;  %v3856_v17 = vand.u32 4294901760, %v3855_v28  ;;  %5704 = vmatprep.subr.mxu0 %v5856_v4  ;;  %v5147_v28 = vadd.f32 %v5146_v26, %v5145_v43 }
 0x1b8   :  { %v3847_v21 = vand.u32 4294901760, %v8708_v7  ;;  %v3842_v25 = vand.u32 4294901760, %v3841_v9  ;;  %5711 = vmatprep.subr.mxu1 %v5856_v4  ;;  %5705 = vmatpush3.msra.mxu0 %v8710_v13  ;;  %v5181_v24 = vpop.f32.mrf.mxu0  ;;  %v1228_v40 = vadd.f32 %v5042_v5, %v1116_v54  ;;  %v5112_v9 = vadd.f32 %v5111_v44, %v5110_v48 }
 0x1b9   :  { %5720 = vmatprep.subr.mxu0 %v5856_v4  ;;  %v5182_v53 = vadd.f32 %v5181_v24, %v5180_v62 }
 0x1ba   :  { %v3848_v18 = vsub.f32 %v8708_v7, %v3847_v21  ;;  %5712 = vmatpush3.msra.mxu1 %v3842_v25 }
 0x1bb   :  { %5713 = vmatprep.subr.mxu1 %v5856_v4 }
 0x1bc   :  { %v3849_v27 = vand.u32 4294901760, %v3848_v18 }
 0x1be   :  { %5714 = vmatpush3.msra.mxu1 %v3849_v27  ;;  %v1460_v27 = vadd.f32 %v5077_v30, %v1228_v40 }
 0x1bf   :  { %5715 = vmatprep.subr.mxu1 %v5856_v4  ;;  %v5250_v50 = vpop.f32.mrf.mxu0 }
 0x1c0   :  { %5716 = vmatpush3.msra.mxu1 %v3856_v17  ;;  %v1598_v36 = vadd.f32 %v5112_v9, %v1460_v27 }
 0x1c1   :  { %5731 = vmatprep.subr.mxu1 %v5856_v4  ;;  %v5251_v63 = vpop.f32.mrf.mxu0 }
 0x1c2   :  { %v1706_v19 = vadd.f32 %v5147_v28, %v1598_v36  ;;  %v5252_v61 = vadd.f32 %v5251_v63, %v5250_v50 }
 0x1c4   :  { %v1874_v60 = vadd.f32 %v5182_v53, %v1706_v19 }
 0x1c6   :  { %v1978_v16 = vadd.f32 %v5217_v12, %v1874_v60 }
 0x1c8   :  { %v2090_v1 = vadd.f32 %v5252_v61, %v1978_v16 }
 0x1ca   :  { %v5285_v51 = vpop.f32.mrf.mxu1 }
 0x1cc   :  { %v5286_v34 = vpop.f32.mrf.mxu1 }
 0x1cd   :  { %v5287_v58 = vadd.f32 %v5286_v34, %v5285_v51 }
 0x1cf   :  { %v2322_v0 = vadd.f32 %v5287_v58, %v2090_v1 }
 0x1e2   :  { %v5320_v31 = vpop.f32.mrf.mxu0 }
 0x1e4   :  { %v5321_v25 = vpop.f32.mrf.mxu0 }
 0x1e5   :  { %v5322_v11 = vadd.f32 %v5321_v25, %v5320_v31 }
 0x1e7   :  { %v2460_v43 = vadd.f32 %v5322_v11, %v2322_v0 }
 0x1eb   :  { %v5355_v18 = vpop.f32.mrf.mxu1 }
 0x1ed   :  { %v5356_v23 = vpop.f32.mrf.mxu1 }
 0x1ee   :  { %v5357_v2 = vadd.f32 %v5356_v23, %v5355_v18 }
 0x1f0   :  { %v2568_v41 = vadd.f32 %v5357_v2, %v2460_v43 }
 0x204   :  { %v5390_v17 = vpop.f32.mrf.mxu0 }
 0x206   :  { %v5391_v37 = vpop.f32.mrf.mxu0 }
 0x207   :  { %v5392_v62 = vadd.f32 %v5391_v37, %v5390_v17 }
 0x209   :  { %v2736_v6 = vadd.f32 %v5392_v62, %v2568_v41 }
 0x20d   :  { %v5425_v29 = vpop.f32.mrf.mxu1 }
 0x20f   :  { %v5426_v59 = vpop.f32.mrf.mxu1 }
 0x210   :  { %v5427_v26 = vadd.f32 %v5426_v59, %v5425_v29 }
 0x212   :  { %v2840_v50 = vadd.f32 %v5427_v26, %v2736_v6 }
 0x227   :  { %v5460_v3 = vpop.f32.mrf.mxu0 }
 0x229   :  { %v5461_v48 = vpop.f32.mrf.mxu0 }
 0x22a   :  { %v5462_v20 = vadd.f32 %v5461_v48, %v5460_v3 }
 0x22c   :  { %v2952_v8 = vadd.f32 %v5462_v20, %v2840_v50 }
 0x231   :  { %v5495_v15 = vpop.f32.mrf.mxu1 }
 0x233   :  { %v5496_v33 = vpop.f32.mrf.mxu1 }
 0x234   :  { %v5497_v22 = vadd.f32 %v5496_v33, %v5495_v15 }
 0x236   :  { %v3184_v63 = vadd.f32 %v5497_v22, %v2952_v8 }
 0x249   :  { %v5530_v44 = vpop.f32.mrf.mxu0 }
 0x24b   :  { %v5531_v57 = vpop.f32.mrf.mxu0 }
 0x24c   :  { %v5532_v55 = vadd.f32 %v5531_v57, %v5530_v44  ;;  %v4795_v57 = vld [vmem:[%s8929_s4] ss:$0 sm:$0xff] }
 0x24e   :  { %v3322_v47 = vadd.f32 %v5532_v55, %v3184_v63 }
 0x252   :  { %v5565_v24 = vpop.f32.mrf.mxu1 }
 0x254   :  { %v5566_v56 = vpop.f32.mrf.mxu1 }
 0x255   :  { %v5567_v51 = vadd.f32 %v5566_v56, %v5565_v24 }
 0x257   :  { %v3430_v54 = vadd.f32 %v5567_v51, %v3322_v47 }
 0x26b   :  { %v5600_v10 = vpop.f32.mrf.mxu0 }
 0x26d   :  { %v5601_v52 = vpop.f32.mrf.mxu0 }
 0x26e   :  { %v5602_v5 = vadd.f32 %v5601_v52, %v5600_v10 }
 0x270   :  { %v3598_v34 = vadd.f32 %v5602_v5, %v3430_v54 }
 0x274   :  { %v5635_v31 = vpop.f32.mrf.mxu1 }
 0x276   :  { %v5636_v30 = vpop.f32.mrf.mxu1 }
 0x277   :  { %v5637_v40 = vadd.f32 %v5636_v30, %v5635_v31 }
 0x279   :  { %v3702_v9 = vadd.f32 %v5637_v40, %v3598_v34 }
 0x27b   :  { %v3706_v25 = vmul.f32 1.442695, %v3702_v9  ;;  %vm3705_vm1 = vcmp.gt.f32.partialorder %v3702_v9, 0.0 }
 0x27d   :  { %5845 = vpow2.f32 %v3706_v25 }
 0x28a   :  { %v5846_v18 = vpop.eup %5845 }
 0x28b   :  { %v4794_v27 = vadd.f32 -1.0, %v5846_v18 }
 0x28d   :  { %v3709_v28 = vmul.f32 1.6732632, %v4794_v27 }
 0x28f   :  { %v3710_v17 = vsel %vm3705_vm1, %v3702_v9, %v3709_v28 }
 0x290   :  { %v3711_v36 = vmul.f32 1.050701, %v3710_v17 }
 0x292   :  { %v3725_v53 = vsel %vm3723_vm2, %v3711_v36, 0 }
 0x293   :  { %v3796_v23 = vand.u32 4294901760, %v3725_v53 }
 0x295   :  { %v3797_v19 = vsub.f32 %v3725_v53, %v3796_v23  ;;  %5718 = vmatmul.mubr.f32.vlgmr.msra.gmra.mxu1 %v3796_v23 }
 0x296   :  { %5732 = vmatpush3.msra.mxu1 %v8681_v46  ;;  %5739 = vmatprep.mubr.msk.f32.mxu1 %vm5857_vm0, %v5856_v4 }
 0x297   :  { %5733 = vmatprep.subr.mxu1 %v5856_v4  ;;  %v3798_v12 = vand.u32 4294901760, %v3797_v19 }
 0x298   :  { %5734 = vmatpush3.msra.mxu1 %v8689_v14 }
 0x299   :  { %5735 = vmatprep.subr.mxu1 %v5856_v4  ;;  %v3799_v37 = vsub.f32 %v3797_v19, %v3798_v12 }
 0x29a   :  { %5736 = vmatpush3.msra.mxu1 %v8698_v45 }
 0x29b   :  { %5737 = vmatprep.subr.mxu1 %v5856_v4  ;;  %v3800_v29 = vand.u32 4294901760, %v3799_v37  ;;  %v4797_v37 = vld [vmem:[%s8931_s6] ss:$0 sm:$0xff] }
 0x29c   :  { %5738 = vmatpush3.msra.mxu1 %v8710_v13 }
 0x29d   :  { %5740 = vmatmul.mubr.f32.vlgmr.msra.gmra.mxu1 %v3798_v12  ;;  %5753 = vmatprep.subr.mxu1 %v5856_v4 }
 0x29e   :  { %5707 = vmatmul.mubr.f32.vlgmr.msra.gmra.mxu0 %v3800_v29  ;;  %5754 = vmatpush3.msra.mxu1 %v8681_v46  ;;  %v4222_v46 = vld [vmem:[%s8930_s5 + $0x18] sm:$0xff] }
 0x29f   :  { %5721 = vmatpush3.msra.mxu0 %v8687_v42  ;;  %5755 = vmatprep.subr.mxu1 %v5856_v4  ;;  %v8799_v42 = vand.u32 4294901760, %v4222_v46 }
 0x2a0   :  { %5722 = vmatprep.subr.mxu0 %v5856_v4  ;;  %5756 = vmatpush3.msra.mxu1 %v8689_v14  ;;  %v4221_v14 = vld [vmem:[%s8930_s5 + $0x10] sm:$0xff] }
 0x2a1   :  { %5723 = vmatpush3.msra.mxu0 %v8696_v32  ;;  %5757 = vmatprep.subr.mxu1 %v5856_v4  ;;  %v8807_v32 = vand.u32 4294901760, %v4221_v14 }
 0x2a2   :  { %5724 = vmatprep.subr.mxu0 %v5856_v4  ;;  %5758 = vmatpush3.msra.mxu1 %v8698_v45  ;;  %v4220_v45 = vld [vmem:[%s8930_s5 + $0x8] sm:$0xff] }
 0x2a3   :  { %5725 = vmatpush3.msra.mxu0 %v8708_v7  ;;  %5759 = vmatprep.subr.mxu1 %v5856_v4  ;;  %v8816_v7 = vsub.f32 %v4221_v14, %v8807_v32 }
 0x2a4   :  { %5726 = vmatprep.subr.mxu0 %v5856_v4  ;;  %5728 = vmatprep.mubr.msk.f32.mxu0 %vm5857_vm0, %v5856_v4 }
 0x2a5   :  { %5727 = vmatpush3.msra.mxu0 %v8718_v49  ;;  %5760 = vmatpush3.msra.mxu1 %v8710_v13  ;;  %v8818_v13 = vand.u32 4294901760, %v4220_v45 }
 0x2a6   :  { %5761 = vmatprep.mubr.msk.f32.mxu1 %vm5857_vm0, %v5856_v4  ;;  %5729 = vmatmul.mubr.f32.vlgmr.msra.gmra.mxu0 %v3797_v19 }
 0x2a7   :  { %5742 = vmatprep.subr.mxu0 %v5856_v4  ;;  %5762 = vmatmul.mubr.f32.vlgmr.msra.gmra.mxu1 %v3796_v23  ;;  %v8830_v60 = vsub.f32 %v4220_v45, %v8818_v13  ;;  %v9674_v45 = vlaneseq }
 0x2a8   :  { %5743 = vmatpush3.msra.mxu0 %v3833_v39  ;;  %5750 = vmatprep.mubr.msk.f32.mxu0 %vm5857_vm0, %v5856_v4  ;;  %v8805_v39 = vsub.f32 %v4222_v46, %v8799_v42 }
 0x2a9   :  { %5744 = vmatprep.subr.mxu0 %v5856_v4  ;;  %5775 = vmatprep.subr.mxu1 %v5856_v4  ;;  %v4353_v58 = vand.u32 4294901760, %v8830_v60 }
 0x2aa   :  { %5745 = vmatpush3.msra.mxu0 %v3840_v38  ;;  %5783 = vmatprep.mubr.msk.f32.mxu1 %vm5857_vm0, %v5856_v4  ;;  %v4339_v38 = vand.u32 4294901760, %v8805_v39 }
 0x2ab   :  { %5746 = vmatprep.subr.mxu0 %v5856_v4  ;;  %v4354_v11 = vsub.f32 %v8830_v60, %v4353_v58 }
 0x2ac   :  { %5747 = vmatpush3.msra.mxu0 %v3847_v21  ;;  %v4219_v21 = vld [vmem:[%s8930_s5] sm:$0xff]  ;;  %v4340_v49 = vsub.f32 %v8805_v39, %v4339_v38 }
 0x2ad   :  { %5748 = vmatprep.subr.mxu0 %v5856_v4  ;;  %v8832_v61 = vand.u32 4294901760, %v4219_v21  ;;  %v4355_v15 = vand.u32 4294901760, %v4354_v11 }
 0x2ae   :  { %5749 = vmatpush3.msra.mxu0 %v3854_v35  ;;  %v4346_v35 = vand.u32 4294901760, %v8816_v7  ;;  %v4341_v3 = vand.u32 4294901760, %v4340_v49 }
 0x2af   :  { %5751 = vmatmul.mubr.f32.vlgmr.msra.gmra.mxu0 %v3796_v23  ;;  %5764 = vmatprep.subr.mxu0 %v5856_v4  ;;  %v8841_v59 = vsub.f32 %v4219_v21, %v8832_v61 }
 0x2b0   :  { %5772 = vmatprep.mubr.msk.f32.mxu0 %vm5857_vm0, %v5856_v4  ;;  %5765 = vmatpush3.msra.mxu0 %v8799_v42  ;;  %v4347_v16 = vsub.f32 %v8816_v7, %v4346_v35 }
 0x2b1   :  { %5766 = vmatprep.subr.mxu0 %v5856_v4  ;;  %5776 = vmatpush3.msra.mxu1 %v4341_v3  ;;  %v4360_v48 = vand.u32 4294901760, %v8841_v59 }
 0x2b2   :  { %5767 = vmatpush3.msra.mxu0 %v8807_v32  ;;  %v4348_v1 = vand.u32 4294901760, %v4347_v16  ;;  %5777 = vmatprep.subr.mxu1 %v5856_v4 }
 0x2b3   :  { %5768 = vmatprep.subr.mxu0 %v5856_v4  ;;  %v4361_v0 = vsub.f32 %v8841_v59, %v4360_v48 }
 0x2b4   :  { %5769 = vmatpush3.msra.mxu0 %v8818_v13  ;;  %5778 = vmatpush3.msra.mxu1 %v4348_v1 }
 0x2b5   :  { %5770 = vmatprep.subr.mxu0 %v5856_v4  ;;  %5779 = vmatprep.subr.mxu1 %v5856_v4  ;;  %v4362_v2 = vand.u32 4294901760, %v4361_v0 }
 0x2b6   :  { %5771 = vmatpush3.msra.mxu0 %v8832_v61  ;;  %5780 = vmatpush3.msra.mxu1 %v4355_v15 }
 0x2b7   :  { %5786 = vmatprep.subr.mxu0 %v5856_v4  ;;  %5781 = vmatprep.subr.mxu1 %v5856_v4 }
 0x2b8   :  { %5782 = vmatpush3.msra.mxu1 %v4362_v2 }
 0x2b9   :  { %5797 = vmatprep.subr.mxu1 %v5856_v4 }
 0x355   :  { %v3893_v44 = vpop.f32.mrf.mxu1 }
 0x357   :  { %v5719_v43 = vpop.f32.mrf.mxu1 }
 0x35d   :  { %v4050_v62 = vpop.f32.mrf.mxu1 }
 0x35e   :  { %v3802_v33 = vpop.f32.mrf.mxu0 }
 0x35f   :  { %v5741_v41 = vpop.f32.mrf.mxu1  ;;  %v3803_v24 = vadd.f32 %v4795_v57, %v3802_v33 }
 0x360   :  { %v5708_v26 = vpop.f32.mrf.mxu0 }
 0x361   :  { %v3894_v10 = vadd.f32 %v3893_v44, %v3803_v24 }
 0x366   :  { %v3973_v6 = vpop.f32.mrf.mxu0 }
 0x367   :  { %v4208_v20 = vpop.f32.mrf.mxu1  ;;  %v3974_v56 = vadd.f32 %v3973_v6, %v3894_v10 }
 0x368   :  { %v5730_v50 = vpop.f32.mrf.mxu0 }
 0x369   :  { %v5763_v22 = vpop.f32.mrf.mxu1  ;;  %v4051_v8 = vadd.f32 %v4050_v62, %v3974_v56 }
 0x36f   :  { %v4133_v55 = vpop.f32.mrf.mxu0 }
 0x370   :  { %v4134_v52 = vadd.f32 %v4133_v55, %v4051_v8 }
 0x371   :  { %v5752_v63 = vpop.f32.mrf.mxu0 }
 0x372   :  { %v4209_v51 = vadd.f32 %v4208_v20, %v4134_v52 }
 0x374   :  { %v4213_v47 = vmul.f32 1.442695, %v4209_v51  ;;  %vm4212_vm3 = vcmp.gt.f32.partialorder %v4209_v51, 0.0 }
 0x376   :  { %5847 = vpow2.f32 %v4213_v47 }
 0x383   :  { %v5848_v5 = vpop.eup %5847 }
 0x384   :  { %v4796_v31 = vadd.f32 -1.0, %v5848_v5 }
 0x386   :  { %v4216_v54 = vmul.f32 1.6732632, %v4796_v31 }
 0x388   :  { %v4217_v30 = vsel %vm4212_vm3, %v4209_v51, %v4216_v54 }
 0x389   :  { %v4218_v34 = vmul.f32 1.050701, %v4217_v30 }
 0x38b   :  { %v4231_v40 = vsel %vm3723_vm2, %v4218_v34, 0 }
 0x38c   :  { %v4302_v9 = vand.u32 4294901760, %v4231_v40 }
 0x38e   :  { %v4303_v25 = vsub.f32 %v4231_v40, %v4302_v9  ;;  %5784 = vmatmul.mubr.f32.vlgmr.msra.gmra.mxu1 %v4302_v9 }
 0x38f   :  { %5798 = vmatpush3.msra.mxu1 %v8799_v42  ;;  %5805 = vmatprep.mubr.msk.f32.mxu1 %vm5857_vm0, %v5856_v4 }
 0x390   :  { %5799 = vmatprep.subr.mxu1 %v5856_v4  ;;  %v4304_v18 = vand.u32 4294901760, %v4303_v25 }
 0x391   :  { %5800 = vmatpush3.msra.mxu1 %v8807_v32 }
 0x392   :  { %5801 = vmatprep.subr.mxu1 %v5856_v4  ;;  %v4305_v27 = vsub.f32 %v4303_v25, %v4304_v18 }
 0x393   :  { %5802 = vmatpush3.msra.mxu1 %v8818_v13 }
 0x394   :  { %5803 = vmatprep.subr.mxu1 %v5856_v4  ;;  %v4306_v28 = vand.u32 4294901760, %v4305_v27 }
 0x395   :  { %5804 = vmatpush3.msra.mxu1 %v8832_v61 }
 0x396   :  { %5806 = vmatmul.mubr.f32.vlgmr.msra.gmra.mxu1 %v4304_v18  ;;  %5819 = vmatprep.subr.mxu1 %v5856_v4 }
 0x397   :  { %5773 = vmatmul.mubr.f32.vlgmr.msra.gmra.mxu0 %v4306_v28  ;;  %5820 = vmatpush3.msra.mxu1 %v8799_v42 }
 0x398   :  { %5787 = vmatpush3.msra.mxu0 %v8805_v39  ;;  %5821 = vmatprep.subr.mxu1 %v5856_v4 }
 0x399   :  { %5788 = vmatprep.subr.mxu0 %v5856_v4  ;;  %5822 = vmatpush3.msra.mxu1 %v8807_v32 }
 0x39a   :  { %5789 = vmatpush3.msra.mxu0 %v8816_v7  ;;  %5823 = vmatprep.subr.mxu1 %v5856_v4 }
 0x39b   :  { %5790 = vmatprep.subr.mxu0 %v5856_v4  ;;  %5824 = vmatpush3.msra.mxu1 %v8818_v13 }
 0x39c   :  { %5791 = vmatpush3.msra.mxu0 %v8830_v60  ;;  %5825 = vmatprep.subr.mxu1 %v5856_v4 }
 0x39d   :  { %5792 = vmatprep.subr.mxu0 %v5856_v4  ;;  %5794 = vmatprep.mubr.msk.f32.mxu0 %vm5857_vm0, %v5856_v4 }
 0x39e   :  { %5793 = vmatpush3.msra.mxu0 %v8841_v59  ;;  %5826 = vmatpush3.msra.mxu1 %v8832_v61 }
 0x39f   :  { %5827 = vmatprep.mubr.msk.f32.mxu1 %vm5857_vm0, %v5856_v4  ;;  %5795 = vmatmul.mubr.f32.vlgmr.msra.gmra.mxu0 %v4303_v25 }
 0x3a0   :  { %5808 = vmatprep.subr.mxu0 %v5856_v4  ;;  %5828 = vmatmul.mubr.f32.vlgmr.msra.gmra.mxu1 %v4302_v9 }
 0x3a1   :  { %5809 = vmatpush3.msra.mxu0 %v4339_v38  ;;  %5816 = vmatprep.mubr.msk.f32.mxu0 %vm5857_vm0, %v5856_v4  ;;  %v4719_v38 = vand.u32 127, %v9674_v45 }
 0x3a2   :  { %5810 = vmatprep.subr.mxu0 %v5856_v4 }
 0x3a3   :  { %5811 = vmatpush3.msra.mxu0 %v4346_v35  ;;  %vm4721_vm4 = vcmp.ge.s32.totalorder %v4719_v38, 5  ;;  %vm4722_vm5 = vcmp.lt.s32.totalorder %v4719_v38, 15  ;;  %vm4720_vm7 = vcmp.lt.s32.totalorder %v4719_v38, 5  ;;  %vm4724_vm8 = vcmp.eq.s32.totalorder %v4719_v38, 15 }
 0x3a4   :  { %5812 = vmatprep.subr.mxu0 %v5856_v4  ;;  %vm8906_vm6 = vmand %vm4721_vm4, %vm4722_vm5 }
 0x3a5   :  { %5813 = vmatpush3.msra.mxu0 %v4353_v58 }
 0x3a6   :  { %5814 = vmatprep.subr.mxu0 %v5856_v4 }
 0x3a7   :  { %5815 = vmatpush3.msra.mxu0 %v4360_v48 }
 0x3a8   :  { %5817 = vmatmul.mubr.f32.vlgmr.msra.gmra.mxu0 %v4302_v9 }
 0x44e   :  { %v4399_v17 = vpop.f32.mrf.mxu1 }
 0x450   :  { %v5785_v36 = vpop.f32.mrf.mxu1 }
 0x456   :  { %v4556_v53 = vpop.f32.mrf.mxu1 }
 0x457   :  { %v4308_v23 = vpop.f32.mrf.mxu0 }
 0x458   :  { %v5807_v19 = vpop.f32.mrf.mxu1  ;;  %v4309_v29 = vadd.f32 %v4797_v37, %v4308_v23 }
 0x459   :  { %v5774_v12 = vpop.f32.mrf.mxu0 }
 0x45a   :  { %v4400_v14 = vadd.f32 %v4399_v17, %v4309_v29 }
 0x45f   :  { %v4479_v46 = vpop.f32.mrf.mxu0 }
 0x460   :  { %v4714_v42 = vpop.f32.mrf.mxu1  ;;  %v4480_v32 = vadd.f32 %v4479_v46, %v4400_v14 }
 0x461   :  { %v5796_v39 = vpop.f32.mrf.mxu0 }
 0x462   :  { %v5829_v4 = vpop.f32.mrf.mxu1  ;;  %v4557_v7 = vadd.f32 %v4556_v53, %v4480_v32 }
 0x468   :  { %v4639_v13 = vpop.f32.mrf.mxu0 }
 0x469   :  { %v4640_v21 = vadd.f32 %v4639_v13, %v4557_v7 }
 0x46a   :  { %v5818_v49 = vpop.f32.mrf.mxu0 }
 0x46b   :  { %v4715_v60 = vadd.f32 %v4714_v42, %v4640_v21 }
 0x46d   :  { %v4728_v61 = vsel %vm8906_vm6, %v4715_v60, -inf  ;;  %v4725_v3 = vsel %vm4720_vm7, %v4715_v60, -inf  ;;  %v4749_v24 = vsel %vm4724_vm8, %v4715_v60, 0.0 }
 0x46e   :  { %4729 = vmax.xlane.f32.xlu0 %v4728_v61 }
 0x472   :  { %4726 = vmax.xlane.f32.xlu0 %v4725_v3 }
 0x4f7   :  { %v4730_v16 = vpop.xlane.xlu0 %4729 }
 0x4f8   :  { %v4731_v58 = vsel %vm8906_vm6, %v4730_v16, inf }
 0x4fb   :  { %v4727_v59 = vpop.xlane.xlu0 %4726 }
 0x4fc   :  { %v4732_v1 = vsel %vm4720_vm7, %v4727_v59, %v4731_v58 }
 0x4fd   :  { %v4733_v11 = vsub.f32 %v4715_v60, %v4732_v1 }
 0x4ff   :  { %v4734_v48 = vmul.f32 1.442695, %v4733_v11 }
 0x501   :  { %5849 = vpow2.f32 %v4734_v48 }
 0x50e   :  { %v5850_v15 = vpop.eup %5849 }
 0x50f   :  { %v4739_v0 = vsel %vm8906_vm6, %v5850_v15, 0.0  ;;  %v4736_v2 = vsel %vm4720_vm7, %v5850_v15, 0.0 }
 0x510   :  { %4740 = vadd.xlane.f32.xlu1 %v4739_v0 }
 0x514   :  { %4737 = vadd.xlane.f32.xlu1 %v4736_v2 }
 0x599   :  { %v4741_v44 = vpop.xlane.xlu1 %4740 }
 0x59a   :  { %5851 = vrcp.f32 %v4741_v44 }
 0x59d   :  { %v4738_v43 = vpop.xlane.xlu1 %4737 }
 0x59e   :  { %5853 = vrcp.f32 %v4738_v43 }
 0x5a7   :  { %v5852_v62 = vpop.eup %5851 }
 0x5a8   :  { %v4746_v41 = vsel %vm8906_vm6, %v5852_v62, 0.0 }
 0x5ab   :  { %v5854_v33 = vpop.eup %5853 }
 0x5ac   :  { %v4747_v26 = vsel %vm4720_vm7, %v5854_v33, %v4746_v41 }
 0x5ad   :  { %v4748_v57 = vmul.f32 %v5850_v15, %v4747_v26 }
 0x5af   :  { %v4750_v6 = vadd.f32 %v4749_v24, %v4748_v57 }
 0x5b1   :  { %4751 = vst [vmem:[#allocation2] sm:$0xff] %v4750_v6 }
 0x5b8   :  { %v4770_v20 = vld [vmem:[#allocation2] sm:$0x3] }
 0x5b9   :  { %4771 = vst [vmem:[%s8932_s7] sm:$0x3] %v4770_v20 }

</bundles_post_ra>
